<compile_context>
chip_gen: v7x
topology: tpu7x:2x2x1
jax: 0.10.0
libtpu: 0.0.40
codegen_flags: <defaults>
</compile_context>

<pallas_src>
import functools

import jax
import jax.numpy as jnp
from jax.experimental import pallas as pl
from jax.experimental.pallas import tpu as pltpu

_LN_EPS = 1e-5  # matches nn.LayerNorm default


# ----------------------------------------------------------------------------------
# In-kernel helpers (bf16 MXU matmuls with f32 accumulation, f32 vector math)
# ----------------------------------------------------------------------------------

def _mm(a, b):
    """(M, K) @ (K, N) -> (M, N) f32, MXU in bf16."""
    return jax.lax.dot_general(
        a.astype(jnp.bfloat16), b.astype(jnp.bfloat16),
        dimension_numbers=(((1,), (0,)), ((), ())),
        preferred_element_type=jnp.float32)


def _mm_t(a, b):
    """(M, K) @ (N, K)^T -> (M, N) f32, MXU in bf16 (contract minor dims)."""
    return jax.lax.dot_general(
        a.astype(jnp.bfloat16), b.astype(jnp.bfloat16),
        dimension_numbers=(((1,), (1,)), ((), ())),
        preferred_element_type=jnp.float32)


def _ln(x, g, b):
    """LayerNorm over the last (lane) dim, f32."""
    mu = jnp.mean(x, axis=-1, keepdims=True)
    var = jnp.mean(jnp.square(x - mu), axis=-1, keepdims=True)
    return (x - mu) * jax.lax.rsqrt(var + _LN_EPS) * g + b


# ----------------------------------------------------------------------------------
# Kernel 1: temporal patch embed + positional embeddings (fused), grid over samples
# ----------------------------------------------------------------------------------

def _embed_kernel(x_ref, w_ref, b_ref, pos_ref, o_ref):
    x = x_ref[0].astype(jnp.float32)                       # (S, t_patch*C)
    y = _mm(x, w_ref[...]) + b_ref[...].astype(jnp.float32)
    y = y + pos_ref[...].astype(jnp.float32)               # pos_t + pos_s, precombined
    o_ref[0] = y.astype(o_ref.dtype)


def embed_tokens(x_tok, w, b, pos):
    """x_tok: (N, S, Cin), w: (Cin, D), b: (D,), pos: (S, D) -> (N, S, D)."""
    N, S, Cin = x_tok.shape
    D = w.shape[1]
    return pl.pallas_call(
        _embed_kernel,
        out_shape=jax.ShapeDtypeStruct((N, S, D), x_tok.dtype),
        grid=(N,),
        in_specs=[
            pl.BlockSpec((1, S, Cin), lambda n: (n, 0, 0)),
            pl.BlockSpec((Cin, D), lambda n: (0, 0)),       # VMEM-resident weights
            pl.BlockSpec((1, D), lambda n: (0, 0)),
            pl.BlockSpec((S, D), lambda n: (0, 0)),
        ],
        out_specs=pl.BlockSpec((1, S, D), lambda n: (n, 0, 0)),
        compiler_params=pltpu.CompilerParams(dimension_semantics=("parallel",)),
    )(x_tok, w, b.reshape(1, D), pos)


# ----------------------------------------------------------------------------------
# Kernel 2: one full transformer block (pre-LN attention + pre-LN MLP), per sample
# ----------------------------------------------------------------------------------

def _block_kernel(x_ref, ln1g_ref, ln1b_ref, qkvw_ref, qkvb_ref,
                  projw_ref, projb_ref, ln2g_ref, ln2b_ref,
                  fc1w_ref, fc1b_ref, fc2w_ref, fc2b_ref, o_ref,
                  *, num_heads, head_dim, scale):
    x = x_ref[0].astype(jnp.float32)                        # (S, D)
    S, D = x.shape

    # ---- attention sub-block: LN1 -> fused QKV matmul -> per-head attn -> out-proj ----
    h = _ln(x, ln1g_ref[...].astype(jnp.float32), ln1b_ref[...].astype(jnp.float32))
    qkv = _mm(h, qkvw_ref[...]) + qkvb_ref[...].astype(jnp.float32)   # (S, 3D)
    pw = projw_ref[...]                                               # (D, D)

    attn = jnp.zeros((S, D), jnp.float32)
    for hh in range(num_heads):                              # static unroll
        lo = hh * head_dim
        q = qkv[:, lo:lo + head_dim] * scale                 # (S, Dh)
        k = qkv[:, D + lo:D + lo + head_dim]                 # (S, Dh)
        v = qkv[:, 2 * D + lo:2 * D + lo + head_dim]         # (S, Dh)
        s = _mm_t(q, k)                                      # (S, S) scores
        s = s - jnp.max(s, axis=-1, keepdims=True)
        p = jnp.exp(s)
        p = p * pl.reciprocal(jnp.sum(p, axis=-1, keepdims=True), approx=True)
        o = _mm(p, v)                                        # (S, Dh)
        # fold the output projection per head: accumulate o_h @ W_proj[h]
        attn = attn + _mm(o, pw[lo:lo + head_dim, :])        # (S, D)
    x = x + attn + projb_ref[...].astype(jnp.float32)        # residual (in-register)

    # ---- MLP sub-block: LN2 -> FC1 + GELU -> FC2 -> residual ----
    h = _ln(x, ln2g_ref[...].astype(jnp.float32), ln2b_ref[...].astype(jnp.float32))
    # TODO(synk): torch nn.GELU defaults to exact erf; tanh approximation used here.
    h = jax.nn.gelu(_mm(h, fc1w_ref[...]) + fc1b_ref[...].astype(jnp.float32),
                    approximate=True)
    h = _mm(h, fc2w_ref[...]) + fc2b_ref[...].astype(jnp.float32)
    o_ref[0] = (x + h).astype(o_ref.dtype)


def transformer_block(x, p, *, num_heads, qk_scale):
    """x: (N, S, D) -> (N, S, D), one fused kernel per block, grid over samples."""
    N, S, D = x.shape
    Dh = D // num_heads
    scale = qk_scale if qk_scale is not None else Dh ** -0.5
    hidden = p["fc1_w"].shape[1]

    vec = lambda a: a.reshape(1, -1)
    full = lambda shp: pl.BlockSpec(shp, lambda n: (0, 0))   # VMEM-resident params

    return pl.pallas_call(
        functools.partial(_block_kernel, num_heads=num_heads, head_dim=Dh, scale=scale),
        out_shape=jax.ShapeDtypeStruct((N, S, D), x.dtype),
        grid=(N,),
        in_specs=[
            pl.BlockSpec((1, S, D), lambda n: (n, 0, 0)),
            full((1, D)), full((1, D)),                      # ln1 gamma/beta
            full((D, 3 * D)), full((1, 3 * D)),              # qkv
            full((D, D)), full((1, D)),                      # proj
            full((1, D)), full((1, D)),                      # ln2 gamma/beta
            full((D, hidden)), full((1, hidden)),            # fc1
            full((hidden, D)), full((1, D)),                 # fc2
        ],
        out_specs=pl.BlockSpec((1, S, D), lambda n: (n, 0, 0)),
        compiler_params=pltpu.CompilerParams(dimension_semantics=("parallel",)),
    )(x,
      vec(p["ln1_g"]), vec(p["ln1_b"]),
      p["qkv_w"], vec(p["qkv_b"]),
      p["proj_w"], vec(p["proj_b"]),
      vec(p["ln2_g"]), vec(p["ln2_b"]),
      p["fc1_w"], vec(p["fc1_b"]),
      p["fc2_w"], vec(p["fc2_b"]))


# ----------------------------------------------------------------------------------
# Kernel 3: final LayerNorm + mean-pool over (M*T'*J') + linprobe Linear, grid over B
# ----------------------------------------------------------------------------------

def _final_head_kernel(h_ref, g_ref, b_ref, w_ref, hb_ref, o_ref):
    h = h_ref[0].astype(jnp.float32)                         # (P, D)
    hn = _ln(h, g_ref[...].astype(jnp.float32), b_ref[...].astype(jnp.float32))
    pooled = jnp.mean(hn, axis=0, keepdims=True)             # (1, D)
    y = _mm(pooled, w_ref[...]) + hb_ref[...].astype(jnp.float32)
    o_ref[0] = y.astype(o_ref.dtype)


def final_norm_pool_head(h, g, b, w, hb):
    """h: (B, P, D) -> LN per token -> mean over P -> Linear(D, num_classes)."""
    B, P, D = h.shape
    NC = w.shape[1]
    out = pl.pallas_call(
        _final_head_kernel,
        out_shape=jax.ShapeDtypeStruct((B, 1, NC), h.dtype),
        grid=(B,),
        in_specs=[
            pl.BlockSpec((1, P, D), lambda i: (i, 0, 0)),
            pl.BlockSpec((1, D), lambda i: (0, 0)),
            pl.BlockSpec((1, D), lambda i: (0, 0)),
            pl.BlockSpec((D, NC), lambda i: (0, 0)),
            pl.BlockSpec((1, NC), lambda i: (0, 0)),
        ],
        out_specs=pl.BlockSpec((1, 1, NC), lambda i: (i, 0, 0)),
        compiler_params=pltpu.CompilerParams(dimension_semantics=("parallel",)),
    )(h, g.reshape(1, D), b.reshape(1, D), w, hb.reshape(1, NC))
    return out.reshape(B, NC)


# ----------------------------------------------------------------------------------
# Model glue (layout plumbing done once, in XLA; all compute in kernels above)
# ----------------------------------------------------------------------------------

def init_params(key, *, dim_in, dim_feat, depth, num_heads, mlp_ratio,
                t_patch_size, Tp, num_joints, num_classes):
    keys = iter(jax.random.split(key, 8 + 8 * depth))

    def w(shape, scale=0.02):
        return (scale * jax.random.normal(next(keys), shape)).astype(jnp.float32)

    hidden = mlp_ratio * dim_feat
    params = {
        "embed_w": w((dim_in * t_patch_size, dim_feat)),
        "embed_b": jnp.zeros((dim_feat,), jnp.float32),
        "pos_t": w((Tp, dim_feat)),
        "pos_s": w((num_joints, dim_feat)),
        "blocks": [],
        "lnf_g": jnp.ones((dim_feat,), jnp.float32),
        "lnf_b": jnp.zeros((dim_feat,), jnp.float32),
        "head_w": w((dim_feat, num_classes)),
        "head_b": jnp.zeros((num_classes,), jnp.float32),
    }
    for _ in range(depth):
        params["blocks"].append({
            "ln1_g": jnp.ones((dim_feat,), jnp.float32),
            "ln1_b": jnp.zeros((dim_feat,), jnp.float32),
            "qkv_w": w((dim_feat, 3 * dim_feat)),
            "qkv_b": jnp.zeros((3 * dim_feat,), jnp.float32),
            "proj_w": w((dim_feat, dim_feat)),
            "proj_b": jnp.zeros((dim_feat,), jnp.float32),
            "ln2_g": jnp.ones((dim_feat,), jnp.float32),
            "ln2_b": jnp.zeros((dim_feat,), jnp.float32),
            "fc1_w": w((dim_feat, hidden)),
            "fc1_b": jnp.zeros((hidden,), jnp.float32),
            "fc2_w": w((hidden, dim_feat)),
            "fc2_b": jnp.zeros((dim_feat,), jnp.float32),
        })
    return params


def student_mlp_network_forward(x, params, *, dim_feat, num_heads, t_patch_size,
                                qk_scale=None, mask_ratio=0.9, motion_stride=1,
                                motion_aware_tau=0.8):
    """Mirrors StudentMLPNetwork.forward (mask_ratio forced to 0 / setting='test',
    dropout/drop-path rates are 0 -> identity)."""
    B, C, T, J, M = x.shape
    D = dim_feat
    Tp = T // t_patch_size
    S = Tp * J

    # One-time layout plumbing: (B,C,T,J,M) -> (B*M, Tp*J, t_patch*C)
    xr = jnp.transpose(x, (0, 4, 2, 3, 1)).reshape(B * M, Tp, t_patch_size, J, C)
    xr = jnp.transpose(xr, (0, 1, 3, 2, 4)).reshape(B * M, S, t_patch_size * C)

    # combined temporal + spatial positional table (tiny, computed once)
    pos = (params["pos_t"][:, None, :] + params["pos_s"][None, :, :]).reshape(S, D)

    # patch embed + pos-add (fused kernel)
    h = embed_tokens(xr, params["embed_w"], params["embed_b"], pos)   # (B*M, S, D)

    # transformer encoder: one fused kernel per block, fixed (B*M, S, D) layout
    for blk in params["blocks"]:
        h = transformer_block(h, blk, num_heads=num_heads, qk_scale=qk_scale)

    # studentEncoded (B*M, T', J', D) -> (B, M*T'*J', D) is a contiguous reshape
    feat = h.reshape(B, M * S, D)

    # ActionHeadLinprobe: final LN + mean over (M, T', J') + Linear -> (B, num_classes)
    return final_norm_pool_head(feat, params["lnf_g"], params["lnf_b"],
                                params["head_w"], params["head_b"])


# ----------------------------------------------------------------------------------

if __name__ == "__main__":
    # small shapes consistent with the module (B, C=dim_in, T, J, M)
    B, C, T, J, M = 2, 3, 8, 25, 2
    dim_feat, depth, num_heads, mlp_ratio = 32, 2, 4, 2
    t_patch_size, num_classes = 4, 10
    Tp = T // t_patch_size

    key = jax.random.PRNGKey(0)
    kx, kp = jax.random.split(key)
    x = jax.random.normal(kx, (B, C, T, J, M), dtype=jnp.float32)

    params = init_params(
        kp, dim_in=C, dim_feat=dim_feat, depth=depth, num_heads=num_heads,
        mlp_ratio=mlp_ratio, t_patch_size=t_patch_size, Tp=Tp,
        num_joints=J, num_classes=num_classes)

    fwd = jax.jit(functools.partial(
        student_mlp_network_forward,
        dim_feat=dim_feat, num_heads=num_heads, t_patch_size=t_patch_size))

    pred = fwd(x, params)
    pred = jax.block_until_ready(pred)

    assert pred.shape == (B, num_classes), pred.shape
    assert bool(jnp.all(jnp.isfinite(pred)))
    print("KERNEL_OK")
</pallas_src>

<mosaic_0001>
module attributes {stable_mosaic.version = 11 : i64} {
  func.func @_embed_kernel(%arg0: i32, %arg1: memref<1x50x12xf32, #tpu.memory_space<vmem>>, %arg2: memref<12x32xf32, #tpu.memory_space<vmem>>, %arg3: memref<1x32xf32, #tpu.memory_space<vmem>>, %arg4: memref<50x32xf32, #tpu.memory_space<vmem>>, %arg5: memref<1x50x32xf32, #tpu.memory_space<vmem>>) attributes {dimension_semantics = [#tpu.dimension_semantics<parallel>], iteration_bounds = array<i64: 4>, scalar_prefetch = 0 : i64, scratch_operands = 0 : i64, tpu.core_type = #tpu.core_type<tc>, window_params = [{transform_indices = @transform_0, window_bounds = array<i64: 1, 50, 12>}, {pipeline_mode = #tpu.pipeline_mode<synchronous>, transform_indices = @transform_1, window_bounds = array<i64: 12, 32>}, {pipeline_mode = #tpu.pipeline_mode<synchronous>, transform_indices = @transform_2, window_bounds = array<i64: 1, 32>}, {pipeline_mode = #tpu.pipeline_mode<synchronous>, transform_indices = @transform_3, window_bounds = array<i64: 50, 32>}, {transform_indices = @transform_4, window_bounds = array<i64: 1, 50, 32>}]} {
    %c0 = arith.constant 0 : index
    %c0_0 = arith.constant 0 : index
    %c0_1 = arith.constant 0 : index
    %0 = vector.load %arg1[%c0, %c0_0, %c0_1] : memref<1x50x12xf32, #tpu.memory_space<vmem>>, vector<1x50x12xf32>
    %1 = vector.shape_cast %0 : vector<1x50x12xf32> to vector<50x12xf32>
    %c0_2 = arith.constant 0 : index
    %c0_3 = arith.constant 0 : index
    %2 = vector.load %arg2[%c0_2, %c0_3] : memref<12x32xf32, #tpu.memory_space<vmem>>, vector<12x32xf32>
    %3 = arith.truncf %1 : vector<50x12xf32> to vector<50x12xbf16>
    %4 = arith.truncf %2 : vector<12x32xf32> to vector<12x32xbf16>
    %cst = arith.constant dense<0.000000e+00> : vector<50x32xf32>
    %5 = tpu.matmul %3, %4, %cst {dimension_numbers = #tpu.dot_dimension_numbers<[1], [0], [0], [1], [0, 0, 1, 1], [], []>} : vector<50x12xbf16>, vector<12x32xbf16>, vector<50x32xf32> -> vector<50x32xf32>
    %c0_4 = arith.constant 0 : index
    %c0_5 = arith.constant 0 : index
    %6 = vector.load %arg3[%c0_4, %c0_5] : memref<1x32xf32, #tpu.memory_space<vmem>>, vector<1x32xf32>
    %7 = vector.broadcast %6 : vector<1x32xf32> to vector<50x32xf32>
    %8 = arith.addf %5, %7 : vector<50x32xf32>
    %c0_6 = arith.constant 0 : index
    %c0_7 = arith.constant 0 : index
    %9 = vector.load %arg4[%c0_6, %c0_7] : memref<50x32xf32, #tpu.memory_space<vmem>>, vector<50x32xf32>
    %10 = arith.addf %8, %9 : vector<50x32xf32>
    %c0_8 = arith.constant 0 : index
    %c0_9 = arith.constant 0 : index
    %c0_10 = arith.constant 0 : index
    %11 = vector.load %arg5[%c0_8, %c0_9, %c0_10] : memref<1x50x32xf32, #tpu.memory_space<vmem>>, vector<1x50x32xf32>
    %12 = vector.shape_cast %11 : vector<1x50x32xf32> to vector<50x32xf32>
    %13 = vector.shape_cast %10 : vector<50x32xf32> to vector<1x50x32xf32>
    tpu.vector_store %arg5[%c0_8, %c0_9, %c0_10], %13 {strides = array<i32>} : memref<1x50x32xf32, #tpu.memory_space<vmem>>, vector<1x50x32xf32>,
    return
  }
  func.func @transform_0(%arg0: i32) -> (i32, i32, i32) {
    %c0_i32 = arith.constant 0 : i32
    %c0_i32_0 = arith.constant 0 : i32
    %c0_i32_1 = arith.constant 0 : i32
    return %arg0, %c0_i32, %c0_i32_0 : i32, i32, i32
  }
  func.func @transform_1(%arg0: i32) -> (i32, i32) {
    %c0_i32 = arith.constant 0 : i32
    %c0_i32_0 = arith.constant 0 : i32
    %c0_i32_1 = arith.constant 0 : i32
    return %c0_i32, %c0_i32_0 : i32, i32
  }
  func.func @transform_2(%arg0: i32) -> (i32, i32) {
    %c0_i32 = arith.constant 0 : i32
    %c0_i32_0 = arith.constant 0 : i32
    %c0_i32_1 = arith.constant 0 : i32
    return %c0_i32, %c0_i32_0 : i32, i32
  }
  func.func @transform_3(%arg0: i32) -> (i32, i32) {
    %c0_i32 = arith.constant 0 : i32
    %c0_i32_0 = arith.constant 0 : i32
    %c0_i32_1 = arith.constant 0 : i32
    return %c0_i32, %c0_i32_0 : i32, i32
  }
  func.func @transform_4(%arg0: i32) -> (i32, i32, i32) {
    %c0_i32 = arith.constant 0 : i32
    %c0_i32_0 = arith.constant 0 : i32
    %c0_i32_1 = arith.constant 0 : i32
    return %arg0, %c0_i32, %c0_i32_0 : i32, i32, i32
  }
}

module attributes {stable_mosaic.version = 11 : i64} {
  func.func @_block_kernel(%arg0: i32, %arg1: memref<1x50x32xf32, #tpu.memory_space<vmem>>, %arg2: memref<1x32xf32, #tpu.memory_space<vmem>>, %arg3: memref<1x32xf32, #tpu.memory_space<vmem>>, %arg4: memref<32x96xf32, #tpu.memory_space<vmem>>, %arg5: memref<1x96xf32, #tpu.memory_space<vmem>>, %arg6: memref<32x32xf32, #tpu.memory_space<vmem>>, %arg7: memref<1x32xf32, #tpu.memory_space<vmem>>, %arg8: memref<1x32xf32, #tpu.memory_space<vmem>>, %arg9: memref<1x32xf32, #tpu.memory_space<vmem>>, %arg10: memref<32x64xf32, #tpu.memory_space<vmem>>, %arg11: memref<1x64xf32, #tpu.memory_space<vmem>>, %arg12: memref<64x32xf32, #tpu.memory_space<vmem>>, %arg13: memref<1x32xf32, #tpu.memory_space<vmem>>, %arg14: memref<1x50x32xf32, #tpu.memory_space<vmem>>) attributes {dimension_semantics = [#tpu.dimension_semantics<parallel>], iteration_bounds = array<i64: 4>, scalar_prefetch = 0 : i64, scratch_operands = 0 : i64, tpu.core_type = #tpu.core_type<tc>, window_params = [{transform_indices = @transform_0, window_bounds = array<i64: 1, 50, 32>}, {pipeline_mode = #tpu.pipeline_mode<synchronous>, transform_indices = @transform_1, window_bounds = array<i64: 1, 32>}, {pipeline_mode = #tpu.pipeline_mode<synchronous>, transform_indices = @transform_2, window_bounds = array<i64: 1, 32>}, {pipeline_mode = #tpu.pipeline_mode<synchronous>, transform_indices = @transform_3, window_bounds = array<i64: 32, 96>}, {pipeline_mode = #tpu.pipeline_mode<synchronous>, transform_indices = @transform_4, window_bounds = array<i64: 1, 96>}, {pipeline_mode = #tpu.pipeline_mode<synchronous>, transform_indices = @transform_5, window_bounds = array<i64: 32, 32>}, {pipeline_mode = #tpu.pipeline_mode<synchronous>, transform_indices = @transform_6, window_bounds = array<i64: 1, 32>}, {pipeline_mode = #tpu.pipeline_mode<synchronous>, transform_indices = @transform_7, window_bounds = array<i64: 1, 32>}, {pipeline_mode = #tpu.pipeline_mode<synchronous>, transform_indices = @transform_8, window_bounds = array<i64: 1, 32>}, {pipeline_mode = #tpu.pipeline_mode<synchronous>, transform_indices = @transform_9, window_bounds = array<i64: 32, 64>}, {pipeline_mode = #tpu.pipeline_mode<synchronous>, transform_indices = @transform_10, window_bounds = array<i64: 1, 64>}, {pipeline_mode = #tpu.pipeline_mode<synchronous>, transform_indices = @transform_11, window_bounds = array<i64: 64, 32>}, {pipeline_mode = #tpu.pipeline_mode<synchronous>, transform_indices = @transform_12, window_bounds = array<i64: 1, 32>}, {transform_indices = @transform_13, window_bounds = array<i64: 1, 50, 32>}]} {
    %c0 = arith.constant 0 : index
    %c0_0 = arith.constant 0 : index
    %c0_1 = arith.constant 0 : index
    %0 = vector.load %arg1[%c0, %c0_0, %c0_1] : memref<1x50x32xf32, #tpu.memory_space<vmem>>, vector<1x50x32xf32>
    %1 = vector.shape_cast %0 : vector<1x50x32xf32> to vector<50x32xf32>
    %c0_2 = arith.constant 0 : index
    %c0_3 = arith.constant 0 : index
    %2 = vector.load %arg2[%c0_2, %c0_3] : memref<1x32xf32, #tpu.memory_space<vmem>>, vector<1x32xf32>
    %c0_4 = arith.constant 0 : index
    %c0_5 = arith.constant 0 : index
    %3 = vector.load %arg3[%c0_4, %c0_5] : memref<1x32xf32, #tpu.memory_space<vmem>>, vector<1x32xf32>
    %cst = arith.constant dense<0.000000e+00> : vector<50xf32>
    %4 = vector.multi_reduction <add>, %1, %cst [1] : vector<50x32xf32> to vector<50xf32>
    %5 = vector.shape_cast %4 : vector<50xf32> to vector<50x1xf32>
    %cst_6 = arith.constant 3.200000e+01 : f32
    %6 = vector.broadcast %cst_6 : f32 to vector<50x1xf32>
    %7 = arith.divf %5, %6 : vector<50x1xf32>
    %8 = vector.broadcast %7 : vector<50x1xf32> to vector<50x32xf32>
    %9 = arith.subf %1, %8 : vector<50x32xf32>
    %10 = arith.mulf %9, %9 : vector<50x32xf32>
    %cst_7 = arith.constant dense<0.000000e+00> : vector<50xf32>
    %11 = vector.multi_reduction <add>, %10, %cst_7 [1] : vector<50x32xf32> to vector<50xf32>
    %12 = vector.shape_cast %11 : vector<50xf32> to vector<50x1xf32>
    %cst_8 = arith.constant 3.200000e+01 : f32
    %13 = vector.broadcast %cst_8 : f32 to vector<50x1xf32>
    %14 = arith.divf %12, %13 : vector<50x1xf32>
    %15 = vector.broadcast %7 : vector<50x1xf32> to vector<50x32xf32>
    %16 = arith.subf %1, %15 : vector<50x32xf32>
    %cst_9 = arith.constant 9.99999974E-6 : f32
    %17 = vector.broadcast %cst_9 : f32 to vector<50x1xf32>
    %18 = arith.addf %14, %17 : vector<50x1xf32>
    %19 = math.rsqrt %18 : vector<50x1xf32>
    %20 = vector.broadcast %19 : vector<50x1xf32> to vector<50x32xf32>
    %21 = arith.mulf %16, %20 : vector<50x32xf32>
    %22 = vector.broadcast %2 : vector<1x32xf32> to vector<50x32xf32>
    %23 = arith.mulf %21, %22 : vector<50x32xf32>
    %24 = vector.broadcast %3 : vector<1x32xf32> to vector<50x32xf32>
    %25 = arith.addf %23, %24 : vector<50x32xf32>
    %c0_10 = arith.constant 0 : index
    %c0_11 = arith.constant 0 : index
    %26 = vector.load %arg4[%c0_10, %c0_11] : memref<32x96xf32, #tpu.memory_space<vmem>>, vector<32x96xf32>
    %27 = arith.truncf %25 : vector<50x32xf32> to vector<50x32xbf16>
    %28 = arith.truncf %26 : vector<32x96xf32> to vector<32x96xbf16>
    %cst_12 = arith.constant dense<0.000000e+00> : vector<50x96xf32>
    %29 = tpu.matmul %27, %28, %cst_12 {dimension_numbers = #tpu.dot_dimension_numbers<[1], [0], [0], [1], [0, 0, 1, 1], [], []>} : vector<50x32xbf16>, vector<32x96xbf16>, vector<50x96xf32> -> vector<50x96xf32>
    %c0_13 = arith.constant 0 : index
    %c0_14 = arith.constant 0 : index
    %30 = vector.load %arg5[%c0_13, %c0_14] : memref<1x96xf32, #tpu.memory_space<vmem>>, vector<1x96xf32>
    %31 = vector.broadcast %30 : vector<1x96xf32> to vector<50x96xf32>
    %32 = arith.addf %29, %31 : vector<50x96xf32>
    %c0_15 = arith.constant 0 : index
    %c0_16 = arith.constant 0 : index
    %33 = vector.load %arg6[%c0_15, %c0_16] : memref<32x32xf32, #tpu.memory_space<vmem>>, vector<32x32xf32>
    %cst_17 = arith.constant 0.000000e+00 : f32
    %34 = vector.broadcast %cst_17 : f32 to vector<50x32xf32>
    %35 = vector.extract_strided_slice %32 {offsets = [0, 0], sizes = [50, 8], strides = [1, 1]} : vector<50x96xf32> to vector<50x8xf32>
    %cst_18 = arith.constant 0.353553385 : f32
    %36 = vector.broadcast %cst_18 : f32 to vector<50x8xf32>
    %37 = arith.mulf %35, %36 : vector<50x8xf32>
    %38 = vector.extract_strided_slice %32 {offsets = [0, 32], sizes = [50, 8], strides = [1, 1]} : vector<50x96xf32> to vector<50x8xf32>
    %39 = vector.extract_strided_slice %32 {offsets = [0, 64], sizes = [50, 8], strides = [1, 1]} : vector<50x96xf32> to vector<50x8xf32>
    %40 = arith.truncf %37 : vector<50x8xf32> to vector<50x8xbf16>
    %41 = arith.truncf %38 : vector<50x8xf32> to vector<50x8xbf16>
    %cst_19 = arith.constant dense<0.000000e+00> : vector<50x50xf32>
    %42 = tpu.matmul %40, %41, %cst_19 {dimension_numbers = #tpu.dot_dimension_numbers<[1], [1], [0], [0], [0, 0, 1, 0], [], []>} : vector<50x8xbf16>, vector<50x8xbf16>, vector<50x50xf32> -> vector<50x50xf32>
    %cst_20 = arith.constant dense<0xFF800000> : vector<50xf32>
    %43 = vector.multi_reduction <maximumf>, %42, %cst_20 [1] : vector<50x50xf32> to vector<50xf32>
    %44 = vector.shape_cast %43 : vector<50xf32> to vector<50x1xf32>
    %45 = vector.broadcast %44 : vector<50x1xf32> to vector<50x50xf32>
    %46 = arith.subf %42, %45 : vector<50x50xf32>
    %47 = math.exp %46 : vector<50x50xf32>
    %cst_21 = arith.constant dense<0.000000e+00> : vector<50xf32>
    %48 = vector.multi_reduction <add>, %47, %cst_21 [1] : vector<50x50xf32> to vector<50xf32>
    %49 = vector.shape_cast %48 : vector<50xf32> to vector<50x1xf32>
    %50 = tpu.reciprocal %49 {approx = true} : vector<50x1xf32> -> vector<50x1xf32>
    %51 = vector.broadcast %50 : vector<50x1xf32> to vector<50x50xf32>
    %52 = arith.mulf %47, %51 : vector<50x50xf32>
    %53 = arith.truncf %52 : vector<50x50xf32> to vector<50x50xbf16>
    %54 = arith.truncf %39 : vector<50x8xf32> to vector<50x8xbf16>
    %cst_22 = arith.constant dense<0.000000e+00> : vector<50x8xf32>
    %55 = tpu.matmul %53, %54, %cst_22 {dimension_numbers = #tpu.dot_dimension_numbers<[1], [0], [0], [1], [0, 0, 1, 1], [], []>} : vector<50x50xbf16>, vector<50x8xbf16>, vector<50x8xf32> -> vector<50x8xf32>
    %56 = vector.extract_strided_slice %33 {offsets = [0, 0], sizes = [8, 32], strides = [1, 1]} : vector<32x32xf32> to vector<8x32xf32>
    %57 = arith.truncf %55 : vector<50x8xf32> to vector<50x8xbf16>
    %58 = arith.truncf %56 : vector<8x32xf32> to vector<8x32xbf16>
    %cst_23 = arith.constant dense<0.000000e+00> : vector<50x32xf32>
    %59 = tpu.matmul %57, %58, %cst_23 {dimension_numbers = #tpu.dot_dimension_numbers<[1], [0], [0], [1], [0, 0, 1, 1], [], []>} : vector<50x8xbf16>, vector<8x32xbf16>, vector<50x32xf32> -> vector<50x32xf32>
    %60 = arith.addf %34, %59 : vector<50x32xf32>
    %61 = vector.extract_strided_slice %32 {offsets = [0, 8], sizes = [50, 8], strides = [1, 1]} : vector<50x96xf32> to vector<50x8xf32>
    %cst_24 = arith.constant 0.353553385 : f32
    %62 = vector.broadcast %cst_24 : f32 to vector<50x8xf32>
    %63 = arith.mulf %61, %62 : vector<50x8xf32>
    %64 = vector.extract_strided_slice %32 {offsets = [0, 40], sizes = [50, 8], strides = [1, 1]} : vector<50x96xf32> to vector<50x8xf32>
    %65 = vector.extract_strided_slice %32 {offsets = [0, 72], sizes = [50, 8], strides = [1, 1]} : vector<50x96xf32> to vector<50x8xf32>
    %66 = arith.truncf %63 : vector<50x8xf32> to vector<50x8xbf16>
    %67 = arith.truncf %64 : vector<50x8xf32> to vector<50x8xbf16>
    %cst_25 = arith.constant dense<0.000000e+00> : vector<50x50xf32>
    %68 = tpu.matmul %66, %67, %cst_25 {dimension_numbers = #tpu.dot_dimension_numbers<[1], [1], [0], [0], [0, 0, 1, 0], [], []>} : vector<50x8xbf16>, vector<50x8xbf16>, vector<50x50xf32> -> vector<50x50xf32>
    %cst_26 = arith.constant dense<0xFF800000> : vector<50xf32>
    %69 = vector.multi_reduction <maximumf>, %68, %cst_26 [1] : vector<50x50xf32> to vector<50xf32>
    %70 = vector.shape_cast %69 : vector<50xf32> to vector<50x1xf32>
    %71 = vector.broadcast %70 : vector<50x1xf32> to vector<50x50xf32>
    %72 = arith.subf %68, %71 : vector<50x50xf32>
    %73 = math.exp %72 : vector<50x50xf32>
    %cst_27 = arith.constant dense<0.000000e+00> : vector<50xf32>
    %74 = vector.multi_reduction <add>, %73, %cst_27 [1] : vector<50x50xf32> to vector<50xf32>
    %75 = vector.shape_cast %74 : vector<50xf32> to vector<50x1xf32>
    %76 = tpu.reciprocal %75 {approx = true} : vector<50x1xf32> -> vector<50x1xf32>
    %77 = vector.broadcast %76 : vector<50x1xf32> to vector<50x50xf32>
    %78 = arith.mulf %73, %77 : vector<50x50xf32>
    %79 = arith.truncf %78 : vector<50x50xf32> to vector<50x50xbf16>
    %80 = arith.truncf %65 : vector<50x8xf32> to vector<50x8xbf16>
    %cst_28 = arith.constant dense<0.000000e+00> : vector<50x8xf32>
    %81 = tpu.matmul %79, %80, %cst_28 {dimension_numbers = #tpu.dot_dimension_numbers<[1], [0], [0], [1], [0, 0, 1, 1], [], []>} : vector<50x50xbf16>, vector<50x8xbf16>, vector<50x8xf32> -> vector<50x8xf32>
    %82 = vector.extract_strided_slice %33 {offsets = [8, 0], sizes = [8, 32], strides = [1, 1]} : vector<32x32xf32> to vector<8x32xf32>
    %83 = arith.truncf %81 : vector<50x8xf32> to vector<50x8xbf16>
    %84 = arith.truncf %82 : vector<8x32xf32> to vector<8x32xbf16>
    %cst_29 = arith.constant dense<0.000000e+00> : vector<50x32xf32>
    %85 = tpu.matmul %83, %84, %cst_29 {dimension_numbers = #tpu.dot_dimension_numbers<[1], [0], [0], [1], [0, 0, 1, 1], [], []>} : vector<50x8xbf16>, vector<8x32xbf16>, vector<50x32xf32> -> vector<50x32xf32>
    %86 = arith.addf %60, %85 : vector<50x32xf32>
    %87 = vector.extract_strided_slice %32 {offsets = [0, 16], sizes = [50, 8], strides = [1, 1]} : vector<50x96xf32> to vector<50x8xf32>
    %cst_30 = arith.constant 0.353553385 : f32
    %88 = vector.broadcast %cst_30 : f32 to vector<50x8xf32>
    %89 = arith.mulf %87, %88 : vector<50x8xf32>
    %90 = vector.extract_strided_slice %32 {offsets = [0, 48], sizes = [50, 8], strides = [1, 1]} : vector<50x96xf32> to vector<50x8xf32>
    %91 = vector.extract_strided_slice %32 {offsets = [0, 80], sizes = [50, 8], strides = [1, 1]} : vector<50x96xf32> to vector<50x8xf32>
    %92 = arith.truncf %89 : vector<50x8xf32> to vector<50x8xbf16>
    %93 = arith.truncf %90 : vector<50x8xf32> to vector<50x8xbf16>
    %cst_31 = arith.constant dense<0.000000e+00> : vector<50x50xf32>
    %94 = tpu.matmul %92, %93, %cst_31 {dimension_numbers = #tpu.dot_dimension_numbers<[1], [1], [0], [0], [0, 0, 1, 0], [], []>} : vector<50x8xbf16>, vector<50x8xbf16>, vector<50x50xf32> -> vector<50x50xf32>
    %cst_32 = arith.constant dense<0xFF800000> : vector<50xf32>
    %95 = vector.multi_reduction <maximumf>, %94, %cst_32 [1] : vector<50x50xf32> to vector<50xf32>
    %96 = vector.shape_cast %95 : vector<50xf32> to vector<50x1xf32>
    %97 = vector.broadcast %96 : vector<50x1xf32> to vector<50x50xf32>
    %98 = arith.subf %94, %97 : vector<50x50xf32>
    %99 = math.exp %98 : vector<50x50xf32>
    %cst_33 = arith.constant dense<0.000000e+00> : vector<50xf32>
    %100 = vector.multi_reduction <add>, %99, %cst_33 [1] : vector<50x50xf32> to vector<50xf32>
    %101 = vector.shape_cast %100 : vector<50xf32> to vector<50x1xf32>
    %102 = tpu.reciprocal %101 {approx = true} : vector<50x1xf32> -> vector<50x1xf32>
    %103 = vector.broadcast %102 : vector<50x1xf32> to vector<50x50xf32>
    %104 = arith.mulf %99, %103 : vector<50x50xf32>
    %105 = arith.truncf %104 : vector<50x50xf32> to vector<50x50xbf16>
    %106 = arith.truncf %91 : vector<50x8xf32> to vector<50x8xbf16>
    %cst_34 = arith.constant dense<0.000000e+00> : vector<50x8xf32>
    %107 = tpu.matmul %105, %106, %cst_34 {dimension_numbers = #tpu.dot_dimension_numbers<[1], [0], [0], [1], [0, 0, 1, 1], [], []>} : vector<50x50xbf16>, vector<50x8xbf16>, vector<50x8xf32> -> vector<50x8xf32>
    %108 = vector.extract_strided_slice %33 {offsets = [16, 0], sizes = [8, 32], strides = [1, 1]} : vector<32x32xf32> to vector<8x32xf32>
    %109 = arith.truncf %107 : vector<50x8xf32> to vector<50x8xbf16>
    %110 = arith.truncf %108 : vector<8x32xf32> to vector<8x32xbf16>
    %cst_35 = arith.constant dense<0.000000e+00> : vector<50x32xf32>
    %111 = tpu.matmul %109, %110, %cst_35 {dimension_numbers = #tpu.dot_dimension_numbers<[1], [0], [0], [1], [0, 0, 1, 1], [], []>} : vector<50x8xbf16>, vector<8x32xbf16>, vector<50x32xf32> -> vector<50x32xf32>
    %112 = arith.addf %86, %111 : vector<50x32xf32>
    %113 = vector.extract_strided_slice %32 {offsets = [0, 24], sizes = [50, 8], strides = [1, 1]} : vector<50x96xf32> to vector<50x8xf32>
    %cst_36 = arith.constant 0.353553385 : f32
    %114 = vector.broadcast %cst_36 : f32 to vector<50x8xf32>
    %115 = arith.mulf %113, %114 : vector<50x8xf32>
    %116 = vector.extract_strided_slice %32 {offsets = [0, 56], sizes = [50, 8], strides = [1, 1]} : vector<50x96xf32> to vector<50x8xf32>
    %117 = vector.extract_strided_slice %32 {offsets = [0, 88], sizes = [50, 8], strides = [1, 1]} : vector<50x96xf32> to vector<50x8xf32>
    %118 = arith.truncf %115 : vector<50x8xf32> to vector<50x8xbf16>
    %119 = arith.truncf %116 : vector<50x8xf32> to vector<50x8xbf16>
    %cst_37 = arith.constant dense<0.000000e+00> : vector<50x50xf32>
    %120 = tpu.matmul %118, %119, %cst_37 {dimension_numbers = #tpu.dot_dimension_numbers<[1], [1], [0], [0], [0, 0, 1, 0], [], []>} : vector<50x8xbf16>, vector<50x8xbf16>, vector<50x50xf32> -> vector<50x50xf32>
    %cst_38 = arith.constant dense<0xFF800000> : vector<50xf32>
    %121 = vector.multi_reduction <maximumf>, %120, %cst_38 [1] : vector<50x50xf32> to vector<50xf32>
    %122 = vector.shape_cast %121 : vector<50xf32> to vector<50x1xf32>
    %123 = vector.broadcast %122 : vector<50x1xf32> to vector<50x50xf32>
    %124 = arith.subf %120, %123 : vector<50x50xf32>
    %125 = math.exp %124 : vector<50x50xf32>
    %cst_39 = arith.constant dense<0.000000e+00> : vector<50xf32>
    %126 = vector.multi_reduction <add>, %125, %cst_39 [1] : vector<50x50xf32> to vector<50xf32>
    %127 = vector.shape_cast %126 : vector<50xf32> to vector<50x1xf32>
    %128 = tpu.reciprocal %127 {approx = true} : vector<50x1xf32> -> vector<50x1xf32>
    %129 = vector.broadcast %128 : vector<50x1xf32> to vector<50x50xf32>
    %130 = arith.mulf %125, %129 : vector<50x50xf32>
    %131 = arith.truncf %130 : vector<50x50xf32> to vector<50x50xbf16>
    %132 = arith.truncf %117 : vector<50x8xf32> to vector<50x8xbf16>
    %cst_40 = arith.constant dense<0.000000e+00> : vector<50x8xf32>
    %133 = tpu.matmul %131, %132, %cst_40 {dimension_numbers = #tpu.dot_dimension_numbers<[1], [0], [0], [1], [0, 0, 1, 1], [], []>} : vector<50x50xbf16>, vector<50x8xbf16>, vector<50x8xf32> -> vector<50x8xf32>
    %134 = vector.extract_strided_slice %33 {offsets = [24, 0], sizes = [8, 32], strides = [1, 1]} : vector<32x32xf32> to vector<8x32xf32>
    %135 = arith.truncf %133 : vector<50x8xf32> to vector<50x8xbf16>
    %136 = arith.truncf %134 : vector<8x32xf32> to vector<8x32xbf16>
    %cst_41 = arith.constant dense<0.000000e+00> : vector<50x32xf32>
    %137 = tpu.matmul %135, %136, %cst_41 {dimension_numbers = #tpu.dot_dimension_numbers<[1], [0], [0], [1], [0, 0, 1, 1], [], []>} : vector<50x8xbf16>, vector<8x32xbf16>, vector<50x32xf32> -> vector<50x32xf32>
    %138 = arith.addf %112, %137 : vector<50x32xf32>
    %139 = arith.addf %1, %138 : vector<50x32xf32>
    %c0_42 = arith.constant 0 : index
    %c0_43 = arith.constant 0 : index
    %140 = vector.load %arg7[%c0_42, %c0_43] : memref<1x32xf32, #tpu.memory_space<vmem>>, vector<1x32xf32>
    %141 = vector.broadcast %140 : vector<1x32xf32> to vector<50x32xf32>
    %142 = arith.addf %139, %141 : vector<50x32xf32>
    %c0_44 = arith.constant 0 : index
    %c0_45 = arith.constant 0 : index
    %143 = vector.load %arg8[%c0_44, %c0_45] : memref<1x32xf32, #tpu.memory_space<vmem>>, vector<1x32xf32>
    %c0_46 = arith.constant 0 : index
    %c0_47 = arith.constant 0 : index
    %144 = vector.load %arg9[%c0_46, %c0_47] : memref<1x32xf32, #tpu.memory_space<vmem>>, vector<1x32xf32>
    %cst_48 = arith.constant dense<0.000000e+00> : vector<50xf32>
    %145 = vector.multi_reduction <add>, %142, %cst_48 [1] : vector<50x32xf32> to vector<50xf32>
    %146 = vector.shape_cast %145 : vector<50xf32> to vector<50x1xf32>
    %cst_49 = arith.constant 3.200000e+01 : f32
    %147 = vector.broadcast %cst_49 : f32 to vector<50x1xf32>
    %148 = arith.divf %146, %147 : vector<50x1xf32>
    %149 = vector.broadcast %148 : vector<50x1xf32> to vector<50x32xf32>
    %150 = arith.subf %142, %149 : vector<50x32xf32>
    %151 = arith.mulf %150, %150 : vector<50x32xf32>
    %cst_50 = arith.constant dense<0.000000e+00> : vector<50xf32>
    %152 = vector.multi_reduction <add>, %151, %cst_50 [1] : vector<50x32xf32> to vector<50xf32>
    %153 = vector.shape_cast %152 : vector<50xf32> to vector<50x1xf32>
    %cst_51 = arith.constant 3.200000e+01 : f32
    %154 = vector.broadcast %cst_51 : f32 to vector<50x1xf32>
    %155 = arith.divf %153, %154 : vector<50x1xf32>
    %156 = vector.broadcast %148 : vector<50x1xf32> to vector<50x32xf32>
    %157 = arith.subf %142, %156 : vector<50x32xf32>
    %cst_52 = arith.constant 9.99999974E-6 : f32
    %158 = vector.broadcast %cst_52 : f32 to vector<50x1xf32>
    %159 = arith.addf %155, %158 : vector<50x1xf32>
    %160 = math.rsqrt %159 : vector<50x1xf32>
    %161 = vector.broadcast %160 : vector<50x1xf32> to vector<50x32xf32>
    %162 = arith.mulf %157, %161 : vector<50x32xf32>
    %163 = vector.broadcast %143 : vector<1x32xf32> to vector<50x32xf32>
    %164 = arith.mulf %162, %163 : vector<50x32xf32>
    %165 = vector.broadcast %144 : vector<1x32xf32> to vector<50x32xf32>
    %166 = arith.addf %164, %165 : vector<50x32xf32>
    %c0_53 = arith.constant 0 : index
    %c0_54 = arith.constant 0 : index
    %167 = vector.load %arg10[%c0_53, %c0_54] : memref<32x64xf32, #tpu.memory_space<vmem>>, vector<32x64xf32>
    %168 = arith.truncf %166 : vector<50x32xf32> to vector<50x32xbf16>
    %169 = arith.truncf %167 : vector<32x64xf32> to vector<32x64xbf16>
    %cst_55 = arith.constant dense<0.000000e+00> : vector<50x64xf32>
    %170 = tpu.matmul %168, %169, %cst_55 {dimension_numbers = #tpu.dot_dimension_numbers<[1], [0], [0], [1], [0, 0, 1, 1], [], []>} : vector<50x32xbf16>, vector<32x64xbf16>, vector<50x64xf32> -> vector<50x64xf32>
    %c0_56 = arith.constant 0 : index
    %c0_57 = arith.constant 0 : index
    %171 = vector.load %arg11[%c0_56, %c0_57] : memref<1x64xf32, #tpu.memory_space<vmem>>, vector<1x64xf32>
    %172 = vector.broadcast %171 : vector<1x64xf32> to vector<50x64xf32>
    %173 = arith.addf %170, %172 : vector<50x64xf32>
    %174 = arith.mulf %173, %173 : vector<50x64xf32>
    %175 = arith.mulf %173, %174 : vector<50x64xf32>
    %cst_58 = arith.constant 4.471500e-02 : f32
    %176 = vector.broadcast %cst_58 : f32 to vector<50x64xf32>
    %177 = arith.mulf %176, %175 : vector<50x64xf32>
    %178 = arith.addf %173, %177 : vector<50x64xf32>
    %cst_59 = arith.constant 0.797884583 : f32
    %179 = vector.broadcast %cst_59 : f32 to vector<50x64xf32>
    %180 = arith.mulf %179, %178 : vector<50x64xf32>
    %181 = math.tanh %180 : vector<50x64xf32>
    %cst_60 = arith.constant 1.000000e+00 : f32
    %182 = vector.broadcast %cst_60 : f32 to vector<50x64xf32>
    %183 = arith.addf %182, %181 : vector<50x64xf32>
    %cst_61 = arith.constant 5.000000e-01 : f32
    %184 = vector.broadcast %cst_61 : f32 to vector<50x64xf32>
    %185 = arith.mulf %184, %183 : vector<50x64xf32>
    %186 = arith.mulf %173, %185 : vector<50x64xf32>
    %c0_62 = arith.constant 0 : index
    %c0_63 = arith.constant 0 : index
    %187 = vector.load %arg12[%c0_62, %c0_63] : memref<64x32xf32, #tpu.memory_space<vmem>>, vector<64x32xf32>
    %188 = arith.truncf %186 : vector<50x64xf32> to vector<50x64xbf16>
    %189 = arith.truncf %187 : vector<64x32xf32> to vector<64x32xbf16>
    %cst_64 = arith.constant dense<0.000000e+00> : vector<50x32xf32>
    %190 = tpu.matmul %188, %189, %cst_64 {dimension_numbers = #tpu.dot_dimension_numbers<[1], [0], [0], [1], [0, 0, 1, 1], [], []>} : vector<50x64xbf16>, vector<64x32xbf16>, vector<50x32xf32> -> vector<50x32xf32>
    %c0_65 = arith.constant 0 : index
    %c0_66 = arith.constant 0 : index
    %191 = vector.load %arg13[%c0_65, %c0_66] : memref<1x32xf32, #tpu.memory_space<vmem>>, vector<1x32xf32>
    %192 = vector.broadcast %191 : vector<1x32xf32> to vector<50x32xf32>
    %193 = arith.addf %190, %192 : vector<50x32xf32>
    %194 = arith.addf %142, %193 : vector<50x32xf32>
    %c0_67 = arith.constant 0 : index
    %c0_68 = arith.constant 0 : index
    %c0_69 = arith.constant 0 : index
    %195 = vector.load %arg14[%c0_67, %c0_68, %c0_69] : memref<1x50x32xf32, #tpu.memory_space<vmem>>, vector<1x50x32xf32>
    %196 = vector.shape_cast %195 : vector<1x50x32xf32> to vector<50x32xf32>
    %197 = vector.shape_cast %194 : vector<50x32xf32> to vector<1x50x32xf32>
    tpu.vector_store %arg14[%c0_67, %c0_68, %c0_69], %197 {strides = array<i32>} : memref<1x50x32xf32, #tpu.memory_space<vmem>>, vector<1x50x32xf32>,
    return
  }
  func.func @transform_0(%arg0: i32) -> (i32, i32, i32) {
    %c0_i32 = arith.constant 0 : i32
    %c0_i32_0 = arith.constant 0 : i32
    %c0_i32_1 = arith.constant 0 : i32
    return %arg0, %c0_i32, %c0_i32_0 : i32, i32, i32
  }
  func.func @transform_1(%arg0: i32) -> (i32, i32) {
    %c0_i32 = arith.constant 0 : i32
    %c0_i32_0 = arith.constant 0 : i32
    %c0_i32_1 = arith.constant 0 : i32
    return %c0_i32, %c0_i32_0 : i32, i32
  }
  func.func @transform_2(%arg0: i32) -> (i32, i32) {
    %c0_i32 = arith.constant 0 : i32
    %c0_i32_0 = arith.constant 0 : i32
    %c0_i32_1 = arith.constant 0 : i32
    return %c0_i32, %c0_i32_0 : i32, i32
  }
  func.func @transform_3(%arg0: i32) -> (i32, i32) {
    %c0_i32 = arith.constant 0 : i32
    %c0_i32_0 = arith.constant 0 : i32
    %c0_i32_1 = arith.constant 0 : i32
    return %c0_i32, %c0_i32_0 : i32, i32
  }
  func.func @transform_4(%arg0: i32) -> (i32, i32) {
    %c0_i32 = arith.constant 0 : i32
    %c0_i32_0 = arith.constant 0 : i32
    %c0_i32_1 = arith.constant 0 : i32
    return %c0_i32, %c0_i32_0 : i32, i32
  }
  func.func @transform_5(%arg0: i32) -> (i32, i32) {
    %c0_i32 = arith.constant 0 : i32
    %c0_i32_0 = arith.constant 0 : i32
    %c0_i32_1 = arith.constant 0 : i32
    return %c0_i32, %c0_i32_0 : i32, i32
  }
  func.func @transform_6(%arg0: i32) -> (i32, i32) {
    %c0_i32 = arith.constant 0 : i32
    %c0_i32_0 = arith.constant 0 : i32
    %c0_i32_1 = arith.constant 0 : i32
    return %c0_i32, %c0_i32_0 : i32, i32
  }
  func.func @transform_7(%arg0: i32) -> (i32, i32) {
    %c0_i32 = arith.constant 0 : i32
    %c0_i32_0 = arith.constant 0 : i32
    %c0_i32_1 = arith.constant 0 : i32
    return %c0_i32, %c0_i32_0 : i32, i32
  }
  func.func @transform_8(%arg0: i32) -> (i32, i32) {
    %c0_i32 = arith.constant 0 : i32
    %c0_i32_0 = arith.constant 0 : i32
    %c0_i32_1 = arith.constant 0 : i32
    return %c0_i32, %c0_i32_0 : i32, i32
  }
  func.func @transform_9(%arg0: i32) -> (i32, i32) {
    %c0_i32 = arith.constant 0 : i32
    %c0_i32_0 = arith.constant 0 : i32
    %c0_i32_1 = arith.constant 0 : i32
    return %c0_i32, %c0_i32_0 : i32, i32
  }
  func.func @transform_10(%arg0: i32) -> (i32, i32) {
    %c0_i32 = arith.constant 0 : i32
    %c0_i32_0 = arith.constant 0 : i32
    %c0_i32_1 = arith.constant 0 : i32
    return %c0_i32, %c0_i32_0 : i32, i32
  }
  func.func @transform_11(%arg0: i32) -> (i32, i32) {
    %c0_i32 = arith.constant 0 : i32
    %c0_i32_0 = arith.constant 0 : i32
    %c0_i32_1 = arith.constant 0 : i32
    return %c0_i32, %c0_i32_0 : i32, i32
  }
  func.func @transform_12(%arg0: i32) -> (i32, i32) {
    %c0_i32 = arith.constant 0 : i32
    %c0_i32_0 = arith.constant 0 : i32
    %c0_i32_1 = arith.constant 0 : i32
    return %c0_i32, %c0_i32_0 : i32, i32
  }
  func.func @transform_13(%arg0: i32) -> (i32, i32, i32) {
    %c0_i32 = arith.constant 0 : i32
    %c0_i32_0 = arith.constant 0 : i32
    %c0_i32_1 = arith.constant 0 : i32
    return %arg0, %c0_i32, %c0_i32_0 : i32, i32, i32
  }
}

module attributes {stable_mosaic.version = 11 : i64} {
  func.func @_final_head_kernel(%arg0: i32, %arg1: memref<1x100x32xf32, #tpu.memory_space<vmem>>, %arg2: memref<1x32xf32, #tpu.memory_space<vmem>>, %arg3: memref<1x32xf32, #tpu.memory_space<vmem>>, %arg4: memref<32x10xf32, #tpu.memory_space<vmem>>, %arg5: memref<1x10xf32, #tpu.memory_space<vmem>>, %arg6: memref<1x1x10xf32, #tpu.memory_space<vmem>>) attributes {dimension_semantics = [#tpu.dimension_semantics<parallel>], iteration_bounds = array<i64: 2>, scalar_prefetch = 0 : i64, scratch_operands = 0 : i64, tpu.core_type = #tpu.core_type<tc>, window_params = [{transform_indices = @transform_0, window_bounds = array<i64: 1, 100, 32>}, {pipeline_mode = #tpu.pipeline_mode<synchronous>, transform_indices = @transform_1, window_bounds = array<i64: 1, 32>}, {pipeline_mode = #tpu.pipeline_mode<synchronous>, transform_indices = @transform_2, window_bounds = array<i64: 1, 32>}, {pipeline_mode = #tpu.pipeline_mode<synchronous>, transform_indices = @transform_3, window_bounds = array<i64: 32, 10>}, {pipeline_mode = #tpu.pipeline_mode<synchronous>, transform_indices = @transform_4, window_bounds = array<i64: 1, 10>}, {transform_indices = @transform_5, window_bounds = array<i64: 1, 1, 10>}]} {
    %c0 = arith.constant 0 : index
    %c0_0 = arith.constant 0 : index
    %c0_1 = arith.constant 0 : index
    %0 = vector.load %arg1[%c0, %c0_0, %c0_1] : memref<1x100x32xf32, #tpu.memory_space<vmem>>, vector<1x100x32xf32>
    %1 = vector.shape_cast %0 : vector<1x100x32xf32> to vector<100x32xf32>
    %c0_2 = arith.constant 0 : index
    %c0_3 = arith.constant 0 : index
    %2 = vector.load %arg2[%c0_2, %c0_3] : memref<1x32xf32, #tpu.memory_space<vmem>>, vector<1x32xf32>
    %c0_4 = arith.constant 0 : index
    %c0_5 = arith.constant 0 : index
    %3 = vector.load %arg3[%c0_4, %c0_5] : memref<1x32xf32, #tpu.memory_space<vmem>>, vector<1x32xf32>
    %cst = arith.constant dense<0.000000e+00> : vector<100xf32>
    %4 = vector.multi_reduction <add>, %1, %cst [1] : vector<100x32xf32> to vector<100xf32>
    %5 = vector.shape_cast %4 : vector<100xf32> to vector<100x1xf32>
    %cst_6 = arith.constant 3.200000e+01 : f32
    %6 = vector.broadcast %cst_6 : f32 to vector<100x1xf32>
    %7 = arith.divf %5, %6 : vector<100x1xf32>
    %8 = vector.broadcast %7 : vector<100x1xf32> to vector<100x32xf32>
    %9 = arith.subf %1, %8 : vector<100x32xf32>
    %10 = arith.mulf %9, %9 : vector<100x32xf32>
    %cst_7 = arith.constant dense<0.000000e+00> : vector<100xf32>
    %11 = vector.multi_reduction <add>, %10, %cst_7 [1] : vector<100x32xf32> to vector<100xf32>
    %12 = vector.shape_cast %11 : vector<100xf32> to vector<100x1xf32>
    %cst_8 = arith.constant 3.200000e+01 : f32
    %13 = vector.broadcast %cst_8 : f32 to vector<100x1xf32>
    %14 = arith.divf %12, %13 : vector<100x1xf32>
    %15 = vector.broadcast %7 : vector<100x1xf32> to vector<100x32xf32>
    %16 = arith.subf %1, %15 : vector<100x32xf32>
    %cst_9 = arith.constant 9.99999974E-6 : f32
    %17 = vector.broadcast %cst_9 : f32 to vector<100x1xf32>
    %18 = arith.addf %14, %17 : vector<100x1xf32>
    %19 = math.rsqrt %18 : vector<100x1xf32>
    %20 = vector.broadcast %19 : vector<100x1xf32> to vector<100x32xf32>
    %21 = arith.mulf %16, %20 : vector<100x32xf32>
    %22 = vector.broadcast %2 : vector<1x32xf32> to vector<100x32xf32>
    %23 = arith.mulf %21, %22 : vector<100x32xf32>
    %24 = vector.broadcast %3 : vector<1x32xf32> to vector<100x32xf32>
    %25 = arith.addf %23, %24 : vector<100x32xf32>
    %cst_10 = arith.constant dense<0.000000e+00> : vector<32xf32>
    %26 = vector.multi_reduction <add>, %25, %cst_10 [0] : vector<100x32xf32> to vector<32xf32>
    %27 = vector.shape_cast %26 : vector<32xf32> to vector<1x32xf32>
    %cst_11 = arith.constant 1.000000e+02 : f32
    %28 = vector.broadcast %cst_11 : f32 to vector<1x32xf32>
    %29 = arith.divf %27, %28 : vector<1x32xf32>
    %c0_12 = arith.constant 0 : index
    %c0_13 = arith.constant 0 : index
    %30 = vector.load %arg4[%c0_12, %c0_13] : memref<32x10xf32, #tpu.memory_space<vmem>>, vector<32x10xf32>
    %31 = arith.truncf %29 : vector<1x32xf32> to vector<1x32xbf16>
    %32 = arith.truncf %30 : vector<32x10xf32> to vector<32x10xbf16>
    %cst_14 = arith.constant dense<0.000000e+00> : vector<1x10xf32>
    %33 = tpu.matmul %31, %32, %cst_14 {dimension_numbers = #tpu.dot_dimension_numbers<[1], [0], [0], [1], [0, 0, 1, 1], [], []>} : vector<1x32xbf16>, vector<32x10xbf16>, vector<1x10xf32> -> vector<1x10xf32>
    %c0_15 = arith.constant 0 : index
    %c0_16 = arith.constant 0 : index
    %34 = vector.load %arg5[%c0_15, %c0_16] : memref<1x10xf32, #tpu.memory_space<vmem>>, vector<1x10xf32>
    %35 = arith.addf %33, %34 : vector<1x10xf32>
    %c0_17 = arith.constant 0 : index
    %c0_18 = arith.constant 0 : index
    %c0_19 = arith.constant 0 : index
    %36 = vector.load %arg6[%c0_17, %c0_18, %c0_19] : memref<1x1x10xf32, #tpu.memory_space<vmem>>, vector<1x1x10xf32>
    %37 = vector.shape_cast %36 : vector<1x1x10xf32> to vector<1x10xf32>
    %38 = vector.shape_cast %35 : vector<1x10xf32> to vector<1x1x10xf32>
    tpu.vector_store %arg6[%c0_17, %c0_18, %c0_19], %38 {strides = array<i32>} : memref<1x1x10xf32, #tpu.memory_space<vmem>>, vector<1x1x10xf32>,
    return
  }
  func.func @transform_0(%arg0: i32) -> (i32, i32, i32) {
    %c0_i32 = arith.constant 0 : i32
    %c0_i32_0 = arith.constant 0 : i32
    %c0_i32_1 = arith.constant 0 : i32
    return %arg0, %c0_i32, %c0_i32_0 : i32, i32, i32
  }
  func.func @transform_1(%arg0: i32) -> (i32, i32) {
    %c0_i32 = arith.constant 0 : i32
    %c0_i32_0 = arith.constant 0 : i32
    %c0_i32_1 = arith.constant 0 : i32
    return %c0_i32, %c0_i32_0 : i32, i32
  }
  func.func @transform_2(%arg0: i32) -> (i32, i32) {
    %c0_i32 = arith.constant 0 : i32
    %c0_i32_0 = arith.constant 0 : i32
    %c0_i32_1 = arith.constant 0 : i32
    return %c0_i32, %c0_i32_0 : i32, i32
  }
  func.func @transform_3(%arg0: i32) -> (i32, i32) {
    %c0_i32 = arith.constant 0 : i32
    %c0_i32_0 = arith.constant 0 : i32
    %c0_i32_1 = arith.constant 0 : i32
    return %c0_i32, %c0_i32_0 : i32, i32
  }
  func.func @transform_4(%arg0: i32) -> (i32, i32) {
    %c0_i32 = arith.constant 0 : i32
    %c0_i32_0 = arith.constant 0 : i32
    %c0_i32_1 = arith.constant 0 : i32
    return %c0_i32, %c0_i32_0 : i32, i32
  }
  func.func @transform_5(%arg0: i32) -> (i32, i32, i32) {
    %c0_i32 = arith.constant 0 : i32
    %c0_i32_0 = arith.constant 0 : i32
    %c0_i32_1 = arith.constant 0 : i32
    return %arg0, %c0_i32, %c0_i32_0 : i32, i32, i32
  }
}

</mosaic_0001>

<bundles_post_ra>
// kernel: student_mlp_network_forward.4
= control target key start
LH: loop header
LB: loop body
LE: loop exit
PB: predicated region body
PF: predicated region fallthrough
CT: control target
= control target key end

     0   :  { %s454_s15 = smov 0   ;;  %s519_s0 = inlined_call_operand.vmem [shape: f32[4,50,12], index: 0, kind: input, shape index: {}]   ;;  %s520_s1 = inlined_call_operand.vmem [shape: f32[12,32], index: 1, kind: input, shape index: {}]   ;;  %s521_s2 = inlined_call_operand.vmem [shape: f32[1,32], index: 2, kind: input, shape index: {}]   ;;  %s522_s3 = inlined_call_operand.vmem [shape: f32[50,32], index: 3, kind: input, shape index: {}]   ;;  %s523_s4 = inlined_call_operand.vmem [shape: f32[4,50,32], index: 4, kind: output, shape index: {}]  }
   0x1 LB: > { %s379_s16 = sadd.s32 4294967295, %s427_s15   ;;  %p383_p0 = scmp.ge.s32.totalorder %s427_s15, 1  ;;  %s427_s15 = sphi %s454_s15, %s14_s15  }
   0x2   : > { %p162_p1 = scmp.lt.s32.totalorder %s427_s15, 5 }
   0x4   : > { %p163_p2 = pnand %p383_p0, %p162_p1 }
   0x5   : > { %v206_v0 = vld [vmem:[%s520_s1] sm:$0xff] (!%p163_p2)  ;;  %v207_v1 = vld [vmem:[%s520_s1 + $0x8] sm:$0xf] (!%p163_p2)  ;;  %vm233_vm0 = vcmask (!%p163_p2), 1045504   ;;  %p188_p3 = scmp.lt.s32.totalorder (!%p163_p2), %s379_s16, 3  ;;  %vm220_vm1 = vcmask (!%p163_p2), 97280  }
   0x6   : > { %166 = sbr.rel (%p163_p2) target bundleno = 242 (0xf2), region = 36  ;;  %v212_v2 = vpack.c.bf16 (!%p163_p2), %v207_v1, %v206_v0  ;;  %v386_v15 = vld [vmem:[%s521_s2] ss:$0 sm:$0xff] (!%p163_p2)  ;;  %v303_v17 = vld [vmem:[%s522_s3 + $0x10] sm:$0xff] (!%p163_p2)  ;;  %vm315_vm2 = vcmask (!%p163_p2), 261120   ;;  %v304_v28 = vld [vmem:[%s522_s3 + $0x18] sm:$0xff] (!%p163_p2) }
   0x7   : > { %v307_v20 = vld [vmem:[%s522_s3 + $0x30] sm:$0x3] (!%p163_p2)  ;;  %v301_v22 = vld [vmem:[%s522_s3] sm:$0xff] (!%p163_p2)  ;;  %vm322_vm3 = vcmask (!%p163_p2), 254976   ;;  %v302_v34 = vld [vmem:[%s522_s3 + $0x8] sm:$0xff] (!%p163_p2) }
   0x8   : > { %410 = vmatprep.subr.msk.bf16.mxu0 (!%p163_p2), %vm233_vm0, %v212_v2  ;;  %411 = vmatprep.subr.msk.bf16.mxu1 (!%p163_p2), %vm233_vm0, %v212_v2  ;;  %v235_v3 = vsel (!%p163_p2), %vm233_vm0, %v212_v2, 0  ;;  %v305_v26 = vld [vmem:[%s522_s3 + $0x20] sm:$0xff] (!%p163_p2)  ;;  %v306_v39 = vld [vmem:[%s522_s3 + $0x28] sm:$0xff] (!%p163_p2) }
   0x9   : > { %399 = vmatpush3.bf16.msra.mxu0 (!%p163_p2), %v235_v3  ;;  %409 = vmatpush3.bf16.msra.mxu1 (!%p163_p2), %v235_v3 }
   0xd   : > { %s525_s16 = smov (!%p188_p3, %s379_s16), 3 }
   0xe   : > { %s412_s21 = smul.u32 56, %s525_s16 }
  0x10   : > { %s192_s24 = scalar_lea.vmem %s519_s0, %s412_s21  ;;  %s489_s9 = scalar_lea.vmem %s523_s4, %s412_s21 }
  0x11   : > { %v199_v4 = vld [vmem:[%s192_s24] sm:$0xff]  ;;  %v200_v5 = vld [vmem:[%s192_s24 + $0x8] sm:$0xff]  ;;  %v201_v9 = vld [vmem:[%s192_s24 + $0x10] sm:$0xff] }
  0x12   : > { %v203_v6 = vld [vmem:[%s192_s24 + $0x20] sm:$0xff]  ;;  %v208_v7 = vpack.c.bf16 %v200_v5, %v199_v4  ;;  %v204_v8 = vld [vmem:[%s192_s24 + $0x28] sm:$0xff]  ;;  %v202_v10 = vld [vmem:[%s192_s24 + $0x18] sm:$0xff] }
  0x13   : > { %v210_v11 = vpack.c.bf16 %v204_v8, %v203_v6  ;;  %v209_v12 = vpack.c.bf16 %v202_v10, %v201_v9  ;;  %v205_v13 = vld [vmem:[%s192_s24 + $0x30] sm:$0x3] }
  0x14   : > { %400 = vmatprep.mubr.msk.bf16.mxu0 %vm220_vm1, %v208_v7  ;;  %v211_v14 = vpack.c.bf16 %v205_v13, %v205_v13 }
  0x15   : > { %404 = vmatprep.mubr.msk.bf16.mxu1 %vm220_vm1, %v210_v11  ;;  %401 = vmatmul.mubr.msk.bf16.vlgmr.msra.gmra.mrb[0].mxu0 %vm220_vm1, %v209_v12 }
  0x16   : > { %405 = vmatmul.mubr.msk.bf16.vlgmr.msra.gmra.mrb[0].mxu1 %vm220_vm1, %v211_v14 }
  0xe8   : > { %v402_v16 = vpop.f32.mrb[0].mxu0 }
  0xe9   : > { %v280_v18 = vadd.f32 %v402_v16, %v386_v15  ;;  %v406_v19 = vpop.f32.mrb[0].mxu1  ;;  %v271_v21 = vpop.f32.mrb[1].mxu0 }
  0xea   : > { %v296_v23 = vadd.f32 %v406_v19, %v386_v15  ;;  %v272_v24 = vadd.f32 %v386_v15, %v271_v21  ;;  %v287_v25 = vpop.f32.mrb[1].mxu1  ;;  %v403_v27 = vpop.f32.mrb[2].mxu0 }
  0xeb   : > { %v310_v29 = vadd.f32 %v303_v17, %v280_v18  ;;  %v288_v30 = vadd.f32 %v386_v15, %v287_v25  ;;  %v283_v31 = vadd.f32 %v403_v27, %v386_v15  ;;  %v407_v32 = vpop.f32.mrb[2].mxu1  ;;  %v274_v33 = vpop.f32.mrb[3].mxu0 }
  0xec   : > { %v314_v35 = vadd.f32 %v307_v20, %v296_v23  ;;  %v308_v36 = vadd.f32 %v301_v22, %v272_v24  ;;  %v275_v37 = vadd.f32 %v386_v15, %v274_v33  ;;  %v290_v38 = vpop.f32.mrb[3].mxu1 }
  0xed   : > { %318 = vst.msk [vmem:[%s489_s9 + $0x10] sm:$0xff] %vm315_vm2, %v310_v29  ;;  %v312_v40 = vadd.f32 %v305_v26, %v288_v30  ;;  %v311_v41 = vadd.f32 %v304_v28, %v283_v31  ;;  %v291_v42 = vadd.f32 %v386_v15, %v290_v38 }
  0xee   : > { %323 = vst.msk [vmem:[%s489_s9 + $0x30] sm:$0x3] %vm322_vm3, %v314_v35  ;;  %v309_v43 = vadd.f32 %v302_v34, %v275_v37 }
  0xef   : > { %316 = vst.msk [vmem:[%s489_s9] sm:$0xff] %vm315_vm2, %v308_v36  ;;  %320 = vst.msk [vmem:[%s489_s9 + $0x20] sm:$0xff] %vm315_vm2, %v312_v40  ;;  %v313_v44 = vadd.f32 %v306_v39, %v291_v42 }
  0xf0   : > { %319 = vst.msk [vmem:[%s489_s9 + $0x18] sm:$0xff] %vm315_vm2, %v311_v41  ;;  %317 = vst.msk [vmem:[%s489_s9 + $0x8] sm:$0xff] %vm315_vm2, %v309_v43 }
  0xf1   : > { %321 = vst.msk [vmem:[%s489_s9 + $0x28] sm:$0xff] %vm315_vm2, %v313_v44 }
  0xf2 PF: > { %s14_s15 = sadd.s32 1, %s427_s15  }
  0xf3   : > { %p11_p4 = scmp.ge.s32.totalorder %s14_s15, 6  }
  0xf5   :  { %13 = sbr.rel (!%p11_p4) target bundleno = 1 (0x1), region = 66 }

// kernel: student_mlp_network_forward.7
= control target key start
LH: loop header
LB: loop body
LE: loop exit
PB: predicated region body
PF: predicated region fallthrough
CT: control target
= control target key end

     0   :  { %10 = vsyncpa [#allocation3], 0  ;;  %s1080_s0 = inlined_call_operand.vmem [shape: f32[2,100,32], index: 0, kind: input, shape index: {}]   ;;  %s1081_s1 = inlined_call_operand.vmem [shape: f32[1,32], index: 1, kind: input, shape index: {}]   ;;  %s1082_s2 = inlined_call_operand.vmem [shape: f32[1,32], index: 2, kind: input, shape index: {}]   ;;  %s1083_s3 = inlined_call_operand.vmem [shape: f32[32,10], index: 3, kind: input, shape index: {}]   ;;  %s1084_s4 = inlined_call_operand.vmem [shape: f32[1,10], index: 4, kind: input, shape index: {}]   ;;  %s1085_s5 = inlined_call_operand.hbm [shape: f32[2,1,10], index: 5, kind: output, shape index: {}]  }
   0x1   :  { %12 = vsyncpa [#allocation3 + $0x1], 0  ;;  %s789_s18 = smov 0   ;;  %s791_s19 = smov 0  }
   0x2   :  { %s793_s20 = smov 0   ;;  %s795_s21 = smov 0  }
   0x3 LB: > { %s810_s22 = sadd.s32 4294967295, %s754_s21   ;;  %s602_s23 = sadd.s32 4294967294, %s754_s21   ;;  %s754_s21 = sphi %s795_s21, %s1091_s21   ;;  %s750_s20 = sphi %s793_s20, %s1090_s20   ;;  %s746_s19 = sphi %s791_s19, %s1089_s19   ;;  %s742_s18 = sphi %s789_s18, %s1088_s18  }
   0x4   : > { %s814_s24 = sadd.s32 1, %s754_s21   ;;  %s135_s25 = sadd.s32 1, %s750_s20 }
   0x5   : > { %s132_s26 = ssub.s32 %s754_s21, %s814_s24  ;;  %p145_p0 = scmp.ne.s32.totalorder %s750_s20, %s746_s19 }
   0x6   : > { %p133_p1 = scmp.eq.s32.totalorder %s132_s26, 0  ;;  %p146_p2 = scmp.eq.s32.totalorder %s810_s22, 1 }
   0x7   : > { %p151_p3 = scmp.ne.s32.totalorder %s746_s19, %s742_s18  ;;  %p152_p4 = scmp.eq.s32.totalorder %s602_s23, 1 }
   0x8   : > { %s825_s27 = scalar_select %p133_p1, %s750_s20, %s135_s25  }
   0x9   : > { %p827_p5 = por %p146_p2, %p145_p0  ;;  %p831_p6 = por %p152_p4, %p151_p3 }
   0xa   : > { %p605_p7 = scmp.ge.s32.totalorder %s754_s21, 1  ;;  %p190_p8 = scmp.lt.s32.totalorder %s754_s21, 3 }
   0xc   : > { %p191_p9 = pnand %p605_p7, %p190_p8 }
   0xd   : > { %p217_p10 = scmp.lt.s32.totalorder (!%p191_p9), %s810_s22, 1  ;;  %vm238_vm0 = vcmask (!%p191_p9), 261120   ;;  %vm275_vm1 = vcmask (!%p191_p9), 257024   ;;  %vm757_vm2 = vmmov (!%p191_p9), 0   ;;  %vm532_vm3 = vcmask (!%p191_p9), 73728   ;;  %s758_s16 = smov (!%p191_p9), [#allocation2]  }
   0xe   : > { %194 = sbr.rel (%p191_p9) target bundleno = 614 (0x266), region = 40  ;;  %s696_s17 = sshll.u32 (!%p191_p9), %s758_s16, 4  ;;  %s697_s17 = int_to_ptr.vmem [resolvable:$false] %s696_s17 }
   0xf   : > { %s698_s23 = scalar_lea.vmem (!%p191_p9), %s697_s17, 32 }
  0x15   : > { %s218_s30 = scalar_select %p217_p10, %s810_s22, 1 }
  0x17   : > { %s624_s6 = smul.u32 104, %s218_s30 }
  0x19   : > { %s842_s9 = scalar_lea.vmem %s1080_s0, %s624_s6  ;;  %s215_s6 = sand.u32 1, %s746_s19  }
  0x1a   : > { %v223_v0 = vld [vmem:[%s842_s9] sm:$0xff]  ;;  %v225_v1 = vld [vmem:[%s842_s9 + $0x10] sm:$0xff]  ;;  %v224_v2 = vld [vmem:[%s842_s9 + $0x8] sm:$0xff]  ;;  %s216_s10 = scalar_lea.vmem [#allocation2], %s215_s6 }
  0x1b   : > { %v239_v3 = vsel %vm238_vm0, %v223_v0, 0.0  ;;  %v245_v4 = vsel %vm238_vm0, %v225_v1, 0.0  ;;  %v226_v5 = vld [vmem:[%s842_s9 + $0x18] sm:$0xff]  ;;  %v242_v6 = vsel %vm238_vm0, %v224_v2, 0.0  ;;  %v227_v8 = vld [vmem:[%s842_s9 + $0x20] sm:$0xff]  ;;  %v228_v9 = vld [vmem:[%s842_s9 + $0x28] sm:$0xff] }
  0x1c   : > { %240 = vadd.xlane.f32.xlu0 %v239_v3  ;;  %246 = vadd.xlane.f32.xlu1 %v245_v4  ;;  %v248_v7 = vsel %vm238_vm0, %v226_v5, 0.0  ;;  %v251_v10 = vsel %vm238_vm0, %v227_v8, 0.0  ;;  %v254_v11 = vsel %vm238_vm0, %v228_v9, 0.0  ;;  %v229_v12 = vld [vmem:[%s842_s9 + $0x30] sm:$0xff]  ;;  %v230_v13 = vld [vmem:[%s842_s9 + $0x38] sm:$0xff]  ;;  %v861_v16 = vld [vmem:[%s842_s9 + $0x40] sm:$0xff] }
  0x1d   : > { %v257_v14 = vsel %vm238_vm0, %v229_v12, 0.0  ;;  %v260_v15 = vsel %vm238_vm0, %v230_v13, 0.0  ;;  %v864_v17 = vld [vmem:[%s842_s9 + $0x48] sm:$0xff]  ;;  %v263_v18 = vsel %vm238_vm0, %v861_v16, 0.0  ;;  %v871_v20 = vld [vmem:[%s842_s9 + $0x50] sm:$0xff]  ;;  %v874_v21 = vld [vmem:[%s842_s9 + $0x58] sm:$0xff] }
  0x1e   : > { %v266_v19 = vsel %vm238_vm0, %v864_v17, 0.0  ;;  %v269_v22 = vsel %vm238_vm0, %v871_v20, 0.0  ;;  %v272_v23 = vsel %vm238_vm0, %v874_v21, 0.0  ;;  %v881_v24 = vld [vmem:[%s842_s9 + $0x60] sm:$0xf]  ;;  %s610_s9 = sshll.u32 %s810_s22, 4 }
  0x1f   : > { %v276_v25 = vsel %vm275_vm1, %v881_v24, 0.0  ;;  %s547_s11 = sshll.u32 %s216_s10, 4  ;;  %s1038_s14 = scalar_lea.hbm %s1085_s5, %s610_s9  ;;  %s1040_s11 = int_to_ptr.vmem [resolvable:$true] %s547_s11 }
  0x20   : > { %243 = vadd.xlane.f32.xlu0 %v242_v6  ;;  %249 = vadd.xlane.f32.xlu1 %v248_v7  ;;  %s535_s22 = scalar_lea.sflag [#allocation3], %s215_s6  ;;  %s692_s15 = scalar_lea.vmem %s1040_s11, 16 }
  0x21   : > { %p693_p11 = scmp.ne.s32.totalorder %s1040_s11, %s692_s15  ;;  %p699_p0 = scmp.lt.s32.totalorder %s1040_s11, %s697_s17 }
  0x22   : > { %p700_p1 = scmp.lt.s32.totalorder %s698_s23, %s692_s15 }
  0x23   : > { %p694_p12 = pnand %p693_p11, %p827_p5 }
  0x24   : > { %252 = vadd.xlane.f32.xlu0 %v251_v10  ;;  %255 = vadd.xlane.f32.xlu1 %v254_v11  ;;  %p701_p2 = por %p700_p1, %p699_p0 }
  0x25   : > { %p695_p13 = pneg %p694_p12 }
  0x27   : > { %p702_p3 = pnand %p701_p2, %p695_p13 }
  0x28   : > { %258 = vadd.xlane.f32.xlu0 %v257_v14  ;;  %261 = vadd.xlane.f32.xlu1 %v260_v15 }
  0x2c   : > { %264 = vadd.xlane.f32.xlu0 %v263_v18  ;;  %267 = vadd.xlane.f32.xlu1 %v266_v19 }
  0x30   : > { %270 = vadd.xlane.f32.xlu0 %v269_v22  ;;  %273 = vadd.xlane.f32.xlu1 %v272_v23 }
  0x34   : > { %277 = vadd.xlane.f32.xlu0 %v276_v25 }
  0xa9   : > { %v241_v26 = vpop.xlane.xlu0 %240  ;;  %v247_v27 = vpop.xlane.xlu1 %246 }
  0xaa   : > { %v280_v28 = vmul.f32 0.03125, %v241_v26  ;;  %v282_v29 = vmul.f32 0.03125, %v247_v27 }
  0xac   : > { %v885_v30 = vsub.f32 %v223_v0, %v280_v28  ;;  %v887_v31 = vsub.f32 %v225_v1, %v282_v29  ;;  %v481_v28 = vld [vmem:[%s1083_s3] sm:$0xff]  ;;  %v483_v29 = vld [vmem:[%s1083_s3 + $0x10] sm:$0xff] }
  0xad   : > { %v244_v32 = vpop.xlane.xlu0 %243  ;;  %v250_v33 = vpop.xlane.xlu1 %249 }
  0xae   : > { %v281_v34 = vmul.f32 0.03125, %v244_v32  ;;  %v283_v35 = vmul.f32 0.03125, %v250_v33  ;;  %v306_v36 = vmul.f32 %v885_v30, %v885_v30  ;;  %v308_v37 = vmul.f32 %v887_v31, %v887_v31 }
  0xaf   : > { %v756_v32 = vmov 0.0  }
  0xb0   : > { %v893_v38 = vsub.f32 %v224_v2, %v281_v34  ;;  %v895_v39 = vsub.f32 %v226_v5, %v283_v35  ;;  %v319_v40 = vsel %vm238_vm0, %v306_v36, 0.0  ;;  %v325_v43 = vsel %vm238_vm0, %v308_v37, 0.0  ;;  %616 = vmatprep.subr.bf16.mxu0 %v756_v32  ;;  %v484_v34 = vld [vmem:[%s1083_s3 + $0x18] sm:$0xff]  ;;  %620 = vmatprep.mubr.msk.bf16.mxu0 %vm757_vm2, %v756_v32 }
  0xb1   : > { %320 = vadd.xlane.f32.xlu1 %v319_v40  ;;  %v253_v41 = vpop.xlane.xlu0 %252  ;;  %v256_v42 = vpop.xlane.xlu1 %255  ;;  %v487_v35 = vpack.c.bf16 %v484_v34, %v483_v29 }
  0xb2   : > { %v284_v44 = vmul.f32 0.03125, %v253_v41  ;;  %v285_v45 = vmul.f32 0.03125, %v256_v42  ;;  %v307_v46 = vmul.f32 %v893_v38, %v893_v38  ;;  %v309_v47 = vmul.f32 %v895_v39, %v895_v39 }
  0xb4   : > { %v903_v48 = vsub.f32 %v227_v8, %v284_v44  ;;  %v905_v49 = vsub.f32 %v228_v9, %v285_v45  ;;  %v322_v50 = vsel %vm238_vm0, %v307_v46, 0.0  ;;  %v328_v53 = vsel %vm238_vm0, %v309_v47, 0.0 }
  0xb5   : > { %326 = vadd.xlane.f32.xlu1 %v325_v43  ;;  %323 = vadd.xlane.f32.xlu0 %v322_v50  ;;  %v259_v51 = vpop.xlane.xlu0 %258  ;;  %v262_v52 = vpop.xlane.xlu1 %261 }
  0xb6   : > { %v286_v54 = vmul.f32 0.03125, %v259_v51  ;;  %v287_v55 = vmul.f32 0.03125, %v262_v52  ;;  %v310_v56 = vmul.f32 %v903_v48, %v903_v48  ;;  %v311_v57 = vmul.f32 %v905_v49, %v905_v49 }
  0xb8   : > { %v913_v58 = vsub.f32 %v229_v12, %v286_v54  ;;  %v915_v59 = vsub.f32 %v230_v13, %v287_v55  ;;  %v331_v60 = vsel %vm238_vm0, %v310_v56, 0.0  ;;  %v334_v63 = vsel %vm238_vm0, %v311_v57, 0.0 }
  0xb9   : > { %329 = vadd.xlane.f32.xlu0 %v328_v53  ;;  %332 = vadd.xlane.f32.xlu1 %v331_v60  ;;  %v265_v61 = vpop.xlane.xlu0 %264  ;;  %v268_v62 = vpop.xlane.xlu1 %267 }
  0xba   : > { %v288_v0 = vmul.f32 0.03125, %v265_v61  ;;  %v289_v1 = vmul.f32 0.03125, %v268_v62  ;;  %v312_v2 = vmul.f32 %v913_v58, %v913_v58  ;;  %v313_v3 = vmul.f32 %v915_v59, %v915_v59 }
  0xbc   : > { %v924_v4 = vsub.f32 %v861_v16, %v288_v0  ;;  %v927_v5 = vsub.f32 %v864_v17, %v289_v1  ;;  %v337_v6 = vsel %vm238_vm0, %v312_v2, 0.0  ;;  %v340_v9 = vsel %vm238_vm0, %v313_v3, 0.0  ;;  %v970_v0 = vld [vmem:[%s1081_s1] ss:$0 sm:$0xff] }
  0xbd   : > { %335 = vadd.xlane.f32.xlu0 %v334_v63  ;;  %338 = vadd.xlane.f32.xlu1 %v337_v6  ;;  %v271_v7 = vpop.xlane.xlu0 %270  ;;  %v274_v8 = vpop.xlane.xlu1 %273 }
  0xbe   : > { %v290_v10 = vmul.f32 0.03125, %v271_v7  ;;  %v291_v11 = vmul.f32 0.03125, %v274_v8  ;;  %v314_v12 = vmul.f32 %v924_v4, %v924_v4  ;;  %v315_v13 = vmul.f32 %v927_v5, %v927_v5 }
  0xc0   : > { %v936_v14 = vsub.f32 %v871_v20, %v290_v10  ;;  %v939_v15 = vsub.f32 %v874_v21, %v291_v11  ;;  %v343_v16 = vsel %vm238_vm0, %v314_v12, 0.0  ;;  %v346_v19 = vsel %vm238_vm0, %v315_v13, 0.0  ;;  %v977_v13 = vld [vmem:[%s1082_s2] ss:$0 sm:$0xff] }
  0xc1   : > { %341 = vadd.xlane.f32.xlu0 %v340_v9  ;;  %344 = vadd.xlane.f32.xlu1 %v343_v16  ;;  %v278_v17 = vpop.xlane.xlu0 %277 }
  0xc2   : > { %v292_v18 = vmul.f32 0.03125, %v278_v17  ;;  %v316_v22 = vmul.f32 %v936_v14, %v936_v14  ;;  %v317_v23 = vmul.f32 %v939_v15, %v939_v15 }
  0xc4   : > { %v948_v20 = vsub.f32 %v881_v24, %v292_v18  ;;  %v349_v21 = vsel %vm238_vm0, %v316_v22, 0.0  ;;  %v352_v25 = vsel %vm238_vm0, %v317_v23, 0.0  ;;  %v482_v24 = vld [vmem:[%s1083_s3 + $0x8] sm:$0xff] }
  0xc5   : > { %347 = vadd.xlane.f32.xlu0 %v346_v19  ;;  %350 = vadd.xlane.f32.xlu1 %v349_v21  ;;  %v486_v33 = vpack.c.bf16 %v482_v24, %v481_v28 }
  0xc6   : > { %v318_v26 = vmul.f32 %v948_v20, %v948_v20 }
  0xc7   : > { %617 = vmatpush3.bf16.msra.mxu0 %v486_v33 }
  0xc8   : > { %v355_v27 = vsel %vm275_vm1, %v318_v26, 0.0  ;;  %618 = vmatprep.subr.bf16.mxu0 %v756_v32 }
  0xc9   : > { %353 = vadd.xlane.f32.xlu0 %v352_v25  ;;  %356 = vadd.xlane.f32.xlu1 %v355_v27 }
  0xcb   : > { %619 = vmatpush3.bf16.msra.mxu0 %v487_v35 }
 0x13e   : > { %v321_v36 = vpop.xlane.xlu1 %320 }
 0x13f   : > { %v358_v37 = vmul.f32 0.03125, %v321_v36 }
 0x141   : > { %v371_v40 = vadd.f32 1e-05, %v358_v37 }
 0x142   : > { %v327_v41 = vpop.xlane.xlu1 %326  ;;  %v324_v42 = vpop.xlane.xlu0 %323 }
 0x143   : > { %666 = vrsqrt.f32 %v371_v40  ;;  %v360_v43 = vmul.f32 0.03125, %v327_v41  ;;  %v359_v44 = vmul.f32 0.03125, %v324_v42 }
 0x145   : > { %v373_v45 = vadd.f32 1e-05, %v360_v43  ;;  %v372_v46 = vadd.f32 1e-05, %v359_v44 }
 0x146   : > { %v333_v47 = vpop.xlane.xlu1 %332  ;;  %v330_v50 = vpop.xlane.xlu0 %329 }
 0x147   : > { %668 = vrsqrt.f32 %v373_v45  ;;  %v362_v51 = vmul.f32 0.03125, %v333_v47  ;;  %v361_v52 = vmul.f32 0.03125, %v330_v50 }
 0x148   : > { %670 = vrsqrt.f32 %v372_v46 }
 0x149   : > { %v375_v53 = vadd.f32 1e-05, %v362_v51  ;;  %v374_v54 = vadd.f32 1e-05, %v361_v52 }
 0x14a   : > { %v339_v55 = vpop.xlane.xlu1 %338  ;;  %v336_v56 = vpop.xlane.xlu0 %335 }
 0x14b   : > { %672 = vrsqrt.f32 %v375_v53  ;;  %v364_v57 = vmul.f32 0.03125, %v339_v55  ;;  %v363_v60 = vmul.f32 0.03125, %v336_v56 }
 0x14c   : > { %674 = vrsqrt.f32 %v374_v54 }
 0x14d   : > { %v667_v61 = vpop.eup %666  ;;  %v377_v62 = vadd.f32 1e-05, %v364_v57  ;;  %v376_v63 = vadd.f32 1e-05, %v363_v60 }
 0x14e   : > { %v397_v1 = vmul.f32 %v667_v61, %v885_v30  ;;  %v345_v2 = vpop.xlane.xlu1 %344  ;;  %v342_v3 = vpop.xlane.xlu0 %341 }
 0x14f   : > { %676 = vrsqrt.f32 %v377_v62  ;;  %v366_v6 = vmul.f32 0.03125, %v345_v2  ;;  %v365_v7 = vmul.f32 0.03125, %v342_v3 }
 0x150   : > { %678 = vrsqrt.f32 %v376_v63  ;;  %v416_v9 = vmul.f32 %v970_v0, %v397_v1 }
 0x151   : > { %v669_v8 = vpop.eup %668  ;;  %v379_v10 = vadd.f32 1e-05, %v366_v6  ;;  %v378_v11 = vadd.f32 1e-05, %v365_v7 }
 0x152   : > { %v671_v12 = vpop.eup %670  ;;  %v399_v16 = vmul.f32 %v669_v8, %v887_v31  ;;  %v351_v30 = vpop.xlane.xlu1 %350  ;;  %v435_v25 = vadd.f32 %v977_v13, %v416_v9 }
 0x153   : > { %v348_v17 = vpop.xlane.xlu0 %347  ;;  %v398_v18 = vmul.f32 %v671_v12, %v893_v38  ;;  %680 = vrsqrt.f32 %v379_v10  ;;  %v368_v19 = vmul.f32 0.03125, %v351_v30 }
 0x154   : > { %v367_v22 = vmul.f32 0.03125, %v348_v17  ;;  %v418_v23 = vmul.f32 %v970_v0, %v399_v16  ;;  %682 = vrsqrt.f32 %v378_v11  ;;  %v448_v41 = vsel %vm238_vm0, %v435_v25, 0.0 }
 0x155   : > { %v673_v21 = vpop.eup %672  ;;  %v417_v26 = vmul.f32 %v970_v0, %v398_v18  ;;  %v381_v27 = vadd.f32 1e-05, %v368_v19 }
 0x156   : > { %v380_v28 = vadd.f32 1e-05, %v367_v22  ;;  %v675_v24 = vpop.eup %674  ;;  %v437_v31 = vadd.f32 %v977_v13, %v418_v23  ;;  %v401_v29 = vmul.f32 %v673_v21, %v903_v48  ;;  %v357_v32 = vpop.xlane.xlu1 %356 }
 0x157   : > { %v354_v38 = vpop.xlane.xlu0 %353  ;;  %v436_v33 = vadd.f32 %v977_v13, %v417_v26  ;;  %v400_v34 = vmul.f32 %v675_v24, %v895_v39  ;;  %684 = vrsqrt.f32 %v381_v27  ;;  %v370_v35 = vmul.f32 0.03125, %v357_v32 }
 0x158   : > { %v420_v36 = vmul.f32 %v970_v0, %v401_v29  ;;  %686 = vrsqrt.f32 %v380_v28  ;;  %v369_v37 = vmul.f32 0.03125, %v354_v38  ;;  %v451_v45 = vsel %vm238_vm0, %v437_v31, 0.0 }
 0x159   : > { %v677_v40 = vpop.eup %676  ;;  %v449_v42 = vsel %vm238_vm0, %v436_v33, 0.0  ;;  %v419_v43 = vmul.f32 %v970_v0, %v400_v34  ;;  %v383_v48 = vadd.f32 1e-05, %v370_v35 }
 0x15a   : > { %v679_v44 = vpop.eup %678  ;;  %v450_v46 = vadd.f32 %v449_v42, %v448_v41  ;;  %v403_v39 = vmul.f32 %v677_v40, %v913_v58  ;;  %v382_v47 = vadd.f32 1e-05, %v369_v37  ;;  %v439_v50 = vadd.f32 %v977_v13, %v420_v36 }
 0x15b   : > { %v438_v51 = vadd.f32 %v977_v13, %v419_v43  ;;  %v402_v52 = vmul.f32 %v679_v44, %v905_v49  ;;  %688 = vrsqrt.f32 %v383_v48 }
 0x15c   : > { %v452_v53 = vadd.f32 %v451_v45, %v450_v46  ;;  %v422_v54 = vmul.f32 %v970_v0, %v403_v39  ;;  %690 = vrsqrt.f32 %v382_v47  ;;  %v455_v62 = vsel %vm238_vm0, %v439_v50, 0.0 }
 0x15d   : > { %v681_v55 = vpop.eup %680  ;;  %v453_v56 = vsel %vm238_vm0, %v438_v51, 0.0  ;;  %v421_v57 = vmul.f32 %v970_v0, %v402_v52 }
 0x15e   : > { %v683_v60 = vpop.eup %682  ;;  %v454_v61 = vadd.f32 %v453_v56, %v452_v53  ;;  %v405_v58 = vmul.f32 %v681_v55, %v924_v4  ;;  %v441_v63 = vadd.f32 %v977_v13, %v422_v54 }
 0x15f   : > { %v440_v49 = vadd.f32 %v977_v13, %v421_v57  ;;  %v404_v1 = vmul.f32 %v683_v60, %v915_v59 }
 0x160   : > { %v456_v2 = vadd.f32 %v455_v62, %v454_v61  ;;  %v424_v3 = vmul.f32 %v970_v0, %v405_v58  ;;  %v459_v11 = vsel %vm238_vm0, %v441_v63, 0.0 }
 0x161   : > { %v685_v6 = vpop.eup %684  ;;  %v457_v7 = vsel %vm238_vm0, %v440_v49, 0.0  ;;  %v423_v8 = vmul.f32 %v970_v0, %v404_v1 }
 0x162   : > { %v687_v9 = vpop.eup %686  ;;  %v458_v10 = vadd.f32 %v457_v7, %v456_v2  ;;  %v407_v4 = vmul.f32 %v685_v6, %v936_v14  ;;  %v443_v12 = vadd.f32 %v977_v13, %v424_v3 }
 0x163   : > { %v442_v16 = vadd.f32 %v977_v13, %v423_v8  ;;  %v406_v59 = vmul.f32 %v687_v9, %v927_v5 }
 0x164   : > { %v460_v30 = vadd.f32 %v459_v11, %v458_v10  ;;  %v426_v17 = vmul.f32 %v970_v0, %v407_v4  ;;  %v463_v25 = vsel %vm238_vm0, %v443_v12, 0.0 }
 0x165   : > { %v689_v18 = vpop.eup %688  ;;  %v461_v19 = vsel %vm238_vm0, %v442_v16, 0.0  ;;  %v425_v22 = vmul.f32 %v970_v0, %v406_v59 }
 0x166   : > { %v691_v23 = vpop.eup %690  ;;  %v462_v21 = vadd.f32 %v461_v19, %v460_v30  ;;  %v409_v14 = vmul.f32 %v689_v18, %v948_v20  ;;  %v445_v26 = vadd.f32 %v977_v13, %v426_v17 }
 0x167   : > { %v444_v27 = vadd.f32 %v977_v13, %v425_v22  ;;  %v408_v5 = vmul.f32 %v691_v23, %v939_v15 }
 0x168   : > { %v464_v28 = vadd.f32 %v463_v25, %v462_v21  ;;  %v428_v24 = vmul.f32 %v970_v0, %v409_v14  ;;  %v467_v38 = vsel %vm238_vm0, %v445_v26, 0.0 }
 0x169   : > { %v465_v31 = vsel %vm238_vm0, %v444_v27, 0.0  ;;  %v427_v29 = vmul.f32 %v970_v0, %v408_v5 }
 0x16a   : > { %v466_v32 = vadd.f32 %v465_v31, %v464_v28  ;;  %v447_v20 = vadd.f32 %v977_v13, %v428_v24 }
 0x16b   : > { %v446_v33 = vadd.f32 %v977_v13, %v427_v29  ;;  %v488_v13 = vld [vmem:[%s1084_s4] sm:$0x1] }
 0x16c   : > { %v468_v34 = vadd.f32 %v467_v38, %v466_v32  ;;  %v471_v36 = vsel %vm275_vm1, %v447_v20, 0.0 }
 0x16d   : > { %v469_v35 = vsel %vm238_vm0, %v446_v33, 0.0 }
 0x16e   : > { %v470_v15 = vadd.f32 %v469_v35, %v468_v34 }
 0x170   : > { %v472_v37 = vadd.f32 %v471_v36, %v470_v15 }
 0x172   : > { %v473_v40 = vrot.slane %v472_v37, 4 }
 0x174   : > { %v474_v41 = vadd.f32 %v473_v40, %v472_v37 }
 0x176   : > { %v475_v42 = vrot.slane %v474_v41, 2 }
 0x178   : > { %v476_v0 = vadd.f32 %v475_v42, %v474_v41 }
 0x17a   : > { %v477_v43 = vrot.slane %v476_v0, 1 }
 0x17c   : > { %v478_v48 = vadd.f32 %v477_v43, %v476_v0 }
 0x17e   : > { %v480_v44 = vmul.f32 0.01, %v478_v48 }
 0x180   : > { %v485_v45 = vpack.c.bf16 %v480_v44, %v480_v44 }
 0x182   : > { %621 = vmatmul.mubr.msk.bf16.vlgmr.msra.gmra.mrb[0].mxu0 %vm238_vm0, %v485_v45 }
 0x255   : > { %v526_v46 = vpop.f32.mrb[0].mxu0 }
 0x256   : > { %v527_v39 = vadd.f32 %v526_v46, %v488_v13  ;;  %v622_v47 = vpop.f32.mrb[1].mxu0 }
 0x257   : > { %v529_v50 = vpop.f32.mrb[2].mxu0 }
 0x258   : > { %v623_v51 = vpop.f32.mrb[3].mxu0  ;;  %533 = vst.msk [vmem:[%s216_s10] sm:$0x1] %vm532_vm3, %v527_v39 }
 0x259   : > { %705 = shalt.err (!%p702_p3)
}
 0x25a   : > { %s706_s25 = scalar_lea.hbm %s1038_s14, 16  ;;  %s710_s6 = scalar_lea.hbm %s1085_s5, 32 }
 0x25b   : > { %p707_p4 = scmp.ne.s32.totalorder %s1038_s14, %s706_s25  ;;  %p711_p9 = scmp.lt.u32.totalorder %s1038_s14, %s1085_s5 }
 0x25c   : > { %p712_p10 = scmp.lt.u32.totalorder %s710_s6, %s706_s25  ;;  %p714_p12 = scmp.lt.u32.totalorder %s706_s25, %s1038_s14 }
 0x25d   : > { %p708_p7 = pnand %p707_p4, %p827_p5 }
 0x25e   : > { %p713_p11 = por %p712_p10, %p711_p9 }
 0x25f   : > { %p709_p8 = pneg %p708_p7 }
 0x260   : > { %p715_p13 = por %p714_p12, %p713_p11 }
 0x262   : > { %p716_p0 = pnand %p715_p13, %p709_p8 }
 0x264   : > { %719 = shalt.err (!%p716_p0)
}
 0x265   : > { %625 = dma.vmem_to_hbm [thread:$0]  (%p827_p5), %s1040_s11, 16, %s1038_s14, %s535_s22  }
 0x266 PF: > { %p631_p1 = scmp.ge.s32.totalorder %s754_s21, 2  ;;  %s559_s9 = sand.u32 1, %s742_s18  }
 0x267   : > { %s560_s10 = scalar_lea.sflag [#allocation3], %s559_s9 }
 0x268   : > { %p628_p2 = pnand %p631_p1, %p831_p6 }
 0x26a   : > { %737 = dma.done.wait (!%p628_p2), %s560_s10, 16  }
 0x26b   : > { %739 = vsyncadd (!%p628_p2), %s560_s10, 4294967280  ;;  %p15_p3 = scmp.ge.s32.totalorder %s814_s24, 4   ;;  %s1088_s18 = smov %s746_s19 }
 0x26c   : > { %s1089_s19 = smov %s750_s20  ;;  %s1090_s20 = smov %s825_s27 }
 0x26d   : > { %s1091_s21 = smov %s814_s24  ;;  %17 = sbr.rel (!%p15_p3) target bundleno = 3 (0x3), region = 75 }
 0x274   :  { %564 = vsyncpa [#allocation3], 1 }
 0x275   :  { %566 = vsyncpa [#allocation3 + $0x1], 1 }

// kernel: student_mlp_network_forward.5
= control target key start
LH: loop header
LB: loop body
LE: loop exit
PB: predicated region body
PF: predicated region fallthrough
CT: control target
= control target key end

     0   :  { %s3298_s25 = smov 0   ;;  %s4016_s0 = inlined_call_operand.vmem [shape: f32[4,50,32], index: 0, kind: input, shape index: {}]   ;;  %s4017_s1 = inlined_call_operand.vmem [shape: f32[1,32], index: 1, kind: input, shape index: {}]   ;;  %s4018_s2 = inlined_call_operand.vmem [shape: f32[1,32], index: 2, kind: input, shape index: {}]   ;;  %s4019_s3 = inlined_call_operand.vmem [shape: f32[32,96], index: 3, kind: input, shape index: {}]   ;;  %s4020_s4 = inlined_call_operand.vmem [shape: f32[1,96], index: 4, kind: input, shape index: {}]   ;;  %s4021_s5 = inlined_call_operand.vmem [shape: f32[32,32], index: 5, kind: input, shape index: {}]   ;;  %s4022_s6 = inlined_call_operand.vmem [shape: f32[1,32], index: 6, kind: input, shape index: {}]   ;;  %s4023_s7 = inlined_call_operand.vmem [shape: f32[1,32], index: 7, kind: input, shape index: {}]   ;;  %s4024_s8 = inlined_call_operand.vmem [shape: f32[1,32], index: 8, kind: input, shape index: {}]   ;;  %s4025_s9 = inlined_call_operand.vmem [shape: f32[32,64], index: 9, kind: input, shape index: {}]   ;;  %s4026_s10 = inlined_call_operand.vmem [shape: f32[1,64], index: 10, kind: input, shape index: {}]   ;;  %s4027_s11 = inlined_call_operand.vmem [shape: f32[64,32], index: 11, kind: input, shape index: {}]   ;;  %s4028_s12 = inlined_call_operand.vmem [shape: f32[1,32], index: 12, kind: input, shape index: {}]   ;;  %s4029_s13 = inlined_call_operand.vmem [shape: f32[4,50,32], index: 13, kind: output, shape index: {}]  }
   0x1 LB: > { %s2603_s26 = sadd.s32 4294967295, %s3215_s25   ;;  %p2607_p0 = scmp.ge.s32.totalorder %s3215_s25, 1  ;;  %s3215_s25 = sphi %s3298_s25, %s23_s25  }
   0x2   : > { %p387_p1 = scmp.lt.s32.totalorder %s3215_s25, 5 }
   0x4   : > { %p388_p2 = pnand %p2607_p0, %p387_p1 }
   0x5   : > { %p431_p3 = scmp.lt.s32.totalorder (!%p388_p2), %s2603_s26, 3  ;;  %vm451_vm0 = vcmask (!%p388_p2), 261120   ;;  %vm470_vm1 = vcmask (!%p388_p2), 254976   ;;  %v571_v49 = vld [vmem:[%s4019_s3] sm:$0xff] (!%p388_p2)  ;;  %v572_v50 = vld [vmem:[%s4019_s3 + $0x8] sm:$0xff] (!%p388_p2)  ;;  %v573_v51 = vld [vmem:[%s4019_s3 + $0x10] sm:$0xff] (!%p388_p2) }
   0x6   : > { %391 = sbr.rel (%p388_p2) target bundleno = 3639 (0xe37), region = 72  ;;  %v579_v52 = vpack.c.bf16 (!%p388_p2), %v572_v50, %v571_v49  ;;  %v574_v53 = vld [vmem:[%s4019_s3 + $0x18] sm:$0xff] (!%p388_p2)  ;;  %s3217_s15 = smov (!%p388_p2), 96   ;;  %vm695_vm2 = vcmask (!%p388_p2), 64512   ;;  %vm784_vm3 = vcmask (!%p388_p2), 408576   ;;  %vm803_vm4 = vcmask (!%p388_p2), 402432  }
   0x7   : > { %v580_v54 = vpack.c.bf16 (!%p388_p2), %v574_v53, %v573_v51  ;;  %s3218_s16 = smov (!%p388_p2), 64   ;;  %vm890_vm5 = vcmask (!%p388_p2), 1040384   ;;  %s3219_s17 = smov (!%p388_p2), 88   ;;  %vm1259_vm6 = vcmask (!%p388_p2), 1043456   ;;  %vm2457_vm7 = vcmask (!%p388_p2), 523264  }
   0x8   : > { %2784 = vmatprep.subr.bf16.mxu0 (!%p388_p2), %v579_v52  ;;  %s3220_s18 = smov (!%p388_p2), 120   ;;  %s3221_s19 = smov (!%p388_p2), 80  }
   0x9   : > { %2785 = vmatpush3.bf16.msra.mxu0 (!%p388_p2), %v579_v52  ;;  %s3222_s20 = smov (!%p388_p2), 112   ;;  %s3223_s21 = smov (!%p388_p2), 56  }
   0xa   : > { %2786 = vmatprep.subr.bf16.mxu0 (!%p388_p2), %v580_v54  ;;  %s3224_s22 = smov (!%p388_p2), 72   ;;  %s3225_s23 = smov (!%p388_p2), 104  }
   0xd   : > { %s4031_s26 = smov (!%p431_p3, %s2603_s26), 3  ;;  %2787 = vmatpush3.bf16.msra.mxu0 %v580_v54 }
   0xe   : > { %s3028_s27 = smul.u32 56, %s4031_s26 }
  0x10   : > { %s3314_s30 = scalar_lea.vmem %s4016_s0, %s3028_s27 }
  0x11   : > { %v442_v0 = vld [vmem:[%s3314_s30] sm:$0xff]  ;;  %v444_v1 = vld [vmem:[%s3314_s30 + $0x10] sm:$0xff]  ;;  %v443_v2 = vld [vmem:[%s3314_s30 + $0x8] sm:$0xff] }
  0x12   : > { %v452_v3 = vsel %vm451_vm0, %v442_v0, 0.0  ;;  %v458_v4 = vsel %vm451_vm0, %v444_v1, 0.0  ;;  %v445_v5 = vld [vmem:[%s3314_s30 + $0x18] sm:$0xff]  ;;  %v455_v6 = vsel %vm451_vm0, %v443_v2, 0.0  ;;  %v446_v8 = vld [vmem:[%s3314_s30 + $0x20] sm:$0xff]  ;;  %v447_v9 = vld [vmem:[%s3314_s30 + $0x28] sm:$0xff] }
  0x13   : > { %453 = vadd.xlane.f32.xlu0 %v452_v3  ;;  %459 = vadd.xlane.f32.xlu1 %v458_v4  ;;  %v461_v7 = vsel %vm451_vm0, %v445_v5, 0.0  ;;  %v464_v10 = vsel %vm451_vm0, %v446_v8, 0.0  ;;  %v467_v11 = vsel %vm451_vm0, %v447_v9, 0.0  ;;  %v448_v12 = vld [vmem:[%s3314_s30 + $0x30] sm:$0x3] }
  0x14   : > { %v471_v13 = vsel %vm470_vm1, %v448_v12, 0.0 }
  0x17   : > { %456 = vadd.xlane.f32.xlu0 %v455_v6  ;;  %462 = vadd.xlane.f32.xlu1 %v461_v7 }
  0x1b   : > { %465 = vadd.xlane.f32.xlu0 %v464_v10  ;;  %468 = vadd.xlane.f32.xlu1 %v467_v11 }
  0x1f   : > { %472 = vadd.xlane.f32.xlu0 %v471_v13 }
  0xa0   : > { %v454_v14 = vpop.xlane.xlu0 %453  ;;  %v460_v15 = vpop.xlane.xlu1 %459 }
  0xa1   : > { %v475_v16 = vmul.f32 0.03125, %v454_v14  ;;  %v477_v17 = vmul.f32 0.03125, %v460_v15  ;;  %v2610_v14 = vld [vmem:[%s4017_s1] ss:$0 sm:$0xff] }
  0xa3   : > { %v3330_v18 = vsub.f32 %v442_v0, %v475_v16  ;;  %v3332_v19 = vsub.f32 %v444_v1, %v477_v17 }
  0xa4   : > { %v457_v20 = vpop.xlane.xlu0 %456  ;;  %v463_v21 = vpop.xlane.xlu1 %462 }
  0xa5   : > { %v476_v22 = vmul.f32 0.03125, %v457_v20  ;;  %v478_v23 = vmul.f32 0.03125, %v463_v21  ;;  %v489_v24 = vmul.f32 %v3330_v18, %v3330_v18  ;;  %v491_v25 = vmul.f32 %v3332_v19, %v3332_v19  ;;  %v2611_v20 = vld [vmem:[%s4018_s2] ss:$0 sm:$0xff] }
  0xa7   : > { %v3338_v26 = vsub.f32 %v443_v2, %v476_v22  ;;  %v3340_v27 = vsub.f32 %v445_v5, %v478_v23  ;;  %v496_v28 = vsel %vm451_vm0, %v489_v24, 0.0  ;;  %v502_v31 = vsel %vm451_vm0, %v491_v25, 0.0 }
  0xa8   : > { %497 = vadd.xlane.f32.xlu1 %v496_v28  ;;  %v466_v29 = vpop.xlane.xlu0 %465  ;;  %v469_v30 = vpop.xlane.xlu1 %468 }
  0xa9   : > { %v479_v32 = vmul.f32 0.03125, %v466_v29  ;;  %v480_v33 = vmul.f32 0.03125, %v469_v30  ;;  %v490_v34 = vmul.f32 %v3338_v26, %v3338_v26  ;;  %v492_v35 = vmul.f32 %v3340_v27, %v3340_v27 }
  0xab   : > { %v3348_v36 = vsub.f32 %v446_v8, %v479_v32  ;;  %v3350_v37 = vsub.f32 %v447_v9, %v480_v33  ;;  %v499_v38 = vsel %vm451_vm0, %v490_v34, 0.0  ;;  %v505_v41 = vsel %vm451_vm0, %v492_v35, 0.0 }
  0xac   : > { %503 = vadd.xlane.f32.xlu1 %v502_v31  ;;  %500 = vadd.xlane.f32.xlu0 %v499_v38  ;;  %v473_v39 = vpop.xlane.xlu0 %472 }
  0xad   : > { %v481_v40 = vmul.f32 0.03125, %v473_v39  ;;  %v493_v42 = vmul.f32 %v3348_v36, %v3348_v36  ;;  %v494_v43 = vmul.f32 %v3350_v37, %v3350_v37 }
  0xaf   : > { %v3358_v44 = vsub.f32 %v448_v12, %v481_v40  ;;  %v508_v45 = vsel %vm451_vm0, %v493_v42, 0.0  ;;  %v511_v46 = vsel %vm451_vm0, %v494_v43, 0.0 }
  0xb0   : > { %506 = vadd.xlane.f32.xlu0 %v505_v41  ;;  %509 = vadd.xlane.f32.xlu1 %v508_v45 }
  0xb1   : > { %v495_v47 = vmul.f32 %v3358_v44, %v3358_v44 }
  0xb3   : > { %v514_v48 = vsel %vm470_vm1, %v495_v47, 0.0 }
  0xb4   : > { %512 = vadd.xlane.f32.xlu0 %v511_v46  ;;  %515 = vadd.xlane.f32.xlu1 %v514_v48 }
 0x135   : > { %v498_v55 = vpop.xlane.xlu1 %497 }
 0x136   : > { %v517_v56 = vmul.f32 0.03125, %v498_v55 }
 0x138   : > { %v524_v57 = vadd.f32 1e-05, %v517_v56 }
 0x139   : > { %v504_v58 = vpop.xlane.xlu1 %503  ;;  %v501_v59 = vpop.xlane.xlu0 %500 }
 0x13a   : > { %3048 = vrsqrt.f32 %v524_v57  ;;  %v519_v60 = vmul.f32 0.03125, %v504_v58  ;;  %v518_v61 = vmul.f32 0.03125, %v501_v59 }
 0x13c   : > { %v526_v62 = vadd.f32 1e-05, %v519_v60  ;;  %v525_v63 = vadd.f32 1e-05, %v518_v61 }
 0x13d   : > { %v510_v0 = vpop.xlane.xlu1 %509  ;;  %v507_v1 = vpop.xlane.xlu0 %506 }
 0x13e   : > { %3050 = vrsqrt.f32 %v526_v62  ;;  %v521_v2 = vmul.f32 0.03125, %v510_v0  ;;  %v520_v3 = vmul.f32 0.03125, %v507_v1 }
 0x13f   : > { %3052 = vrsqrt.f32 %v525_v63 }
 0x140   : > { %v528_v4 = vadd.f32 1e-05, %v521_v2  ;;  %v527_v5 = vadd.f32 1e-05, %v520_v3 }
 0x141   : > { %v516_v6 = vpop.xlane.xlu1 %515  ;;  %v513_v7 = vpop.xlane.xlu0 %512 }
 0x142   : > { %3054 = vrsqrt.f32 %v528_v4  ;;  %v523_v8 = vmul.f32 0.03125, %v516_v6  ;;  %v522_v9 = vmul.f32 0.03125, %v513_v7 }
 0x143   : > { %3056 = vrsqrt.f32 %v527_v5 }
 0x144   : > { %v3049_v10 = vpop.eup %3048  ;;  %v530_v11 = vadd.f32 1e-05, %v523_v8  ;;  %v529_v12 = vadd.f32 1e-05, %v522_v9 }
 0x145   : > { %v538_v13 = vmul.f32 %v3049_v10, %v3330_v18 }
 0x146   : > { %3058 = vrsqrt.f32 %v530_v11 }
 0x147   : > { %3060 = vrsqrt.f32 %v529_v12  ;;  %v551_v17 = vmul.f32 %v2610_v14, %v538_v13 }
 0x148   : > { %v3051_v15 = vpop.eup %3050 }
 0x149   : > { %v3053_v16 = vpop.eup %3052  ;;  %v540_v22 = vmul.f32 %v3051_v15, %v3332_v19  ;;  %v564_v25 = vadd.f32 %v2611_v20, %v551_v17 }
 0x14a   : > { %v539_v21 = vmul.f32 %v3053_v16, %v3338_v26 }
 0x14b   : > { %v553_v30 = vmul.f32 %v2610_v14, %v540_v22 }
 0x14c   : > { %v3055_v23 = vpop.eup %3054  ;;  %v552_v24 = vmul.f32 %v2610_v14, %v539_v21 }
 0x14d   : > { %v3057_v18 = vpop.eup %3056  ;;  %v542_v31 = vmul.f32 %v3055_v23, %v3348_v36  ;;  %v566_v26 = vadd.f32 %v2611_v20, %v553_v30 }
 0x14e   : > { %v565_v28 = vadd.f32 %v2611_v20, %v552_v24  ;;  %v541_v29 = vmul.f32 %v3057_v18, %v3340_v27 }
 0x14f   : > { %v555_v40 = vmul.f32 %v2610_v14, %v542_v31 }
 0x150   : > { %v3059_v32 = vpop.eup %3058  ;;  %v575_v33 = vpack.c.bf16 %v565_v28, %v564_v25  ;;  %v554_v34 = vmul.f32 %v2610_v14, %v541_v29 }
 0x151   : > { %v3061_v35 = vpop.eup %3060  ;;  %v544_v38 = vmul.f32 %v3059_v32, %v3358_v44  ;;  %v568_v27 = vadd.f32 %v2611_v20, %v555_v40  ;;  %v2612_v44 = vld [vmem:[%s4020_s4] ss:$0 sm:$0xff] }
 0x152   : > { %2788 = vmatprep.mubr.msk.bf16.mxu0 %vm451_vm0, %v575_v33  ;;  %v567_v19 = vadd.f32 %v2611_v20, %v554_v34  ;;  %v543_v39 = vmul.f32 %v3061_v35, %v3350_v37 }
 0x153   : > { %v557_v43 = vmul.f32 %v2610_v14, %v544_v38 }
 0x154   : > { %v576_v41 = vpack.c.bf16 %v567_v19, %v566_v26  ;;  %v556_v42 = vmul.f32 %v2610_v14, %v543_v39 }
 0x155   : > { %v570_v46 = vadd.f32 %v2611_v20, %v557_v43 }
 0x156   : > { %2789 = vmatmul.mubr.msk.bf16.vlgmr.msra.gmra.mrb[0].mxu0 %vm451_vm0, %v576_v41  ;;  %v569_v36 = vadd.f32 %v2611_v20, %v556_v42 }
 0x157   : > { %v578_v47 = vpack.c.bf16 %v570_v46, %v570_v46 }
 0x158   : > { %v577_v45 = vpack.c.bf16 %v569_v36, %v568_v27 }
 0x15a   : > { %2792 = vmatprep.mubr.msk.bf16.mxu0 %vm451_vm0, %v577_v45 }
 0x15e   : > { %2793 = vmatmul.mubr.msk.bf16.gmra.mrb[4].mxu0 %vm451_vm0, %v578_v47 }
 0x229   : > { %v2790_v37 = vpop.f32.mrb[0].mxu0 }
 0x22a   : > { %v643_v48 = vadd.f32 %v2790_v37, %v2612_v44  ;;  %v634_v49 = vpop.f32.mrb[1].mxu0 }
 0x22b   : > { %v635_v50 = vadd.f32 %v2612_v44, %v634_v49  ;;  %v2791_v51 = vpop.f32.mrb[2].mxu0 }
 0x22c   : > { %v646_v52 = vadd.f32 %v2791_v51, %v2612_v44  ;;  %v637_v53 = vpop.f32.mrb[3].mxu0  ;;  %v670_v55 = vmul.f32 0.35355338, %v643_v48 }
 0x22d   : > { %v638_v54 = vadd.f32 %v2612_v44, %v637_v53  ;;  %v668_v58 = vmul.f32 0.35355338, %v635_v50 }
 0x22e   : > { %v671_v56 = vmul.f32 0.35355338, %v646_v52  ;;  %v3397_v57 = vpack.c.bf16 %v646_v52, %v643_v48 }
 0x22f   : > { %v669_v59 = vmul.f32 0.35355338, %v638_v54  ;;  %v3399_v60 = vpack.c.bf16 %v638_v54, %v635_v50 }
 0x230   : > { %v3401_v61 = vpack.c.bf16 %v671_v56, %v670_v55  ;;  %689 = vrot.lane.b32.xlu1 %v3397_v57, %s3217_s15 }
 0x231   : > { %v3404_v62 = vpack.c.bf16 %v669_v59, %v668_v58  ;;  %687 = vrot.lane.b32.xlu0 %v3399_v60, %s3217_s15  ;;  %v2794_v63 = vpop.f32.mrb[4].mxu0 }
 0x232   : > { %v650_v0 = vpop.f32.mrb[5].mxu0  ;;  %v659_v5 = vadd.f32 %v2794_v63, %v2612_v44 }
 0x233   : > { %v651_v1 = vadd.f32 %v2612_v44, %v650_v0  ;;  %v2795_v2 = vpop.f32.mrb[6].mxu0  ;;  %2804 = vmatprep.mubr.msk.bf16.mxu1 %vm695_vm2, %v3404_v62 }
 0x234   : > { %v653_v3 = vpop.f32.mrb[7].mxu0  ;;  %v3414_v10 = vpack.c.bf16 %v659_v5, %v659_v5  ;;  %v674_v21 = vmul.f32 0.35355338, %v659_v5 }
 0x235   : > { %v654_v4 = vadd.f32 %v2612_v44, %v653_v3  ;;  %v672_v6 = vmul.f32 0.35355338, %v651_v1 }
 0x236   : > { %v3429_v22 = vpack.c.bf16 %v674_v21, %v674_v21 }
 0x237   : > { %v673_v7 = vmul.f32 0.35355338, %v654_v4  ;;  %v3409_v8 = vpack.c.bf16 %v654_v4, %v651_v1 }
 0x239   : > { %v3411_v9 = vpack.c.bf16 %v673_v7, %v672_v6  ;;  %691 = vrot.lane.b32.xlu1 %v3409_v8, %s3217_s15 }
 0x23d   : > { %693 = vrot.lane.b32.xlu1 %v3414_v10, %s3217_s15  ;;  %s3226_s15 = smov 48  }
 0x2a2   : > { %v690_v13 = vpop.permute.xlu1 %689 }
 0x2a3   : > { %v688_v11 = vpop.permute.xlu0 %687  ;;  %v712_v14 = vsel %vm695_vm2, %v690_v13, 0 }
 0x2a4   : > { %3004 = vmatprep.subr.msk.bf16.mxu1 %vm695_vm2, %v688_v11  ;;  %v709_v12 = vsel %vm695_vm2, %v688_v11, 0 }
 0x2a5   : > { %2797 = vmatpush3.bf16.xpose.msra.mxu1 %v709_v12 }
 0x2a6   : > { %3005 = vmatprep.subr.msk.bf16.mxu1 %vm695_vm2, %v690_v13 }
 0x2ab   : > { %v692_v15 = vpop.permute.xlu1 %691 }
 0x2ac   : > { %v715_v16 = vsel %vm695_vm2, %v692_v15, 0 }
 0x2ad   : > { %2799 = vmatpush3.bf16.xpose.msra.mxu1 %v712_v14 }
 0x2ae   : > { %3006 = vmatprep.subr.msk.bf16.mxu1 %vm695_vm2, %v692_v15 }
 0x2af   : > { %v694_v17 = vpop.permute.xlu1 %693 }
 0x2b0   : > { %v718_v20 = vsel %vm695_vm2, %v694_v17, 0 }
 0x2b5   : > { %2801 = vmatpush3.bf16.xpose.msra.mxu1 %v715_v16 }
 0x2b6   : > { %3007 = vmatprep.subr.msk.bf16.mxu1 %vm695_vm2, %v694_v17 }
 0x2bd   : > { %2803 = vmatpush3.bf16.xpose.msra.mxu1 %v718_v20 }
 0x2c4   : > { %2805 = vmatmul.mubr.msk.bf16.vlgmr.msra.gmra.mrb[0].mxu1 %vm695_vm2, %v3401_v61 }
 0x2c5   : > { %2808 = vmatprep.mubr.msk.bf16.mxu1 %vm695_vm2, %v3411_v9 }
 0x2cc   : > { %2809 = vmatmul.mubr.msk.bf16.gmra.mrb[4].mxu1 %vm695_vm2, %v3429_v22 }
 0x397   : > { %v2806_v23 = vpop.f32.mrb[0].mxu1 }
 0x398   : > { %v754_v24 = vpop.f32.mrb[1].mxu1  ;;  %v791_v30 = vsel %vm784_vm3, %v2806_v23, -inf }
 0x399   : > { %v2807_v18 = vpop.f32.mrb[2].mxu1  ;;  %v785_v25 = vsel %vm784_vm3, %v754_v24, -inf }
 0x39a   : > { %786 = vmax.xlane.f32.xlu0 %v785_v25  ;;  %v757_v28 = vpop.f32.mrb[3].mxu1  ;;  %v794_v34 = vsel %vm784_vm3, %v2807_v18, -inf }
 0x39b   : > { %v788_v29 = vsel %vm784_vm3, %v757_v28, -inf }
 0x39c   : > { %789 = vmax.xlane.f32.xlu1 %v788_v29 }
 0x39e   : > { %792 = vmax.xlane.f32.xlu0 %v791_v30 }
 0x39f   : > { %v2810_v31 = vpop.f32.mrb[4].mxu1 }
 0x3a0   : > { %v770_v32 = vpop.f32.mrb[5].mxu1  ;;  %v804_v26 = vsel %vm803_vm4, %v2810_v31, -inf }
 0x3a1   : > { %v2811_v33 = vpop.f32.mrb[6].mxu1  ;;  %v797_v19 = vsel %vm784_vm3, %v770_v32, -inf }
 0x3a2   : > { %795 = vmax.xlane.f32.xlu0 %v794_v34  ;;  %v773_v35 = vpop.f32.mrb[7].mxu1 }
 0x3a3   : > { %v800_v38 = vsel %vm784_vm3, %v773_v35, -inf }
 0x3a4   : > { %801 = vmax.xlane.f32.xlu1 %v800_v38 }
 0x3a6   : > { %805 = vmax.xlane.f32.xlu0 %v804_v26 }
 0x3aa   : > { %798 = vmax.xlane.f32.xlu0 %v797_v19 }
 0x3b5   : > { %867 = vrot.lane.b32.xlu1 %v3399_v60, %s3218_s16 }
 0x3b9   : > { %871 = vrot.lane.b32.xlu1 %v3409_v8, %s3218_s16 }
 0x3bd   : > { %873 = vrot.lane.b32.xlu1 %v3414_v10, %s3218_s16 }
 0x3c0   : > { %869 = vrot.lane.b32.xlu0 %v3397_v57, %s3218_s16 }
 0x427   : > { %v787_v39 = vpop.xlane.xlu0 %786 }
 0x428   : > { %v807_v40 = vsub.f32 %v754_v24, %v787_v39 }
 0x429   : > { %v790_v41 = vpop.xlane.xlu1 %789 }
 0x42a   : > { %v814_v27 = vmul.f32 1.442695, %v807_v40  ;;  %v808_v36 = vsub.f32 %v757_v28, %v790_v41 }
 0x42b   : > { %v793_v42 = vpop.xlane.xlu0 %792 }
 0x42c   : > { %v809_v43 = vsub.f32 %v2806_v23, %v793_v42  ;;  %v816_v37 = vmul.f32 1.442695, %v808_v36 }
 0x42e   : > { %v818_v45 = vmul.f32 1.442695, %v809_v43 }
 0x42f   : > { %v796_v46 = vpop.xlane.xlu0 %795 }
 0x430   : > { %3062 = vpow2.f32 %v818_v45  ;;  %v810_v47 = vsub.f32 %v2807_v18, %v796_v46 }
 0x431   : > { %v802_v44 = vpop.xlane.xlu1 %801  ;;  %3064 = vpow2.f32 %v814_v27 }
 0x432   : > { %v820_v48 = vmul.f32 1.442695, %v810_v47  ;;  %v812_v52 = vsub.f32 %v773_v35, %v802_v44 }
 0x433   : > { %v806_v49 = vpop.xlane.xlu0 %805 }
 0x434   : > { %3066 = vpow2.f32 %v820_v48  ;;  %v813_v50 = vsub.f32 %v2810_v31, %v806_v49  ;;  %v824_v58 = vmul.f32 1.442695, %v812_v52 }
 0x435   : > { %v868_v51 = vpop.permute.xlu1 %867  ;;  %3068 = vpow2.f32 %v816_v37 }
 0x436   : > { %v826_v53 = vmul.f32 1.442695, %v813_v50  ;;  %2812 = vmatprep.subr.bf16.mxu0 %v868_v51 }
 0x437   : > { %v799_v54 = vpop.xlane.xlu0 %798  ;;  %2813 = vmatpush3.bf16.msra.mxu0 %v868_v51 }
 0x438   : > { %v811_v55 = vsub.f32 %v770_v32, %v799_v54  ;;  %3070 = vpow2.f32 %v826_v53 }
 0x439   : > { %v872_v63 = vpop.permute.xlu1 %871 }
 0x43a   : > { %v3444_v56 = vpop.eup %3062  ;;  %v822_v59 = vmul.f32 1.442695, %v811_v55 }
 0x43b   : > { %v870_v0 = vpop.permute.xlu0 %869  ;;  %v834_v1 = vsel %vm784_vm3, %v3444_v56, 0.0  ;;  %v3448_v2 = vpop.eup %3064 }
 0x43c   : > { %3072 = vpow2.f32 %v822_v59  ;;  %835 = vadd.xlane.f32.xlu1 %v834_v1  ;;  %2814 = vmatprep.subr.bf16.mxu0 %v870_v0  ;;  %v828_v5 = vsel %vm784_vm3, %v3448_v2, 0.0 }
 0x43d   : > { %2815 = vmatpush3.bf16.msra.mxu0 %v870_v0  ;;  %3074 = vpow2.f32 %v824_v58  ;;  %v874_v7 = vpop.permute.xlu1 %873 }
 0x43e   : > { %v3450_v3 = vpop.eup %3066  ;;  %2816 = vmatprep.subr.bf16.mxu0 %v872_v63  ;;  %v892_v13 = vsel %vm890_vm5, %v874_v7, 0 }
 0x43f   : > { %v837_v4 = vsel %vm784_vm3, %v3450_v3, 0.0  ;;  %v3069_v6 = vpop.eup %3068 }
 0x440   : > { %838 = vadd.xlane.f32.xlu0 %v837_v4  ;;  %829 = vadd.xlane.f32.xlu1 %v828_v5  ;;  %v831_v11 = vsel %vm784_vm3, %v3069_v6, 0.0 }
 0x441   : > { %2817 = vmatpush3.bf16.msra.mxu0 %v872_v63 }
 0x442   : > { %3008 = vmatprep.subr.msk.bf16.mxu0 %vm890_vm5, %v874_v7  ;;  %v3458_v12 = vpop.eup %3070 }
 0x443   : > { %v846_v15 = vsel %vm803_vm4, %v3458_v12, 0.0 }
 0x444   : > { %832 = vadd.xlane.f32.xlu0 %v831_v11 }
 0x445   : > { %2819 = vmatpush3.bf16.msra.mxu0 %v892_v13 }
 0x446   : > { %v3461_v14 = vpop.eup %3072 }
 0x447   : > { %v840_v16 = vsel %vm784_vm3, %v3461_v14, 0.0  ;;  %v3075_v17 = vpop.eup %3074 }
 0x448   : > { %847 = vadd.xlane.f32.xlu0 %v846_v15  ;;  %841 = vadd.xlane.f32.xlu1 %v840_v16  ;;  %v843_v20 = vsel %vm784_vm3, %v3075_v17, 0.0 }
 0x44c   : > { %844 = vadd.xlane.f32.xlu0 %v843_v20 }
 0x459   : > { %977 = vrot.lane.b32.xlu1 %v3397_v57, %s3219_s17 }
 0x45d   : > { %979 = vrot.lane.b32.xlu1 %v3409_v8, %s3219_s17 }
 0x461   : > { %981 = vrot.lane.b32.xlu1 %v3414_v10, %s3219_s17 }
 0x462   : > { %975 = vrot.lane.b32.xlu0 %v3399_v60, %s3219_s17 }
 0x465   : > { %969 = vrot.lane.b32.xlu1 %v3401_v61, %s3220_s18 }
 0x466   : > { %967 = vrot.lane.b32.xlu0 %v3404_v62, %s3220_s18 }
 0x469   : > { %973 = vrot.lane.b32.xlu1 %v3429_v22, %s3220_s18 }
 0x46a   : > { %971 = vrot.lane.b32.xlu0 %v3411_v9, %s3220_s18  ;;  %s3227_s18 = smov 40  }
 0x46d   : > { %1416 = vrot.lane.b32.xlu1 %v3397_v57, %s3221_s19 }
 0x46e   : > { %1414 = vrot.lane.b32.xlu0 %v3399_v60, %s3221_s19 }
 0x471   : > { %1420 = vrot.lane.b32.xlu1 %v3414_v10, %s3221_s19 }
 0x472   : > { %1418 = vrot.lane.b32.xlu0 %v3409_v8, %s3221_s19 }
 0x475   : > { %1408 = vrot.lane.b32.xlu1 %v3401_v61, %s3222_s20 }
 0x476   : > { %1406 = vrot.lane.b32.xlu0 %v3404_v62, %s3222_s20 }
 0x479   : > { %1412 = vrot.lane.b32.xlu1 %v3429_v22, %s3222_s20 }
 0x47a   : > { %1410 = vrot.lane.b32.xlu0 %v3411_v9, %s3222_s20 }
 0x4c9   : > { %v836_v21 = vpop.xlane.xlu1 %835 }
 0x4cd   : > { %v839_v23 = vpop.xlane.xlu0 %838  ;;  %v830_v24 = vpop.xlane.xlu1 %829 }
 0x4ce   : > { %3076 = vrcp.f32 %v839_v23 }
 0x4cf   : > { %3078 = vrcp.f32 %v830_v24 }
 0x4d0   : > { %3080 = vrcp.f32 %v836_v21 }
 0x4d1   : > { %v833_v18 = vpop.xlane.xlu0 %832 }
 0x4d2   : > { %3082 = vrcp.f32 %v833_v18 }
 0x4d5   : > { %v848_v25 = vpop.xlane.xlu0 %847  ;;  %v842_v28 = vpop.xlane.xlu1 %841 }
 0x4d6   : > { %3084 = vrcp.f32 %v848_v25 }
 0x4d7   : > { %3086 = vrcp.f32 %v842_v28 }
 0x4d8   : > { %v3077_v29 = vpop.eup %3076 }
 0x4d9   : > { %v845_v30 = vpop.xlane.xlu0 %844  ;;  %v3079_v31 = vpop.eup %3078  ;;  %v859_v34 = vmul.f32 %v3077_v29, %v3450_v3 }
 0x4da   : > { %3088 = vrcp.f32 %v845_v30  ;;  %v3081_v32 = vpop.eup %3080  ;;  %v856_v38 = vmul.f32 %v3079_v31, %v3448_v2  ;;  %v978_v27 = vpop.permute.xlu1 %977 }
 0x4db   : > { %v858_v19 = vmul.f32 %v3081_v32, %v3444_v56  ;;  %v999_v48 = vsel %vm695_vm2, %v978_v27, 0 }
 0x4dc   : > { %v3083_v33 = vpop.eup %3082 }
 0x4dd   : > { %v976_v35 = vpop.permute.xlu0 %975  ;;  %v857_v26 = vmul.f32 %v3083_v33, %v3069_v6  ;;  %v864_v40 = vpack.c.bf16 %v859_v34, %v858_v19 }
 0x4de   : > { %3009 = vmatprep.subr.msk.bf16.mxu0 %vm695_vm2, %v976_v35  ;;  %v996_v43 = vsel %vm695_vm2, %v976_v35, 0  ;;  %v980_v50 = vpop.permute.xlu1 %979 }
 0x4df   : > { %v863_v39 = vpack.c.bf16 %v857_v26, %v856_v38  ;;  %v1002_v52 = vsel %vm695_vm2, %v980_v50, 0 }
 0x4e0   : > { %v3085_v41 = vpop.eup %3084 }
 0x4e1   : > { %2820 = vmatprep.mubr.msk.bf16.mxu0 %vm784_vm3, %v863_v39  ;;  %v3087_v42 = vpop.eup %3086  ;;  %v862_v45 = vmul.f32 %v3085_v41, %v3458_v12  ;;  %v968_v49 = vpop.permute.xlu0 %967 }
 0x4e2   : > { %2821 = vmatmul.mubr.msk.bf16.vlgmr.msra.gmra.mrb[8].mxu0 %vm784_vm3, %v864_v40  ;;  %v860_v46 = vmul.f32 %v3087_v42, %v3461_v14  ;;  %v982_v51 = vpop.permute.xlu1 %981 }
 0x4e3   : > { %2829 = vmatpush3.bf16.xpose.msra.mxu0 %v996_v43  ;;  %v866_v37 = vpack.c.bf16 %v862_v45, %v862_v45  ;;  %v1005_v55 = vsel %vm695_vm2, %v982_v51, 0 }
 0x4e4   : > { %v3089_v36 = vpop.eup %3088  ;;  %3010 = vmatprep.subr.msk.bf16.mxu0 %vm695_vm2, %v978_v27 }
 0x4e5   : > { %v861_v47 = vmul.f32 %v3089_v36, %v3075_v17  ;;  %v972_v53 = vpop.permute.xlu0 %971 }
 0x4e6   : > { %v970_v54 = vpop.permute.xlu1 %969 }
 0x4e7   : > { %v865_v44 = vpack.c.bf16 %v861_v47, %v860_v46 }
 0x4e9   : > { %2824 = vmatprep.mubr.msk.bf16.mxu0 %vm784_vm3, %v865_v44  ;;  %v1415_v56 = vpop.permute.xlu0 %1414 }
 0x4ea   : > { %2825 = vmatmul.mubr.msk.bf16.gmra.mrb[12].mxu0 %vm784_vm3, %v866_v37  ;;  %v974_v58 = vpop.permute.xlu1 %973  ;;  %v1435_v59 = vsel %vm695_vm2, %v1415_v56, 0 }
 0x4eb   : > { %2831 = vmatpush3.bf16.xpose.msra.mxu0 %v999_v48  ;;  %2836 = vmatprep.mubr.msk.bf16.mxu0 %vm695_vm2, %v968_v49 }
 0x4ec   : > { %3011 = vmatprep.subr.msk.bf16.mxu0 %vm695_vm2, %v980_v50 }
 0x4ed   : > { %v1419_v0 = vpop.permute.xlu0 %1418 }
 0x4ee   : > { %v1417_v63 = vpop.permute.xlu1 %1416  ;;  %v1441_v3 = vsel %vm695_vm2, %v1419_v0, 0 }
 0x4ef   : > { %v1438_v1 = vsel %vm695_vm2, %v1417_v63, 0 }
 0x4f1   : > { %v1407_v2 = vpop.permute.xlu0 %1406 }
 0x4f2   : > { %v1421_v4 = vpop.permute.xlu1 %1420 }
 0x4f3   : > { %2833 = vmatpush3.bf16.xpose.msra.mxu0 %v1002_v52  ;;  %v1444_v5 = vsel %vm695_vm2, %v1421_v4, 0 }
 0x4f4   : > { %3012 = vmatprep.subr.msk.bf16.mxu0 %vm695_vm2, %v982_v51 }
 0x4f5   : > { %v1411_v7 = vpop.permute.xlu0 %1410 }
 0x4f6   : > { %v1409_v6 = vpop.permute.xlu1 %1408 }
 0x4fa   : > { %v1413_v11 = vpop.permute.xlu1 %1412 }
 0x4fb   : > { %2835 = vmatpush3.bf16.xpose.msra.mxu0 %v1005_v55 }
 0x4fc   : > { %3016 = vmatprep.subr.msk.bf16.mxu0 %vm695_vm2, %v1415_v56 }
 0x502   : > { %2837 = vmatmul.mubr.msk.bf16.vlgmr.msra.gmra.mrb[16].mxu0 %vm695_vm2, %v970_v54 }
 0x503   : > { %2840 = vmatprep.mubr.msk.bf16.mxu0 %vm695_vm2, %v972_v53  ;;  %2881 = vmatpush3.bf16.xpose.msra.mxu0 %v1435_v59 }
 0x504   : > { %3017 = vmatprep.subr.msk.bf16.mxu0 %vm695_vm2, %v1417_v63 }
 0x50a   : > { %2841 = vmatmul.mubr.msk.bf16.gmra.mrb[20].mxu0 %vm695_vm2, %v974_v58 }
 0x50b   : > { %2883 = vmatpush3.bf16.xpose.msra.mxu0 %v1438_v1  ;;  %2888 = vmatprep.mubr.msk.bf16.mxu0 %vm695_vm2, %v1407_v2 }
 0x50c   : > { %3018 = vmatprep.subr.msk.bf16.mxu0 %vm695_vm2, %v1419_v0 }
 0x513   : > { %2885 = vmatpush3.bf16.xpose.msra.mxu0 %v1441_v3 }
 0x514   : > { %3019 = vmatprep.subr.msk.bf16.mxu0 %vm695_vm2, %v1421_v4 }
 0x51b   : > { %2887 = vmatpush3.bf16.xpose.msra.mxu0 %v1444_v5 }
 0x522   : > { %2889 = vmatmul.mubr.msk.bf16.vlgmr.msra.gmra.mrb[24].mxu0 %vm695_vm2, %v1409_v6 }
 0x523   : > { %2892 = vmatprep.mubr.msk.bf16.mxu0 %vm695_vm2, %v1411_v7 }
 0x52a   : > { %2893 = vmatmul.mubr.msk.bf16.gmra.mrb[28].mxu0 %vm695_vm2, %v1413_v11 }
 0x5b5   : > { %v3517_v12 = vpop.f32.mrb[8].mxu0 }
 0x5b6   : > { %v3519_v13 = vpop.f32.mrb[9].mxu0 }
 0x5b7   : > { %v3521_v14 = vpop.f32.mrb[10].mxu0 }
 0x5b8   : > { %v959_v15 = vpack.c.bf16 %v3521_v14, %v3517_v12  ;;  %v3525_v16 = vpop.f32.mrb[11].mxu0 }
 0x5b9   : > { %v958_v17 = vpack.c.bf16 %v3525_v16, %v3519_v13 }
 0x5bd   : > { %v3529_v20 = vpop.f32.mrb[12].mxu0 }
 0x5be   : > { %v3531_v21 = vpop.f32.mrb[13].mxu0 }
 0x5bf   : > { %v2827_v23 = vpop.f32.mrb[14].mxu0 }
 0x5c0   : > { %v3533_v24 = vpop.f32.mrb[15].mxu0 }
 0x5c1   : > { %v960_v18 = vpack.c.bf16 %v3533_v24, %v3531_v21  ;;  %v961_v24 = vpack.c.bf16 %v3529_v20, %v3529_v20 }
 0x5d5   : > { %v2838_v25 = vpop.f32.mrb[16].mxu0 }
 0x5d6   : > { %v1041_v28 = vpop.f32.mrb[17].mxu0  ;;  %v1077_v33 = vsel %vm784_vm3, %v2838_v25, -inf }
 0x5d7   : > { %v2839_v29 = vpop.f32.mrb[18].mxu0  ;;  %v1071_v30 = vsel %vm784_vm3, %v1041_v28, -inf }
 0x5d8   : > { %1072 = vmax.xlane.f32.xlu0 %v1071_v30  ;;  %v1044_v31 = vpop.f32.mrb[19].mxu0  ;;  %v1080_v26 = vsel %vm784_vm3, %v2839_v29, -inf }
 0x5d9   : > { %v1074_v32 = vsel %vm784_vm3, %v1044_v31, -inf }
 0x5da   : > { %1075 = vmax.xlane.f32.xlu1 %v1074_v32 }
 0x5dc   : > { %1078 = vmax.xlane.f32.xlu0 %v1077_v33 }
 0x5dd   : > { %v2842_v34 = vpop.f32.mrb[20].mxu0 }
 0x5de   : > { %v1057_v35 = vpop.f32.mrb[21].mxu0  ;;  %v1089_v41 = vsel %vm803_vm4, %v2842_v34, -inf }
 0x5df   : > { %v2843_v38 = vpop.f32.mrb[22].mxu0  ;;  %v1083_v40 = vsel %vm784_vm3, %v1057_v35, -inf }
 0x5e0   : > { %1081 = vmax.xlane.f32.xlu0 %v1080_v26  ;;  %v1060_v19 = vpop.f32.mrb[23].mxu0 }
 0x5e1   : > { %v1086_v39 = vsel %vm784_vm3, %v1060_v19, -inf }
 0x5e2   : > { %1087 = vmax.xlane.f32.xlu1 %v1086_v39 }
 0x5e4   : > { %1084 = vmax.xlane.f32.xlu0 %v1083_v40 }
 0x5e8   : > { %1090 = vmax.xlane.f32.xlu0 %v1089_v41 }
 0x5f5   : > { %v3544_v42 = vpop.f32.mrb[24].mxu0 }
 0x5f6   : > { %v3546_v43 = vpop.f32.mrb[25].mxu0  ;;  %v1516_v40 = vsel %vm784_vm3, %v3544_v42, -inf }
 0x5f7   : > { %v3548_v27 = vpop.f32.mrb[26].mxu0  ;;  %v1510_v39 = vsel %vm784_vm3, %v3546_v43, -inf }
 0x5f8   : > { %v3550_v36 = vpop.f32.mrb[27].mxu0  ;;  %v1519_v41 = vsel %vm784_vm3, %v3548_v27, -inf }
 0x5fd   : > { %v3552_v45 = vpop.f32.mrb[28].mxu0 }
 0x5fe   : > { %v3554_v46 = vpop.f32.mrb[29].mxu0 }
 0x5ff   : > { %v2895_v47 = vpop.f32.mrb[30].mxu0 }
 0x600   : > { %v3556_v44 = vpop.f32.mrb[31].mxu0 }
 0x665   : > { %v1073_v37 = vpop.xlane.xlu0 %1072 }
 0x666   : > { %v1092_v48 = vsub.f32 %v1041_v28, %v1073_v37 }
 0x667   : > { %v1076_v49 = vpop.xlane.xlu1 %1075 }
 0x668   : > { %v1099_v52 = vmul.f32 1.442695, %v1092_v48  ;;  %v1093_v53 = vsub.f32 %v1044_v31, %v1076_v49 }
 0x669   : > { %v1079_v50 = vpop.xlane.xlu0 %1078 }
 0x66a   : > { %v1094_v51 = vsub.f32 %v2838_v25, %v1079_v50  ;;  %v1101_v59 = vmul.f32 1.442695, %v1093_v53 }
 0x66c   : > { %v1103_v54 = vmul.f32 1.442695, %v1094_v51 }
 0x66d   : > { %v1082_v55 = vpop.xlane.xlu0 %1081 }
 0x66e   : > { %3090 = vpow2.f32 %v1103_v54  ;;  %v1095_v56 = vsub.f32 %v2839_v29, %v1082_v55 }
 0x66f   : > { %v1088_v58 = vpop.xlane.xlu1 %1087  ;;  %3092 = vpow2.f32 %v1099_v52 }
 0x670   : > { %v1105_v63 = vmul.f32 1.442695, %v1095_v56  ;;  %v1097_v0 = vsub.f32 %v1060_v19, %v1088_v58 }
 0x671   : > { %v1085_v1 = vpop.xlane.xlu0 %1084 }
 0x672   : > { %3094 = vpow2.f32 %v1105_v63  ;;  %v1109_v2 = vmul.f32 1.442695, %v1097_v0  ;;  %v1096_v3 = vsub.f32 %v1057_v35, %v1085_v1 }
 0x673   : > { %3096 = vpow2.f32 %v1101_v59 }
 0x674   : > { %3098 = vpow2.f32 %v1109_v2  ;;  %v1107_v7 = vmul.f32 1.442695, %v1096_v3 }
 0x675   : > { %v1091_v4 = vpop.xlane.xlu0 %1090 }
 0x676   : > { %v1098_v5 = vsub.f32 %v2842_v34, %v1091_v4 }
 0x678   : > { %v3558_v6 = vpop.eup %3090  ;;  %v1111_v11 = vmul.f32 1.442695, %v1098_v5 }
 0x679   : > { %v1119_v23 = vsel %vm784_vm3, %v3558_v6, 0.0  ;;  %v3562_v25 = vpop.eup %3092 }
 0x67a   : > { %3100 = vpow2.f32 %v1111_v11  ;;  %1120 = vadd.xlane.f32.xlu1 %v1119_v23  ;;  %v1113_v30 = vsel %vm784_vm3, %v3562_v25, 0.0 }
 0x67b   : > { %3102 = vpow2.f32 %v1107_v7 }
 0x67c   : > { %v3564_v28 = vpop.eup %3094 }
 0x67d   : > { %v1122_v29 = vsel %vm784_vm3, %v3564_v28, 0.0  ;;  %v3570_v31 = vpop.eup %3096 }
 0x67e   : > { %1123 = vadd.xlane.f32.xlu0 %v1122_v29  ;;  %1114 = vadd.xlane.f32.xlu1 %v1113_v30  ;;  %v1116_v32 = vsel %vm784_vm3, %v3570_v31, 0.0  ;;  %v3574_v33 = vpop.eup %3098 }
 0x67f   : > { %v1128_v38 = vsel %vm784_vm3, %v3574_v33, 0.0 }
 0x682   : > { %1117 = vadd.xlane.f32.xlu0 %v1116_v32 }
 0x684   : > { %v3576_v34 = vpop.eup %3100 }
 0x685   : > { %v1131_v35 = vsel %vm803_vm4, %v3576_v34, 0.0  ;;  %v3582_v26 = vpop.eup %3102 }
 0x686   : > { %1132 = vadd.xlane.f32.xlu1 %v1131_v35  ;;  %1129 = vadd.xlane.f32.xlu0 %v1128_v38  ;;  %v1125_v19 = vsel %vm784_vm3, %v3582_v26, 0.0 }
 0x68a   : > { %1126 = vadd.xlane.f32.xlu1 %v1125_v19 }
 0x69b   : > { %1154 = vrot.lane.b32.xlu1 %v3397_v57, %s3223_s21 }
 0x69c   : > { %1152 = vrot.lane.b32.xlu0 %v3399_v60, %s3223_s21 }
 0x69f   : > { %1156 = vrot.lane.b32.xlu1 %v3409_v8, %s3223_s21 }
 0x6a0   : > { %1780 = vrot.lane.b32.xlu0 %v3399_v60, %s3224_s22 }
 0x6a3   : > { %1158 = vrot.lane.b32.xlu1 %v3414_v10, %s3223_s21 }
 0x6a4   : > { %1784 = vrot.lane.b32.xlu0 %v3409_v8, %s3224_s22 }
 0x6a7   : > { %1782 = vrot.lane.b32.xlu1 %v3397_v57, %s3224_s22 }
 0x6a8   : > { %1772 = vrot.lane.b32.xlu0 %v3404_v62, %s3225_s23  ;;  %v1513_v62 = vsel %vm784_vm3, %v3550_v36, -inf }
 0x6ab   : > { %1786 = vrot.lane.b32.xlu1 %v3414_v10, %s3224_s22 }
 0x6ac   : > { %1776 = vrot.lane.b32.xlu0 %v3411_v9, %s3225_s23  ;;  %v1525_v9 = vsel %vm784_vm3, %v3556_v44, -inf }
 0x6af   : > { %1774 = vrot.lane.b32.xlu1 %v3401_v61, %s3225_s23  ;;  %v1522_v61 = vsel %vm784_vm3, %v3554_v46, -inf }
 0x6b3   : > { %1778 = vrot.lane.b32.xlu1 %v3429_v22, %s3225_s23  ;;  %v1528_v22 = vsel %vm803_vm4, %v3552_v45, -inf }
 0x6cb   : > { %1511 = vmax.xlane.f32.xlu0 %v1510_v39 }
 0x6cf   : > { %1517 = vmax.xlane.f32.xlu0 %v1516_v40 }
 0x6d3   : > { %1520 = vmax.xlane.f32.xlu0 %v1519_v41 }
 0x6d7   : > { %1514 = vmax.xlane.f32.xlu1 %v1513_v62  ;;  %1523 = vmax.xlane.f32.xlu0 %v1522_v61 }
 0x6db   : > { %1526 = vmax.xlane.f32.xlu1 %v1525_v9  ;;  %1529 = vmax.xlane.f32.xlu0 %v1528_v22 }
 0x707   : > { %v1121_v47 = vpop.xlane.xlu1 %1120 }
 0x70b   : > { %v1124_v37 = vpop.xlane.xlu0 %1123  ;;  %v1115_v48 = vpop.xlane.xlu1 %1114 }
 0x70c   : > { %3104 = vrcp.f32 %v1115_v48 }
 0x70f   : > { %v1118_v49 = vpop.xlane.xlu0 %1117 }
 0x710   : > { %3106 = vrcp.f32 %v1118_v49 }
 0x711   : > { %3108 = vrcp.f32 %v1124_v37 }
 0x712   : > { %3110 = vrcp.f32 %v1121_v47 }
 0x713   : > { %v1130_v50 = vpop.xlane.xlu0 %1129  ;;  %v1133_v51 = vpop.xlane.xlu1 %1132 }
 0x714   : > { %3112 = vrcp.f32 %v1130_v50 }
 0x716   : > { %v3105_v54 = vpop.eup %3104 }
 0x717   : > { %v1153_v52 = vpop.permute.xlu0 %1152  ;;  %v1127_v53 = vpop.xlane.xlu1 %1126  ;;  %v1141_v59 = vmul.f32 %v3105_v54, %v3562_v25 }
 0x718   : > { %3114 = vrcp.f32 %v1127_v53  ;;  %2844 = vmatprep.subr.bf16.mxu1 %v1153_v52 }
 0x719   : > { %2845 = vmatpush3.bf16.msra.mxu1 %v1153_v52  ;;  %3116 = vrcp.f32 %v1133_v51 }
 0x71a   : > { %v3107_v55 = vpop.eup %3106 }
 0x71b   : > { %v1781_v56 = vpop.permute.xlu0 %1780  ;;  %v1155_v58 = vpop.permute.xlu1 %1154  ;;  %v1142_v63 = vmul.f32 %v3107_v55, %v3570_v31 }
 0x71c   : > { %v1801_v0 = vsel %vm695_vm2, %v1781_v56, 0  ;;  %2846 = vmatprep.subr.bf16.mxu1 %v1155_v58  ;;  %3022 = vmatprep.subr.msk.bf16.mxu0 %vm695_vm2, %v1781_v56  ;;  %v3109_v2 = vpop.eup %3108 }
 0x71d   : > { %2847 = vmatpush3.bf16.msra.mxu1 %v1155_v58  ;;  %2923 = vmatpush3.bf16.xpose.msra.mxu0 %v1801_v0  ;;  %v1148_v1 = vpack.c.bf16 %v1142_v63, %v1141_v59  ;;  %v3111_v5 = vpop.eup %3110  ;;  %v1144_v23 = vmul.f32 %v3109_v2, %v3564_v28 }
 0x71e   : > { %v3113_v7 = vpop.eup %3112  ;;  %v1143_v31 = vmul.f32 %v3111_v5, %v3558_v6 }
 0x71f   : > { %v1785_v3 = vpop.permute.xlu0 %1784  ;;  %2852 = vmatprep.mubr.msk.bf16.mxu1 %vm784_vm3, %v1148_v1  ;;  %v1157_v4 = vpop.permute.xlu1 %1156  ;;  %v1146_v35 = vmul.f32 %v3113_v7, %v3574_v33 }
 0x720   : > { %2848 = vmatprep.subr.bf16.mxu1 %v1157_v4  ;;  %v1149_v38 = vpack.c.bf16 %v1144_v23, %v1143_v31  ;;  %v1807_v33 = vsel %vm695_vm2, %v1785_v3, 0 }
 0x721   : > { %2849 = vmatpush3.bf16.msra.mxu1 %v1157_v4 }
 0x722   : > { %v3115_v11 = vpop.eup %3114 }
 0x723   : > { %v1773_v25 = vpop.permute.xlu0 %1772  ;;  %v1159_v29 = vpop.permute.xlu1 %1158  ;;  %v1145_v30 = vmul.f32 %v3115_v11, %v3582_v26 }
 0x724   : > { %v1176_v32 = vsel %vm890_vm5, %v1159_v29, 0  ;;  %3013 = vmatprep.subr.msk.bf16.mxu1 %vm890_vm5, %v1159_v29  ;;  %2930 = vmatprep.mubr.msk.bf16.mxu0 %vm695_vm2, %v1773_v25  ;;  %v3117_v19 = vpop.eup %3116 }
 0x725   : > { %2851 = vmatpush3.bf16.msra.mxu1 %v1176_v32  ;;  %v1150_v40 = vpack.c.bf16 %v1146_v35, %v1145_v30  ;;  %v1147_v6 = vmul.f32 %v3117_v19, %v3576_v34  ;;  %v665_v32 = vld [vmem:[%s4021_s5 + $0x8] sm:$0xff]  ;;  %v664_v19 = vld [vmem:[%s4021_s5] sm:$0xff] }
 0x726   : > { %v1246_v35 = vpack.c.bf16 %v665_v32, %v665_v32 }
 0x727   : > { %v1783_v39 = vpop.permute.xlu1 %1782  ;;  %v1151_v26 = vpack.c.bf16 %v1147_v6, %v1147_v6  ;;  %v1777_v9 = vpop.permute.xlu0 %1776 }
 0x728   : > { %v1804_v28 = vsel %vm695_vm2, %v1783_v39, 0  ;;  %2853 = vmatmul.mubr.msk.bf16.vlgmr.msra.gmra.mrb[8].mxu1 %vm784_vm3, %v1149_v38  ;;  %3023 = vmatprep.subr.msk.bf16.mxu0 %vm695_vm2, %v1783_v39  ;;  %v1261_v38 = vsel %vm1259_vm6, %v1246_v35, 0  ;;  %v962_v39 = vpack.c.bf16 %v664_v19, %v664_v19 }
 0x729   : > { %2856 = vmatprep.mubr.msk.bf16.mxu1 %vm784_vm3, %v1150_v40  ;;  %2925 = vmatpush3.bf16.xpose.msra.mxu0 %v1804_v28 }
 0x72a   : > { %3024 = vmatprep.subr.msk.bf16.mxu0 %vm695_vm2, %v1785_v3  ;;  %3014 = vmatprep.subr.msk.bf16.mxu1 %vm1259_vm6, %v1246_v35 }
 0x72b   : > { %v1787_v41 = vpop.permute.xlu1 %1786  ;;  %2861 = vmatpush3.bf16.msra.mxu1 %v1261_v38 }
 0x72c   : > { %v1810_v62 = vsel %vm695_vm2, %v1787_v41, 0  ;;  %3015 = vmatprep.subr.msk.bf16.mxu1 %vm1259_vm6, %v962_v39 }
 0x72f   : > { %v1775_v61 = vpop.permute.xlu1 %1774 }
 0x730   : > { %2857 = vmatmul.mubr.msk.bf16.gmra.mrb[12].mxu1 %vm784_vm3, %v1151_v26 }
 0x731   : > { %2927 = vmatpush3.bf16.xpose.msra.mxu0 %v1807_v33 }
 0x732   : > { %3025 = vmatprep.subr.msk.bf16.mxu0 %vm695_vm2, %v1787_v41 }
 0x733   : > { %v1779_v22 = vpop.permute.xlu1 %1778 }
 0x739   : > { %2929 = vmatpush3.bf16.xpose.msra.mxu0 %v1810_v62 }
 0x740   : > { %2931 = vmatmul.mubr.msk.bf16.vlgmr.msra.gmra.mrb[32].mxu0 %vm695_vm2, %v1775_v61 }
 0x741   : > { %2934 = vmatprep.mubr.msk.bf16.mxu0 %vm695_vm2, %v1777_v9  ;;  %v1340_v9 = vsel %vm1259_vm6, %v962_v39, 0 }
 0x748   : > { %2935 = vmatmul.mubr.msk.bf16.gmra.mrb[36].mxu0 %vm695_vm2, %v1779_v22 }
 0x758   : > { %v1512_v34 = vpop.xlane.xlu0 %1511 }
 0x759   : > { %v1531_v47 = vsub.f32 %v3546_v43, %v1512_v34 }
 0x75b   : > { %v1538_v49 = vmul.f32 1.442695, %v1531_v47 }
 0x75c   : > { %v1518_v37 = vpop.xlane.xlu0 %1517 }
 0x75d   : > { %v1533_v48 = vsub.f32 %v3544_v42, %v1518_v37 }
 0x75f   : > { %v1542_v50 = vmul.f32 1.442695, %v1533_v48 }
 0x760   : > { %v1521_v51 = vpop.xlane.xlu0 %1520 }
 0x761   : > { %3118 = vpow2.f32 %v1542_v50  ;;  %v1534_v52 = vsub.f32 %v3548_v27, %v1521_v51 }
 0x762   : > { %3120 = vpow2.f32 %v1538_v49 }
 0x763   : > { %v1544_v53 = vmul.f32 1.442695, %v1534_v52 }
 0x764   : > { %v1524_v54 = vpop.xlane.xlu0 %1523  ;;  %v1515_v55 = vpop.xlane.xlu1 %1514 }
 0x765   : > { %3122 = vpow2.f32 %v1544_v53  ;;  %v1532_v56 = vsub.f32 %v3550_v36, %v1515_v55  ;;  %v1535_v58 = vsub.f32 %v3554_v46, %v1524_v54 }
 0x767   : > { %v1540_v59 = vmul.f32 1.442695, %v1532_v56  ;;  %v1546_v27 = vmul.f32 1.442695, %v1535_v58 }
 0x768   : > { %v1530_v43 = vpop.xlane.xlu0 %1529  ;;  %v1527_v63 = vpop.xlane.xlu1 %1526 }
 0x769   : > { %v1537_v42 = vsub.f32 %v3552_v45, %v1530_v43  ;;  %v1536_v0 = vsub.f32 %v3556_v44, %v1527_v63  ;;  %3124 = vpow2.f32 %v1540_v59 }
 0x76b   : > { %v3644_v1 = vpop.eup %3118  ;;  %v1550_v2 = vmul.f32 1.442695, %v1537_v42  ;;  %v1548_v3 = vmul.f32 1.442695, %v1536_v0 }
 0x76c   : > { %v1558_v4 = vsel %vm784_vm3, %v3644_v1, 0.0  ;;  %v3648_v5 = vpop.eup %3120 }
 0x76d   : > { %3126 = vpow2.f32 %v1550_v2  ;;  %1559 = vadd.xlane.f32.xlu1 %v1558_v4  ;;  %v1552_v45 = vsel %vm784_vm3, %v3648_v5, 0.0 }
 0x76e   : > { %3128 = vpow2.f32 %v1548_v3 }
 0x76f   : > { %v3650_v36 = vpop.eup %3122  ;;  %3130 = vpow2.f32 %v1546_v27 }
 0x770   : > { %v1561_v46 = vsel %vm784_vm3, %v3650_v36, 0.0 }
 0x771   : > { %1553 = vadd.xlane.f32.xlu1 %v1552_v45  ;;  %1562 = vadd.xlane.f32.xlu0 %v1561_v46 }
 0x773   : > { %v3656_v44 = vpop.eup %3124 }
 0x774   : > { %v1555_v7 = vsel %vm784_vm3, %v3656_v44, 0.0 }
 0x775   : > { %1556 = vadd.xlane.f32.xlu0 %v1555_v7 }
 0x777   : > { %v3660_v11 = vpop.eup %3126 }
 0x778   : > { %v3662_v23 = vpop.eup %3128  ;;  %v1570_v25 = vsel %vm803_vm4, %v3660_v11, 0.0 }
 0x779   : > { %v3666_v29 = vpop.eup %3130  ;;  %1571 = vadd.xlane.f32.xlu1 %v1570_v25  ;;  %v1567_v30 = vsel %vm784_vm3, %v3662_v23, 0.0 }
 0x77a   : > { %1568 = vadd.xlane.f32.xlu0 %v1567_v30  ;;  %v1564_v31 = vsel %vm784_vm3, %v3666_v29, 0.0 }
 0x77d   : > { %1565 = vadd.xlane.f32.xlu1 %v1564_v31 }
 0x78e   : > { %1593 = vrot.lane.b32.xlu1 %v3397_v57, %s3226_s15 }
 0x790   : > { %1591 = vrot.lane.b32.xlu0 %v3399_v60, %s3226_s15 }
 0x792   : > { %1595 = vrot.lane.b32.xlu1 %v3409_v8, %s3226_s15 }
 0x796   : > { %1597 = vrot.lane.b32.xlu1 %v3414_v10, %s3226_s15  ;;  %s440_s15 = scalar_lea.vmem %s4029_s13, %s3028_s27 }
 0x7fa   : > { %v1560_v28 = vpop.xlane.xlu1 %1559 }
 0x7fb   : > { %v2854_v40 = vpop.f32.mrb[8].mxu1 }
 0x7fc   : > { %v1212_v6 = vpop.f32.mrb[9].mxu1 }
 0x7fd   : > { %v2855_v26 = vpop.f32.mrb[10].mxu1 }
 0x7fe   : > { %v1243_v33 = vpack.c.bf16 %v2855_v26, %v2854_v40  ;;  %v1563_v41 = vpop.xlane.xlu0 %1562  ;;  %v1215_v62 = vpop.f32.mrb[11].mxu1 }
 0x7ff   : > { %v1242_v61 = vpack.c.bf16 %v1215_v62, %v1212_v6  ;;  %v1554_v22 = vpop.xlane.xlu1 %1553 }
 0x801   : > { %2862 = vmatprep.mubr.msk.bf16.mxu1 %vm695_vm2, %v1242_v61 }
 0x802   : > { %2863 = vmatmul.mubr.msk.bf16.vlgmr.msra.gmra.mrb[16].mxu1 %vm695_vm2, %v1243_v33  ;;  %v1557_v34 = vpop.xlane.xlu0 %1556 }
 0x803   : > { %v2858_v47 = vpop.f32.mrb[12].mxu1  ;;  %2871 = vmatpush3.bf16.msra.mxu1 %v1340_v9  ;;  %3132 = vrcp.f32 %v1557_v34 }
 0x804   : > { %v1228_v37 = vpop.f32.mrb[13].mxu1  ;;  %v1245_v53 = vpack.c.bf16 %v2858_v47, %v2858_v47  ;;  %3134 = vrcp.f32 %v1554_v22 }
 0x805   : > { %v2859_v48 = vpop.f32.mrb[14].mxu1  ;;  %3136 = vrcp.f32 %v1563_v41 }
 0x806   : > { %v1231_v49 = vpop.f32.mrb[15].mxu1  ;;  %v1572_v50 = vpop.xlane.xlu1 %1571 }
 0x807   : > { %v1244_v51 = vpack.c.bf16 %v1231_v49, %v1228_v37  ;;  %v1569_v52 = vpop.xlane.xlu0 %1568 }
 0x809   : > { %2866 = vmatprep.mubr.msk.bf16.mxu1 %vm695_vm2, %v1244_v51 }
 0x80a   : > { %2867 = vmatmul.mubr.msk.bf16.gmra.mrb[20].mxu1 %vm695_vm2, %v1245_v53  ;;  %v1566_v54 = vpop.xlane.xlu1 %1565 }
 0x80b   : > { %v1592_v55 = vpop.permute.xlu0 %1591  ;;  %2872 = vmatprep.mubr.msk.bf16.mxu1 %vm695_vm2, %v958_v17  ;;  %3138 = vrcp.f32 %v1566_v54 }
 0x80c   : > { %2896 = vmatprep.subr.bf16.mxu1 %v1592_v55  ;;  %3140 = vrcp.f32 %v1560_v28 }
 0x80d   : > { %v3133_v58 = vpop.eup %3132  ;;  %3142 = vrcp.f32 %v1569_v52 }
 0x80e   : > { %v1594_v56 = vpop.permute.xlu1 %1593  ;;  %v3135_v16 = vpop.eup %3134  ;;  %v1581_v12 = vmul.f32 %v3133_v58, %v3656_v44  ;;  %3144 = vrcp.f32 %v1572_v50 }
 0x80f   : > { %v1580_v21 = vmul.f32 %v3135_v16, %v3648_v5 }
 0x811   : > { %v1587_v0 = vpack.c.bf16 %v1581_v12, %v1580_v21 }
 0x812   : > { %2873 = vmatmul.mubr.msk.bf16.vlgmr.msra.gmra.mrb[16].mxu1 %vm695_vm2, %v959_v15  ;;  %v1596_v59 = vpop.permute.xlu1 %1595 }
 0x813   : > { %2897 = vmatpush3.bf16.msra.mxu1 %v1592_v55  ;;  %2876 = vmatprep.mubr.msk.bf16.mxu1 %vm695_vm2, %v960_v18  ;;  %v3702_v13 = vpop.f32.mrb[32].mxu0  ;;  %v3137_v18 = vpop.eup %3136 }
 0x814   : > { %2898 = vmatprep.subr.bf16.mxu1 %v1594_v56  ;;  %v1846_v17 = vpop.f32.mrb[33].mxu0  ;;  %v1882_v42 = vsel %vm784_vm3, %v3702_v13, -inf  ;;  %v1583_v20 = vmul.f32 %v3137_v18, %v3650_v36 }
 0x815   : > { %v3704_v43 = vpop.f32.mrb[34].mxu0  ;;  %v1876_v63 = vsel %vm784_vm3, %v1846_v17, -inf  ;;  %v3139_v27 = vpop.eup %3138 }
 0x816   : > { %v3708_v14 = vpop.f32.mrb[35].mxu0  ;;  %1877 = vmax.xlane.f32.xlu0 %v1876_v63  ;;  %v3141_v2 = vpop.eup %3140  ;;  %v1885_v44 = vsel %vm784_vm3, %v3704_v43, -inf  ;;  %v1584_v7 = vmul.f32 %v3139_v27, %v3666_v29 }
 0x817   : > { %2899 = vmatpush3.bf16.msra.mxu1 %v1594_v56  ;;  %v1879_v15 = vsel %vm784_vm3, %v3708_v14, -inf  ;;  %v1598_v3 = vpop.permute.xlu1 %1597  ;;  %v3143_v5 = vpop.eup %3142  ;;  %v1582_v25 = vmul.f32 %v3141_v2, %v3644_v1 }
 0x818   : > { %2900 = vmatprep.subr.bf16.mxu1 %v1596_v59  ;;  %1880 = vmax.xlane.f32.xlu1 %v1879_v15  ;;  %v1615_v30 = vsel %vm890_vm5, %v1598_v3, 0  ;;  %v1585_v36 = vmul.f32 %v3143_v5, %v3662_v23  ;;  %v3145_v38 = vpop.eup %3144  ;;  %v666_v23 = vld [vmem:[%s4021_s5 + $0x10] sm:$0xff] }
 0x819   : > { %v1588_v35 = vpack.c.bf16 %v1583_v20, %v1582_v25  ;;  %v1586_v1 = vmul.f32 %v3145_v38, %v3660_v11  ;;  %v1685_v28 = vpack.c.bf16 %v666_v23, %v666_v23 }
 0x81a   : > { %2877 = vmatmul.mubr.msk.bf16.gmra.mrb[24].mxu1 %vm695_vm2, %v961_v24  ;;  %1883 = vmax.xlane.f32.xlu0 %v1882_v42  ;;  %v1589_v39 = vpack.c.bf16 %v1585_v36, %v1584_v7 }
 0x81b   : > { %2901 = vmatpush3.bf16.msra.mxu1 %v1596_v59  ;;  %2904 = vmatprep.mubr.msk.bf16.mxu1 %vm784_vm3, %v1587_v0  ;;  %v2936_v4 = vpop.f32.mrb[36].mxu0  ;;  %v1590_v40 = vpack.c.bf16 %v1586_v1, %v1586_v1  ;;  %v1699_v6 = vsel %vm1259_vm6, %v1685_v28, 0 }
 0x81c   : > { %3020 = vmatprep.subr.msk.bf16.mxu1 %vm890_vm5, %v1598_v3  ;;  %v1862_v45 = vpop.f32.mrb[37].mxu0  ;;  %v1894_v29 = vsel %vm803_vm4, %v2936_v4, -inf }
 0x81d   : > { %v2937_v46 = vpop.f32.mrb[38].mxu0  ;;  %v1888_v19 = vsel %vm784_vm3, %v1862_v45, -inf }
 0x81e   : > { %v1865_v31 = vpop.f32.mrb[39].mxu0  ;;  %1886 = vmax.xlane.f32.xlu0 %v1885_v44 }
 0x81f   : > { %2903 = vmatpush3.bf16.msra.mxu1 %v1615_v30  ;;  %v1891_v32 = vsel %vm784_vm3, %v1865_v31, -inf }
 0x820   : > { %1892 = vmax.xlane.f32.xlu1 %v1891_v32  ;;  %3021 = vmatprep.subr.msk.bf16.mxu1 %vm1259_vm6, %v1685_v28 }
 0x822   : > { %1889 = vmax.xlane.f32.xlu0 %v1888_v19  ;;  %2905 = vmatmul.mubr.msk.bf16.vlgmr.msra.gmra.mrb[28].mxu1 %vm784_vm3, %v1588_v35 }
 0x823   : > { %2908 = vmatprep.mubr.msk.bf16.mxu1 %vm784_vm3, %v1589_v39  ;;  %2913 = vmatpush3.bf16.msra.mxu1 %v1699_v6 }
 0x826   : > { %1895 = vmax.xlane.f32.xlu0 %v1894_v29 }
 0x82a   : > { %2909 = vmatmul.mubr.msk.bf16.gmra.mrb[32].mxu1 %vm784_vm3, %v1590_v40 }
 0x8a3   : > { %v1878_v26 = vpop.xlane.xlu0 %1877 }
 0x8a4   : > { %v1897_v33 = vsub.f32 %v1846_v17, %v1878_v26 }
 0x8a5   : > { %v1881_v41 = vpop.xlane.xlu1 %1880 }
 0x8a6   : > { %v1904_v61 = vmul.f32 1.442695, %v1897_v33  ;;  %v1898_v9 = vsub.f32 %v3708_v14, %v1881_v41 }
 0x8a7   : > { %v1884_v11 = vpop.xlane.xlu0 %1883 }
 0x8a8   : > { %v1899_v62 = vsub.f32 %v3702_v13, %v1884_v11  ;;  %v1906_v48 = vmul.f32 1.442695, %v1898_v9 }
 0x8aa   : > { %v1908_v22 = vmul.f32 1.442695, %v1899_v62 }
 0x8ab   : > { %v1887_v34 = vpop.xlane.xlu0 %1886 }
 0x8ac   : > { %3146 = vpow2.f32 %v1908_v22  ;;  %v1900_v47 = vsub.f32 %v3704_v43, %v1887_v34 }
 0x8ad   : > { %v1893_v37 = vpop.xlane.xlu1 %1892  ;;  %3148 = vpow2.f32 %v1904_v61 }
 0x8ae   : > { %v1910_v49 = vmul.f32 1.442695, %v1900_v47  ;;  %v1902_v50 = vsub.f32 %v1865_v31, %v1893_v37  ;;  %v667_v37 = vld [vmem:[%s4021_s5 + $0x18] sm:$0xff] }
 0x8af   : > { %v1890_v51 = vpop.xlane.xlu0 %1889 }
 0x8b0   : > { %3150 = vpow2.f32 %v1910_v49  ;;  %v1914_v52 = vmul.f32 1.442695, %v1902_v50  ;;  %v1901_v53 = vsub.f32 %v1862_v45, %v1890_v51 }
 0x8b1   : > { %3152 = vpow2.f32 %v1906_v48 }
 0x8b2   : > { %3154 = vpow2.f32 %v1914_v52  ;;  %v1912_v58 = vmul.f32 1.442695, %v1901_v53  ;;  %v2051_v52 = vpack.c.bf16 %v667_v37, %v667_v37 }
 0x8b3   : > { %v1896_v54 = vpop.xlane.xlu0 %1895 }
 0x8b4   : > { %v1903_v55 = vsub.f32 %v2936_v4, %v1896_v54 }
 0x8b6   : > { %v3742_v56 = vpop.eup %3146  ;;  %v1916_v13 = vmul.f32 1.442695, %v1903_v55 }
 0x8b7   : > { %v1924_v16 = vsel %vm784_vm3, %v3742_v56, 0.0  ;;  %v3746_v17 = vpop.eup %3148 }
 0x8b8   : > { %3156 = vpow2.f32 %v1916_v13  ;;  %1925 = vadd.xlane.f32.xlu1 %v1924_v16  ;;  %v1918_v43 = vsel %vm784_vm3, %v3746_v17, 0.0 }
 0x8b9   : > { %3158 = vpow2.f32 %v1912_v58 }
 0x8ba   : > { %v3748_v59 = vpop.eup %3150 }
 0x8bb   : > { %v1927_v63 = vsel %vm784_vm3, %v3748_v59, 0.0  ;;  %v3754_v12 = vpop.eup %3152 }
 0x8bc   : > { %1919 = vadd.xlane.f32.xlu1 %v1918_v43  ;;  %1928 = vadd.xlane.f32.xlu0 %v1927_v63  ;;  %v1921_v14 = vsel %vm784_vm3, %v3754_v12, 0.0  ;;  %v3758_v15 = vpop.eup %3154 }
 0x8bd   : > { %v1933_v18 = vsel %vm784_vm3, %v3758_v15, 0.0 }
 0x8c0   : > { %1922 = vadd.xlane.f32.xlu0 %v1921_v14 }
 0x8c2   : > { %v3760_v21 = vpop.eup %3156 }
 0x8c3   : > { %v1936_v24 = vsel %vm803_vm4, %v3760_v21, 0.0  ;;  %v3766_v42 = vpop.eup %3158 }
 0x8c4   : > { %1937 = vadd.xlane.f32.xlu1 %v1936_v24  ;;  %1934 = vadd.xlane.f32.xlu0 %v1933_v18  ;;  %v1930_v0 = vsel %vm784_vm3, %v3766_v42, 0.0 }
 0x8c8   : > { %1931 = vadd.xlane.f32.xlu1 %v1930_v0 }
 0x8d9   : > { %1959 = vrot.lane.b32.xlu1 %v3397_v57, %s3227_s18 }
 0x8da   : > { %1957 = vrot.lane.b32.xlu0 %v3399_v60, %s3227_s18 }
 0x8dd   : > { %v2868_v27 = vpop.f32.mrb[20].mxu1  ;;  %1961 = vrot.lane.b32.xlu1 %v3409_v8, %s3227_s18 }
 0x8de   : > { %v1313_v2 = vpop.f32.mrb[21].mxu1 }
 0x8df   : > { %v2869_v3 = vpop.f32.mrb[22].mxu1 }
 0x8e0   : > { %v1316_v4 = vpop.f32.mrb[23].mxu1 }
 0x8e1   : > { %1963 = vrot.lane.b32.xlu1 %v3414_v10, %s3227_s18 }
 0x8ed   : > { %v2878_v5 = vpop.f32.mrb[24].mxu1 }
 0x8ee   : > { %v3774_v20 = vadd.f32 %v2878_v5, %v2868_v27  ;;  %v1392_v45 = vpop.f32.mrb[25].mxu1 }
 0x8ef   : > { %v3776_v46 = vadd.f32 %v1392_v45, %v1313_v2  ;;  %v2879_v44 = vpop.f32.mrb[26].mxu1 }
 0x8f0   : > { %v1395_v7 = vpop.f32.mrb[27].mxu1 }
 0x8f1   : > { %v3778_v25 = vadd.f32 %v1395_v7, %v1316_v4 }
 0x8f5   : > { %v2906_v57 = vpop.f32.mrb[28].mxu1 }
 0x8f6   : > { %v1651_v60 = vpop.f32.mrb[29].mxu1 }
 0x8f7   : > { %v2907_v30 = vpop.f32.mrb[30].mxu1 }
 0x8f8   : > { %v1682_v31 = vpack.c.bf16 %v2907_v30, %v2906_v57  ;;  %v1654_v8 = vpop.f32.mrb[31].mxu1 }
 0x8f9   : > { %v1681_v32 = vpack.c.bf16 %v1654_v8, %v1651_v60  ;;  %v2665_v60 = vld [vmem:[%s4022_s6] ss:$0 sm:$0xff] }
 0x8fb   : > { %2914 = vmatprep.mubr.msk.bf16.mxu1 %vm695_vm2, %v1681_v32  ;;  %v3203_v32 = vld [vmem:[%s3314_s30] sm:$0xff] }
 0x8fc   : > { %2915 = vmatmul.mubr.msk.bf16.vlgmr.msra.gmra.mrb[16].mxu1 %vm695_vm2, %v1682_v31  ;;  %v3202_v31 = vld [vmem:[%s3314_s30 + $0x10] sm:$0xff] }
 0x8fd   : > { %v2910_v10 = vpop.f32.mrb[32].mxu1 }
 0x8fe   : > { %v1667_v36 = vpop.f32.mrb[33].mxu1  ;;  %v1684_v39 = vpack.c.bf16 %v2910_v10, %v2910_v10 }
 0x8ff   : > { %v2911_v35 = vpop.f32.mrb[34].mxu1 }
 0x900   : > { %v1670_v38 = vpop.f32.mrb[35].mxu1 }
 0x901   : > { %v1683_v19 = vpack.c.bf16 %v1670_v38, %v1667_v36 }
 0x903   : > { %2918 = vmatprep.mubr.msk.bf16.mxu1 %vm695_vm2, %v1683_v19  ;;  %v3204_v19 = vld [vmem:[%s3314_s30 + $0x8] sm:$0xff] }
 0x904   : > { %2919 = vmatmul.mubr.msk.bf16.gmra.mrb[36].mxu1 %vm695_vm2, %v1684_v39 }
 0x945   : > { %v1926_v1 = vpop.xlane.xlu1 %1925 }
 0x949   : > { %v1929_v29 = vpop.xlane.xlu0 %1928  ;;  %v1920_v40 = vpop.xlane.xlu1 %1919 }
 0x94a   : > { %3160 = vrcp.f32 %v1920_v40 }
 0x94d   : > { %v1923_v23 = vpop.xlane.xlu0 %1922 }
 0x94e   : > { %3162 = vrcp.f32 %v1923_v23 }
 0x94f   : > { %3164 = vrcp.f32 %v1929_v29  ;;  %v3205_v29 = vld [vmem:[%s3314_s30 + $0x18] sm:$0xff] }
 0x950   : > { %3166 = vrcp.f32 %v1926_v1 }
 0x951   : > { %v1935_v28 = vpop.xlane.xlu0 %1934  ;;  %v1938_v6 = vpop.xlane.xlu1 %1937 }
 0x952   : > { %3168 = vrcp.f32 %v1935_v28 }
 0x954   : > { %v3161_v41 = vpop.eup %3160 }
 0x955   : > { %v1958_v26 = vpop.permute.xlu0 %1957  ;;  %v1932_v33 = vpop.xlane.xlu1 %1931  ;;  %v1946_v61 = vmul.f32 %v3161_v41, %v3746_v17  ;;  %v2065_v17 = vsel %vm1259_vm6, %v2051_v52, 0 }
 0x956   : > { %3170 = vrcp.f32 %v1932_v33  ;;  %2938 = vmatprep.subr.bf16.mxu1 %v1958_v26 }
 0x957   : > { %2939 = vmatpush3.bf16.msra.mxu1 %v1958_v26  ;;  %3172 = vrcp.f32 %v1938_v6 }
 0x958   : > { %v3163_v11 = vpop.eup %3162 }
 0x959   : > { %v1960_v62 = vpop.permute.xlu1 %1959  ;;  %v1947_v9 = vmul.f32 %v3163_v11, %v3754_v12  ;;  %v3165_v34 = vpop.eup %3164 }
 0x95a   : > { %2940 = vmatprep.subr.bf16.mxu1 %v1960_v62  ;;  %v3167_v48 = vpop.eup %3166  ;;  %v1949_v51 = vmul.f32 %v3165_v34, %v3748_v59  ;;  %v3206_v34 = vld [vmem:[%s3314_s30 + $0x20] sm:$0xff] }
 0x95b   : > { %2941 = vmatpush3.bf16.msra.mxu1 %v1960_v62  ;;  %v1953_v22 = vpack.c.bf16 %v1947_v9, %v1946_v61  ;;  %v1948_v55 = vmul.f32 %v3167_v48, %v3742_v56  ;;  %v3207_v48 = vld [vmem:[%s3314_s30 + $0x30] sm:$0x3] }
 0x95c   : > { %v3169_v49 = vpop.eup %3168 }
 0x95d   : > { %2946 = vmatprep.mubr.msk.bf16.mxu1 %vm784_vm3, %v1953_v22  ;;  %v1962_v47 = vpop.permute.xlu1 %1961  ;;  %v1951_v13 = vmul.f32 %v3169_v49, %v3758_v15  ;;  %v1954_v16 = vpack.c.bf16 %v1949_v51, %v1948_v55  ;;  %v3208_v51 = vld [vmem:[%s3314_s30 + $0x28] sm:$0xff] }
 0x95e   : > { %2942 = vmatprep.subr.bf16.mxu1 %v1962_v47 }
 0x95f   : > { %2943 = vmatpush3.bf16.msra.mxu1 %v1962_v47 }
 0x960   : > { %v3171_v50 = vpop.eup %3170 }
 0x961   : > { %v1964_v53 = vpop.permute.xlu1 %1963  ;;  %v1950_v54 = vmul.f32 %v3171_v50, %v3766_v42  ;;  %v3173_v43 = vpop.eup %3172 }
 0x962   : > { %v1981_v58 = vsel %vm890_vm5, %v1964_v53, 0  ;;  %3026 = vmatprep.subr.msk.bf16.mxu1 %vm890_vm5, %v1964_v53  ;;  %v1952_v56 = vmul.f32 %v3173_v43, %v3760_v21 }
 0x963   : > { %2945 = vmatpush3.bf16.msra.mxu1 %v1981_v58  ;;  %v1955_v59 = vpack.c.bf16 %v1951_v13, %v1950_v54 }
 0x964   : > { %3027 = vmatprep.subr.msk.bf16.mxu1 %vm1259_vm6, %v2051_v52  ;;  %v1956_v63 = vpack.c.bf16 %v1952_v56, %v1952_v56 }
 0x966   : > { %2947 = vmatmul.mubr.msk.bf16.vlgmr.msra.gmra.mrb[40].mxu1 %vm784_vm3, %v1954_v16 }
 0x967   : > { %2950 = vmatprep.mubr.msk.bf16.mxu1 %vm784_vm3, %v1955_v59  ;;  %2955 = vmatpush3.bf16.msra.mxu1 %v2065_v17 }
 0x96e   : > { %2951 = vmatmul.mubr.msk.bf16.gmra.mrb[44].mxu1 %vm784_vm3, %v1956_v63 }
 0x9d7   : > { %v2920_v12 = vpop.f32.mrb[36].mxu1 }
 0x9d8   : > { %v1771_v14 = vadd.f32 %v2920_v12, %v3774_v20  ;;  %v1751_v15 = vpop.f32.mrb[37].mxu1 }
 0x9d9   : > { %v1769_v24 = vadd.f32 %v1751_v15, %v3776_v46  ;;  %v2921_v18 = vpop.f32.mrb[38].mxu1 }
 0x9da   : > { %v1754_v42 = vpop.f32.mrb[39].mxu1 }
 0x9db   : > { %v1770_v0 = vadd.f32 %v1754_v42, %v3778_v25 }
 0xa39   : > { %v2948_v27 = vpop.f32.mrb[40].mxu1 }
 0xa3a   : > { %v2017_v2 = vpop.f32.mrb[41].mxu1 }
 0xa3b   : > { %v2949_v3 = vpop.f32.mrb[42].mxu1 }
 0xa3c   : > { %v2048_v4 = vpack.c.bf16 %v2949_v3, %v2948_v27  ;;  %v2020_v5 = vpop.f32.mrb[43].mxu1 }
 0xa3d   : > { %v2047_v21 = vpack.c.bf16 %v2020_v5, %v2017_v2 }
 0xa3f   : > { %2956 = vmatprep.mubr.msk.bf16.mxu1 %vm695_vm2, %v2047_v21 }
 0xa40   : > { %2957 = vmatmul.mubr.msk.bf16.vlgmr.msra.gmra.mrb[16].mxu1 %vm695_vm2, %v2048_v4 }
 0xa41   : > { %v2952_v20 = vpop.f32.mrb[44].mxu1 }
 0xa42   : > { %v2033_v45 = vpop.f32.mrb[45].mxu1  ;;  %v2050_v57 = vpack.c.bf16 %v2952_v20, %v2952_v20 }
 0xa43   : > { %v2953_v44 = vpop.f32.mrb[46].mxu1 }
 0xa44   : > { %v2036_v46 = vpop.f32.mrb[47].mxu1 }
 0xa45   : > { %v2049_v7 = vpack.c.bf16 %v2036_v46, %v2033_v45 }
 0xa47   : > { %2960 = vmatprep.mubr.msk.bf16.mxu1 %vm695_vm2, %v2049_v7 }
 0xa48   : > { %2961 = vmatmul.mubr.msk.bf16.gmra.mrb[48].mxu1 %vm695_vm2, %v2050_v57 }
 0xb13   : > { %v2958_v25 = vpop.f32.mrb[16].mxu1 }
 0xb14   : > { %v2101_v30 = vpop.f32.mrb[17].mxu1  ;;  %v2140_v8 = vadd.f32 %v3202_v31, %v2958_v25 }
 0xb15   : > { %v2138_v10 = vadd.f32 %v3203_v32, %v2101_v30  ;;  %v2959_v36 = vpop.f32.mrb[18].mxu1 }
 0xb16   : > { %v2104_v35 = vpop.f32.mrb[19].mxu1  ;;  %v3817_v1 = vadd.f32 %v2665_v60, %v2140_v8  ;;  %v2141_v40 = vadd.f32 %v3205_v29, %v2959_v36  ;;  %v2278_v29 = vld [vmem:[%s4025_s9] sm:$0xff] }
 0xb17   : > { %v3814_v38 = vadd.f32 %v2665_v60, %v2138_v10  ;;  %v2139_v39 = vadd.f32 %v3204_v19, %v2104_v35 }
 0xb18   : > { %v3826_v11 = vadd.f32 %v2665_v60, %v2141_v40  ;;  %v2167_v9 = vsel %vm451_vm0, %v3817_v1, 0.0  ;;  %v2279_v40 = vld [vmem:[%s4025_s9 + $0x8] sm:$0xff] }
 0xb19   : > { %v3820_v23 = vadd.f32 %v2665_v60, %v2139_v39  ;;  %v2161_v28 = vsel %vm451_vm0, %v3814_v38, 0.0 }
 0xb1a   : > { %2162 = vadd.xlane.f32.xlu0 %v2161_v28  ;;  %v2170_v53 = vsel %vm451_vm0, %v3826_v11, 0.0  ;;  %v2286_v28 = vpack.c.bf16 %v2279_v40, %v2278_v29 }
 0xb1b   : > { %v2962_v6 = vpop.f32.mrb[48].mxu1  ;;  %v2164_v26 = vsel %vm451_vm0, %v3820_v23, 0.0 }
 0xb1c   : > { %v2137_v33 = vadd.f32 %v2962_v6, %v1771_v14  ;;  %2165 = vadd.xlane.f32.xlu1 %v2164_v26  ;;  %v2117_v41 = vpop.f32.mrb[49].mxu1  ;;  %2964 = vmatprep.subr.bf16.mxu0 %v2286_v28  ;;  %v2280_v6 = vld [vmem:[%s4025_s9 + $0x10] sm:$0xff]  ;;  %v2281_v26 = vld [vmem:[%s4025_s9 + $0x18] sm:$0xff] }
 0xb1d   : > { %v2135_v62 = vadd.f32 %v2117_v41, %v1769_v24  ;;  %v2963_v61 = vpop.f32.mrb[50].mxu1  ;;  %2965 = vmatpush3.bf16.msra.mxu0 %v2286_v28 }
 0xb1e   : > { %2168 = vadd.xlane.f32.xlu0 %v2167_v9  ;;  %v2120_v22 = vpop.f32.mrb[51].mxu1  ;;  %v2144_v49 = vadd.f32 %v3207_v48, %v2137_v33  ;;  %v2287_v33 = vpack.c.bf16 %v2281_v26, %v2280_v6 }
 0xb1f   : > { %v2142_v47 = vadd.f32 %v3206_v34, %v2135_v62  ;;  %v2136_v37 = vadd.f32 %v2120_v22, %v1770_v0 }
 0xb20   : > { %v3839_v55 = vadd.f32 %v2665_v60, %v2144_v49  ;;  %2966 = vmatprep.subr.bf16.mxu0 %v2287_v33 }
 0xb21   : > { %v3832_v50 = vadd.f32 %v2665_v60, %v2142_v47  ;;  %v2143_v52 = vadd.f32 %v3208_v51, %v2136_v37  ;;  %2967 = vmatpush3.bf16.msra.mxu0 %v2287_v33 }
 0xb22   : > { %2171 = vadd.xlane.f32.xlu0 %v2170_v53  ;;  %v2179_v16 = vsel %vm470_vm1, %v3839_v55, 0.0 }
 0xb23   : > { %v3837_v54 = vadd.f32 %v2665_v60, %v2143_v52  ;;  %v2173_v58 = vsel %vm451_vm0, %v3832_v50, 0.0 }
 0xb25   : > { %v2176_v13 = vsel %vm451_vm0, %v3837_v54, 0.0 }
 0xb26   : > { %2174 = vadd.xlane.f32.xlu0 %v2173_v58  ;;  %2177 = vadd.xlane.f32.xlu1 %v2176_v13 }
 0xb2a   : > { %2180 = vadd.xlane.f32.xlu0 %v2179_v16 }
 0xba7   : > { %v2163_v17 = vpop.xlane.xlu0 %2162 }
 0xba8   : > { %v2182_v43 = vmul.f32 0.03125, %v2163_v17 }
 0xba9   : > { %v2166_v59 = vpop.xlane.xlu1 %2165 }
 0xbaa   : > { %v3848_v56 = vsub.f32 %v3814_v38, %v2182_v43  ;;  %v2183_v63 = vmul.f32 0.03125, %v2166_v59  ;;  %v2666_v43 = vld [vmem:[%s4023_s7] ss:$0 sm:$0xff] }
 0xbab   : > { %v2169_v12 = vpop.xlane.xlu0 %2168 }
 0xbac   : > { %v3851_v14 = vsub.f32 %v3820_v23, %v2183_v63  ;;  %v2184_v15 = vmul.f32 0.03125, %v2169_v12  ;;  %v2196_v24 = vmul.f32 %v3848_v56, %v3848_v56 }
 0xbae   : > { %v3856_v18 = vsub.f32 %v3817_v1, %v2184_v15  ;;  %v2203_v42 = vsel %vm451_vm0, %v2196_v24, 0.0  ;;  %v2197_v0 = vmul.f32 %v3851_v14, %v3851_v14 }
 0xbaf   : > { %v2172_v27 = vpop.xlane.xlu0 %2171  ;;  %2204 = vadd.xlane.f32.xlu1 %v2203_v42 }
 0xbb0   : > { %v2185_v2 = vmul.f32 0.03125, %v2172_v27  ;;  %v2206_v3 = vsel %vm451_vm0, %v2197_v0, 0.0  ;;  %v2198_v4 = vmul.f32 %v3856_v18, %v3856_v18 }
 0xbb1   : > { %2207 = vadd.xlane.f32.xlu0 %v2206_v3  ;;  %v2667_v3 = vld [vmem:[%s4024_s8] ss:$0 sm:$0xff] }
 0xbb2   : > { %v3865_v5 = vsub.f32 %v3826_v11, %v2185_v2  ;;  %v2209_v21 = vsel %vm451_vm0, %v2198_v4, 0.0 }
 0xbb3   : > { %v2175_v20 = vpop.xlane.xlu0 %2174  ;;  %2210 = vadd.xlane.f32.xlu1 %v2209_v21  ;;  %v2178_v45 = vpop.xlane.xlu1 %2177 }
 0xbb4   : > { %v2186_v44 = vmul.f32 0.03125, %v2175_v20  ;;  %v2187_v46 = vmul.f32 0.03125, %v2178_v45  ;;  %v2199_v7 = vmul.f32 %v3865_v5, %v3865_v5 }
 0xbb6   : > { %v3871_v57 = vsub.f32 %v3832_v50, %v2186_v44  ;;  %v3874_v25 = vsub.f32 %v3837_v54, %v2187_v46  ;;  %v2212_v60 = vsel %vm451_vm0, %v2199_v7, 0.0 }
 0xbb7   : > { %2213 = vadd.xlane.f32.xlu0 %v2212_v60  ;;  %v2181_v30 = vpop.xlane.xlu0 %2180 }
 0xbb8   : > { %v2188_v31 = vmul.f32 0.03125, %v2181_v30  ;;  %v2200_v8 = vmul.f32 %v3871_v57, %v3871_v57  ;;  %v2201_v32 = vmul.f32 %v3874_v25, %v3874_v25 }
 0xbba   : > { %v3882_v10 = vsub.f32 %v3839_v55, %v2188_v31  ;;  %v2215_v36 = vsel %vm451_vm0, %v2200_v8, 0.0  ;;  %v2218_v35 = vsel %vm451_vm0, %v2201_v32, 0.0 }
 0xbbb   : > { %2216 = vadd.xlane.f32.xlu1 %v2215_v36  ;;  %2219 = vadd.xlane.f32.xlu0 %v2218_v35 }
 0xbbc   : > { %v2202_v19 = vmul.f32 %v3882_v10, %v3882_v10 }
 0xbbe   : > { %v2221_v39 = vsel %vm470_vm1, %v2202_v19, 0.0 }
 0xbbf   : > { %2222 = vadd.xlane.f32.xlu1 %v2221_v39 }
 0xc3c   : > { %v2205_v41 = vpop.xlane.xlu1 %2204 }
 0xc3d   : > { %v2224_v62 = vmul.f32 0.03125, %v2205_v41 }
 0xc3e   : > { %v2208_v61 = vpop.xlane.xlu0 %2207 }
 0xc3f   : > { %v2231_v9 = vadd.f32 1e-05, %v2224_v62  ;;  %v2225_v22 = vmul.f32 0.03125, %v2208_v61  ;;  %v2436_v62 = vld [vmem:[%s4027_s11 + $0x10] sm:$0xff]  ;;  %v2437_v61 = vld [vmem:[%s4027_s11 + $0x18] sm:$0xff] }
 0xc40   : > { %v2211_v34 = vpop.xlane.xlu1 %2210 }
 0xc41   : > { %3174 = vrsqrt.f32 %v2231_v9  ;;  %v2232_v47 = vadd.f32 1e-05, %v2225_v22  ;;  %v2226_v37 = vmul.f32 0.03125, %v2211_v34  ;;  %v2447_v9 = vpack.c.bf16 %v2437_v61, %v2436_v62  ;;  %v2438_v22 = vld [vmem:[%s4027_s11 + $0x20] sm:$0xff]  ;;  %v2439_v34 = vld [vmem:[%s4027_s11 + $0x28] sm:$0xff] }
 0xc43   : > { %3176 = vrsqrt.f32 %v2232_v47  ;;  %v2233_v48 = vadd.f32 1e-05, %v2226_v37  ;;  %v2448_v47 = vpack.c.bf16 %v2439_v34, %v2438_v22  ;;  %v2440_v37 = vld [vmem:[%s4027_s11 + $0x30] sm:$0xff] }
 0xc44   : > { %v2214_v49 = vpop.xlane.xlu0 %2213 }
 0xc45   : > { %3178 = vrsqrt.f32 %v2233_v48  ;;  %v2227_v51 = vmul.f32 0.03125, %v2214_v49  ;;  %v2441_v48 = vld [vmem:[%s4027_s11 + $0x38] sm:$0xff] }
 0xc46   : > { %v2449_v49 = vpack.c.bf16 %v2441_v48, %v2440_v37 }
 0xc47   : > { %v2234_v52 = vadd.f32 1e-05, %v2227_v51  ;;  %v2668_v51 = vld [vmem:[%s4026_s10] ss:$0 sm:$0xff] }
 0xc48   : > { %v2220_v53 = vpop.xlane.xlu0 %2219  ;;  %v2217_v58 = vpop.xlane.xlu1 %2216 }
 0xc49   : > { %3180 = vrsqrt.f32 %v2234_v52  ;;  %v2229_v13 = vmul.f32 0.03125, %v2220_v53  ;;  %v2228_v16 = vmul.f32 0.03125, %v2217_v58 }
 0xc4b   : > { %v3175_v17 = vpop.eup %3174  ;;  %v2236_v59 = vadd.f32 1e-05, %v2229_v13  ;;  %v2235_v63 = vadd.f32 1e-05, %v2228_v16 }
 0xc4c   : > { %v2245_v12 = vmul.f32 %v3175_v17, %v3848_v56  ;;  %v2223_v15 = vpop.xlane.xlu1 %2222 }
 0xc4d   : > { %v3177_v24 = vpop.eup %3176  ;;  %3182 = vrsqrt.f32 %v2236_v59  ;;  %v2230_v42 = vmul.f32 0.03125, %v2223_v15 }
 0xc4e   : > { %v2246_v0 = vmul.f32 %v3177_v24, %v3851_v14  ;;  %3184 = vrsqrt.f32 %v2235_v63  ;;  %v2258_v27 = vmul.f32 %v2666_v43, %v2245_v12 }
 0xc4f   : > { %v3179_v2 = vpop.eup %3178  ;;  %v2237_v4 = vadd.f32 1e-05, %v2230_v42 }
 0xc50   : > { %v2247_v21 = vmul.f32 %v3179_v2, %v3856_v18  ;;  %v2259_v20 = vmul.f32 %v2666_v43, %v2246_v0  ;;  %v2271_v45 = vadd.f32 %v2667_v3, %v2258_v27 }
 0xc51   : > { %3186 = vrsqrt.f32 %v2237_v4 }
 0xc52   : > { %v2272_v56 = vadd.f32 %v2667_v3, %v2259_v20  ;;  %v2260_v46 = vmul.f32 %v2666_v43, %v2247_v21 }
 0xc53   : > { %v3181_v44 = vpop.eup %3180 }
 0xc54   : > { %v2248_v7 = vmul.f32 %v3181_v44, %v3865_v5  ;;  %v2282_v60 = vpack.c.bf16 %v2272_v56, %v2271_v45  ;;  %v2273_v8 = vadd.f32 %v2667_v3, %v2260_v46 }
 0xc56   : > { %v2261_v14 = vmul.f32 %v2666_v43, %v2248_v7  ;;  %2968 = vmatprep.mubr.msk.bf16.mxu0 %vm451_vm0, %v2282_v60 }
 0xc57   : > { %v3183_v30 = vpop.eup %3182 }
 0xc58   : > { %v3185_v31 = vpop.eup %3184  ;;  %v2274_v32 = vadd.f32 %v2667_v3, %v2261_v14  ;;  %v2250_v36 = vmul.f32 %v3183_v30, %v3874_v25  ;;  %v2435_v25 = vld [vmem:[%s4027_s11 + $0x8] sm:$0xff] }
 0xc59   : > { %v2249_v18 = vmul.f32 %v3185_v31, %v3871_v57  ;;  %v2434_v57 = vld [vmem:[%s4027_s11] sm:$0xff] }
 0xc5a   : > { %v2283_v35 = vpack.c.bf16 %v2274_v32, %v2273_v8  ;;  %v2263_v19 = vmul.f32 %v2666_v43, %v2250_v36 }
 0xc5b   : > { %v3187_v39 = vpop.eup %3186  ;;  %v2262_v29 = vmul.f32 %v2666_v43, %v2249_v18 }
 0xc5c   : > { %v2251_v40 = vmul.f32 %v3187_v39, %v3882_v10  ;;  %2969 = vmatmul.mubr.msk.bf16.vlgmr.msra.gmra.mrb[40].mxu0 %vm451_vm0, %v2283_v35  ;;  %v2276_v5 = vadd.f32 %v2667_v3, %v2263_v19  ;;  %v2446_v10 = vpack.c.bf16 %v2435_v25, %v2434_v57 }
 0xc5d   : > { %v2275_v28 = vadd.f32 %v2667_v3, %v2262_v29 }
 0xc5e   : > { %v2264_v6 = vmul.f32 %v2666_v43, %v2251_v40  ;;  %2976 = vmatprep.subr.bf16.mxu0 %v2446_v10 }
 0xc5f   : > { %v2284_v26 = vpack.c.bf16 %v2276_v5, %v2275_v28  ;;  %2977 = vmatpush3.bf16.msra.mxu0 %v2446_v10 }
 0xc60   : > { %v2277_v33 = vadd.f32 %v2667_v3, %v2264_v6  ;;  %2978 = vmatprep.subr.bf16.mxu0 %v2447_v9 }
 0xc61   : > { %2972 = vmatprep.mubr.msk.bf16.mxu0 %vm451_vm0, %v2284_v26 }
 0xc62   : > { %v2285_v41 = vpack.c.bf16 %v2277_v33, %v2277_v33 }
 0xc63   : > { %2979 = vmatpush3.bf16.msra.mxu0 %v2447_v9 }
 0xc64   : > { %2973 = vmatmul.mubr.msk.bf16.gmra.mrb[44].mxu0 %vm451_vm0, %v2285_v41  ;;  %2980 = vmatprep.subr.bf16.mxu0 %v2448_v47 }
 0xc67   : > { %2981 = vmatpush3.bf16.msra.mxu0 %v2448_v47 }
 0xc68   : > { %2982 = vmatprep.subr.bf16.mxu0 %v2449_v49 }
 0xc6b   : > { %2983 = vmatpush3.bf16.msra.mxu0 %v2449_v49 }
 0xd2f   : > { %v2970_v52 = vpop.f32.mrb[40].mxu0 }
 0xd30   : > { %v3945_v53 = vadd.f32 %v2970_v52, %v2668_v51  ;;  %v2341_v58 = vpop.f32.mrb[41].mxu0 }
 0xd31   : > { %v3947_v13 = vadd.f32 %v2668_v51, %v2341_v58  ;;  %v2971_v16 = vpop.f32.mrb[42].mxu0 }
 0xd32   : > { %v2373_v17 = vmul.f32 %v3945_v53, %v3945_v53  ;;  %v3951_v43 = vadd.f32 %v2971_v16, %v2668_v51  ;;  %v2344_v59 = vpop.f32.mrb[43].mxu0 }
 0xd33   : > { %v2371_v63 = vmul.f32 %v3947_v13, %v3947_v13  ;;  %v3955_v12 = vadd.f32 %v2668_v51, %v2344_v59 }
 0xd34   : > { %v2380_v15 = vmul.f32 %v2373_v17, %v3945_v53  ;;  %v2374_v24 = vmul.f32 %v3951_v43, %v3951_v43 }
 0xd35   : > { %v2378_v42 = vmul.f32 %v2371_v63, %v3947_v13  ;;  %v2372_v0 = vmul.f32 %v3955_v12, %v3955_v12 }
 0xd36   : > { %v2387_v27 = vmul.f32 0.044715, %v2380_v15  ;;  %v2381_v2 = vmul.f32 %v2374_v24, %v3951_v43 }
 0xd37   : > { %v2385_v3 = vmul.f32 0.044715, %v2378_v42  ;;  %v2379_v4 = vmul.f32 %v2372_v0, %v3955_v12  ;;  %v2974_v21 = vpop.f32.mrb[44].mxu0 }
 0xd38   : > { %v2394_v20 = vadd.f32 %v2387_v27, %v3945_v53  ;;  %v2388_v45 = vmul.f32 0.044715, %v2381_v2  ;;  %v3966_v56 = vadd.f32 %v2974_v21, %v2668_v51  ;;  %v2357_v44 = vpop.f32.mrb[45].mxu0 }
 0xd39   : > { %v2392_v46 = vadd.f32 %v2385_v3, %v3947_v13  ;;  %v2386_v7 = vmul.f32 0.044715, %v2379_v4  ;;  %v3969_v60 = vadd.f32 %v2668_v51, %v2357_v44  ;;  %v2975_v14 = vpop.f32.mrb[46].mxu0 }
 0xd3a   : > { %v2401_v30 = vmul.f32 0.7978846, %v2394_v20  ;;  %v2395_v31 = vadd.f32 %v2388_v45, %v3951_v43  ;;  %v2377_v8 = vmul.f32 %v3966_v56, %v3966_v56  ;;  %v2360_v32 = vpop.f32.mrb[47].mxu0 }
 0xd3b   : > { %v2399_v36 = vmul.f32 0.7978846, %v2392_v46  ;;  %v2393_v18 = vadd.f32 %v2386_v7, %v3955_v12  ;;  %v2375_v35 = vmul.f32 %v3969_v60, %v3969_v60  ;;  %v2361_v19 = vadd.f32 %v2668_v51, %v2360_v32 }
 0xd3c   : > { %3188 = vtanh.f32 %v2401_v30  ;;  %v2402_v39 = vmul.f32 0.7978846, %v2395_v31  ;;  %v2384_v29 = vmul.f32 %v2377_v8, %v3966_v56  ;;  %v2673_v30 = vld [vmem:[%s4028_s12] ss:$0 sm:$0xff] }
 0xd3d   : > { %3190 = vtanh.f32 %v2399_v36  ;;  %v2400_v40 = vmul.f32 0.7978846, %v2393_v18  ;;  %v2382_v5 = vmul.f32 %v2375_v35, %v3969_v60  ;;  %v2376_v28 = vmul.f32 %v2361_v19, %v2361_v19 }
 0xd3e   : > { %3192 = vtanh.f32 %v2402_v39  ;;  %v2391_v6 = vmul.f32 0.044715, %v2384_v29 }
 0xd3f   : > { %3194 = vtanh.f32 %v2400_v40  ;;  %v2389_v26 = vmul.f32 0.044715, %v2382_v5  ;;  %v2383_v33 = vmul.f32 %v2376_v28, %v2361_v19 }
 0xd40   : > { %v2398_v41 = vadd.f32 %v2391_v6, %v3966_v56 }
 0xd41   : > { %v2396_v57 = vadd.f32 %v2389_v26, %v3969_v60  ;;  %v2390_v25 = vmul.f32 0.044715, %v2383_v33 }
 0xd42   : > { %v2405_v10 = vmul.f32 0.7978846, %v2398_v41 }
 0xd43   : > { %v2403_v62 = vmul.f32 0.7978846, %v2396_v57  ;;  %v2397_v61 = vadd.f32 %v2390_v25, %v2361_v19 }
 0xd44   : > { %3196 = vtanh.f32 %v2405_v10 }
 0xd45   : > { %3198 = vtanh.f32 %v2403_v62  ;;  %v2404_v9 = vmul.f32 0.7978846, %v2397_v61 }
 0xd46   : > { %v3189_v22 = vpop.eup %3188 }
 0xd47   : > { %v3191_v34 = vpop.eup %3190  ;;  %v2415_v47 = vadd.f32 1.0, %v3189_v22  ;;  %3200 = vtanh.f32 %v2404_v9 }
 0xd48   : > { %v3193_v37 = vpop.eup %3192  ;;  %v2413_v48 = vadd.f32 1.0, %v3191_v34 }
 0xd49   : > { %v3195_v49 = vpop.eup %3194  ;;  %v2422_v51 = vmul.f32 0.5, %v2415_v47  ;;  %v2416_v52 = vadd.f32 1.0, %v3193_v37 }
 0xd4a   : > { %v2420_v58 = vmul.f32 0.5, %v2413_v48  ;;  %v2414_v16 = vadd.f32 1.0, %v3195_v49 }
 0xd4b   : > { %v2423_v17 = vmul.f32 0.5, %v2416_v52  ;;  %v2429_v63 = vmul.f32 %v2422_v51, %v3945_v53 }
 0xd4c   : > { %v2421_v59 = vmul.f32 0.5, %v2414_v16  ;;  %v2427_v42 = vmul.f32 %v2420_v58, %v3947_v13 }
 0xd4d   : > { %v2430_v15 = vmul.f32 %v2423_v17, %v3951_v43 }
 0xd4e   : > { %v3197_v24 = vpop.eup %3196  ;;  %v2428_v0 = vmul.f32 %v2421_v59, %v3955_v12 }
 0xd4f   : > { %v3199_v27 = vpop.eup %3198  ;;  %v2443_v2 = vpack.c.bf16 %v2430_v15, %v2429_v63  ;;  %v2419_v3 = vadd.f32 1.0, %v3197_v24 }
 0xd50   : > { %v2417_v4 = vadd.f32 1.0, %v3199_v27  ;;  %v2442_v21 = vpack.c.bf16 %v2428_v0, %v2427_v42 }
 0xd51   : > { %v3201_v20 = vpop.eup %3200  ;;  %v2426_v45 = vmul.f32 0.5, %v2419_v3 }
 0xd52   : > { %v2424_v44 = vmul.f32 0.5, %v2417_v4  ;;  %v2418_v46 = vadd.f32 1.0, %v3201_v20  ;;  %2984 = vmatprep.mubr.msk.bf16.mxu0 %vm2457_vm7, %v2442_v21 }
 0xd53   : > { %2985 = vmatmul.mubr.msk.bf16.vlgmr.msra.gmra.mrb[48].mxu0 %vm2457_vm7, %v2443_v2  ;;  %v2433_v13 = vmul.f32 %v2426_v45, %v3966_v56 }
 0xd54   : > { %v2425_v53 = vmul.f32 0.5, %v2418_v46  ;;  %v2431_v43 = vmul.f32 %v2424_v44, %v3969_v60 }
 0xd55   : > { %v2445_v14 = vpack.c.bf16 %v2433_v13, %v2433_v13 }
 0xd56   : > { %v2432_v12 = vmul.f32 %v2425_v53, %v2361_v19 }
 0xd58   : > { %v2444_v7 = vpack.c.bf16 %v2432_v12, %v2431_v43 }
 0xd5a   : > { %2988 = vmatprep.mubr.msk.bf16.mxu0 %vm2457_vm7, %v2444_v7 }
 0xd5b   : > { %2989 = vmatmul.mubr.msk.bf16.gmra.mrb[52].mxu0 %vm2457_vm7, %v2445_v14 }
 0xe26   : > { %v2986_v31 = vpop.f32.mrb[48].mxu0 }
 0xe27   : > { %v2513_v8 = vadd.f32 %v2986_v31, %v2673_v30  ;;  %v2504_v32 = vpop.f32.mrb[49].mxu0 }
 0xe28   : > { %v2505_v56 = vadd.f32 %v2673_v30, %v2504_v32  ;;  %v2987_v60 = vpop.f32.mrb[50].mxu0 }
 0xe29   : > { %v2536_v36 = vadd.f32 %v2513_v8, %v3817_v1  ;;  %v2516_v18 = vadd.f32 %v2987_v60, %v2673_v30  ;;  %v2507_v35 = vpop.f32.mrb[51].mxu0 }
 0xe2a   : > { %v2534_v19 = vadd.f32 %v2505_v56, %v3814_v38  ;;  %v2508_v39 = vadd.f32 %v2673_v30, %v2507_v35 }
 0xe2b   : > { %2543 = vst.msk [vmem:[%s440_s15 + $0x10] sm:$0xff] %vm451_vm0, %v2536_v36  ;;  %v2537_v29 = vadd.f32 %v2516_v18, %v3826_v11 }
 0xe2c   : > { %2541 = vst.msk [vmem:[%s440_s15] sm:$0xff] %vm451_vm0, %v2534_v19  ;;  %v2535_v40 = vadd.f32 %v2508_v39, %v3820_v23 }
 0xe2d   : > { %2544 = vst.msk [vmem:[%s440_s15 + $0x18] sm:$0xff] %vm451_vm0, %v2537_v29 }
 0xe2e   : > { %2542 = vst.msk [vmem:[%s440_s15 + $0x8] sm:$0xff] %vm451_vm0, %v2535_v40  ;;  %v2990_v5 = vpop.f32.mrb[52].mxu0 }
 0xe2f   : > { %v2529_v28 = vadd.f32 %v2990_v5, %v2673_v30  ;;  %v2520_v1 = vpop.f32.mrb[53].mxu0 }
 0xe30   : > { %v2521_v6 = vadd.f32 %v2673_v30, %v2520_v1  ;;  %v2991_v26 = vpop.f32.mrb[54].mxu0 }
 0xe31   : > { %v2540_v38 = vadd.f32 %v2529_v28, %v3839_v55  ;;  %v2523_v33 = vpop.f32.mrb[55].mxu0 }
 0xe32   : > { %v2538_v41 = vadd.f32 %v2521_v6, %v3832_v50  ;;  %v2524_v57 = vadd.f32 %v2673_v30, %v2523_v33 }
 0xe33   : > { %2547 = vst.msk [vmem:[%s440_s15 + $0x30] sm:$0x3] %vm470_vm1, %v2540_v38 }
 0xe34   : > { %2545 = vst.msk [vmem:[%s440_s15 + $0x20] sm:$0xff] %vm451_vm0, %v2538_v41  ;;  %v2539_v23 = vadd.f32 %v2524_v57, %v3837_v54 }
 0xe36   : > { %2546 = vst.msk [vmem:[%s440_s15 + $0x28] sm:$0xff] %vm451_vm0, %v2539_v23 }
 0xe37 PF: > { %s23_s25 = sadd.s32 1, %s3215_s25  }
 0xe38   : > { %p20_p4 = scmp.ge.s32.totalorder %s23_s25, 6  }
 0xe3a   :  { %22 = sbr.rel (!%p20_p4) target bundleno = 1 (0x1), region = 102 }

</bundles_post_ra>
